<compile_context>
chip_gen: v5e
topology: v5e:2x2
jax: 0.10.0
libtpu: 0.0.40
codegen_flags: <defaults>
</compile_context>

<pallas_src>
import functools

import jax
import jax.numpy as jnp
from jax.experimental import pallas as pl
from jax.experimental.pallas import tpu as pltpu

EPS = 1e-8


# ---------------------------------------------------------------------------
# Fused Pallas kernel: front -> TCN blocks -> out head (one batch element)
# ---------------------------------------------------------------------------
def _separator_kernel(x_ref, bnw_ref, bnb_ref, w1_ref, ch_ref, rsw_ref,
                      rsb_ref, alph_ref, oa_ref, ow_ref, ob_ref, o_ref,
                      *, dilations, bn_dim, hidden_dim):
    x = x_ref[...]                                  # (in_dim, T), batch squeezed
    T = x.shape[1]
    H = hidden_dim

    def norm_stats(z):
        # Single-pass GroupNorm(1 group) stats over the whole (C, T) tile.
        # The sum and sum-of-squares are fused into ONE lane reduction of the
        # stacked [z ; z*z] tile; only two tiny (C,1) sublane sums remain.
        C = z.shape[0]
        n = float(C * T)
        zz = jnp.concatenate([z, z * z], axis=0)            # (2C, T)
        col = jnp.sum(zz, axis=1, keepdims=True)            # (2C, 1)
        s = jnp.sum(col[:C], keepdims=True)                 # (1, 1)
        s2 = jnp.sum(col[C:], keepdims=True)                # (1, 1)
        m = s / n
        v = jnp.maximum(s2 / n - m * m, 0.0)
        return m, jax.lax.rsqrt(v + EPS)

    # ---- front: GroupNorm (affine folded into bn weights) + 1x1 conv -------
    m0, r0 = norm_stats(x)
    xhat = (x - m0) * r0
    xb = jnp.dot(bnw_ref[...], xhat,
                 preferred_element_type=jnp.float32) + bnb_ref[...]

    skip = jnp.zeros_like(xb)
    for blk, d in enumerate(dilations):             # static unroll over blocks
        ch = ch_ref[blk]                            # (7*H, 1) packed params
        b1, g1, be1 = ch[0:H], ch[H:2 * H], ch[2 * H:3 * H]
        dw0, dw1, dw2, db = (ch[3 * H:4 * H], ch[4 * H:5 * H],
                             ch[5 * H:6 * H], ch[6 * H:7 * H])
        a1 = alph_ref[blk, 0]                       # PReLU alphas from SMEM
        a2 = alph_ref[blk, 1]

        # 1x1 conv -> PReLU -> GroupNorm (scale/shift form, affine kept: the
        # depthwise zero-padding depends on the post-affine values)
        h = jnp.dot(w1_ref[blk], xb,
                    preferred_element_type=jnp.float32) + b1
        h = jnp.where(h >= 0, h, a1 * h)
        m1, r1 = norm_stats(h)
        scale1 = g1 * r1                            # (H, 1)
        u = h * scale1 + (be1 - m1 * scale1)

        # depthwise dilated conv, kernel=3, padding=d (same length):
        #   y[c,t] = dw0[c]*u[c,t-d] + dw1[c]*u[c,t] + dw2[c]*u[c,t+d] + db[c]
        # shifted operands built by zero-block concat along the lane axis.
        zpad = jnp.zeros((H, d), dtype=u.dtype)
        u_m = jnp.concatenate([zpad, u[:, :T - d]], axis=1)   # u[:, t-d]
        u_p = jnp.concatenate([u[:, d:], zpad], axis=1)       # u[:, t+d]
        y = dw0 * u_m + dw1 * u + dw2 * u_p + db

        # PReLU -> GroupNorm (its affine is folded into rsw/rsb at pack time)
        y = jnp.where(y >= 0, y, a2 * y)
        m2, r2 = norm_stats(y)
        yhat = (y - m2) * r2

        # fused residual + skip 1x1 convs (shared RHS): one (2*bn, H) matmul
        rs = jnp.dot(rsw_ref[blk], yhat,
                     preferred_element_type=jnp.float32) + rsb_ref[blk]
        xb = xb + rs[:bn_dim]
        skip = skip + rs[bn_dim:]

    # ---- out head: PReLU + 1x1 conv (bn_dim -> out_dim) --------------------
    oa = oa_ref[0, 0]
    s = jnp.where(skip >= 0, skip, oa * skip)
    o = jnp.dot(ow_ref[...], s,
                preferred_element_type=jnp.float32) + ob_ref[...]
    o_ref[...] = o.astype(o_ref.dtype)


# ---------------------------------------------------------------------------
# Wrapper (single pallas_call for the whole forward)
# ---------------------------------------------------------------------------
def _rep_spec(a):
    """Full-array block, replicated across the batch grid."""
    zeros = (0,) * a.ndim
    return pl.BlockSpec(a.shape, lambda b, _z=zeros: _z)


def separator_forward(x, packed):
    """Pallas-backed Separator.forward (causal=False, dilated=True)."""
    B, in_dim, T = x.shape
    bn_dim = packed["bn_w"].shape[0]
    hidden_dim = packed["w1_all"].shape[1]
    out_dim = packed["out_w"].shape[0]
    dilations = packed["dilations"]

    kernel = functools.partial(_separator_kernel, dilations=dilations,
                               bn_dim=bn_dim, hidden_dim=hidden_dim)

    smem_spec = pl.BlockSpec(memory_space=pltpu.MemorySpace.SMEM)

    args = (x, packed["bn_w"], packed["bn_b"], packed["w1_all"],
            packed["ch_all"], packed["rsw_all"], packed["rsb_all"],
            packed["alphas"], packed["out_a"], packed["out_w"], packed["out_b"])

    in_specs = [
        pl.BlockSpec((None, in_dim, T), lambda b: (b, 0, 0)),   # x (batch-sliced)
        _rep_spec(packed["bn_w"]), _rep_spec(packed["bn_b"]),
        _rep_spec(packed["w1_all"]), _rep_spec(packed["ch_all"]),
        _rep_spec(packed["rsw_all"]), _rep_spec(packed["rsb_all"]),
        smem_spec, smem_spec,                                   # alphas, out_a
        _rep_spec(packed["out_w"]), _rep_spec(packed["out_b"]),
    ]

    return pl.pallas_call(
        kernel,
        out_shape=jax.ShapeDtypeStruct((B, out_dim, T), x.dtype),
        grid=(B,),
        in_specs=in_specs,
        out_specs=pl.BlockSpec((None, out_dim, T), lambda b: (b, 0, 0)),
        compiler_params=pltpu.CompilerParams(
            dimension_semantics=("parallel",),
            vmem_limit_bytes=32 * 1024 * 1024),
    )(*args)


# ---------------------------------------------------------------------------
# Parameter construction (shapes per the PyTorch module) + packing
# ---------------------------------------------------------------------------
def init_params(key, in_dim, out_dim, bn_dim, hidden_dim, layers, stack):
    keys = iter(jax.random.split(key, 256))

    def nrm(shape, scale=0.1):
        return scale * jax.random.normal(next(keys), shape, dtype=jnp.float32)

    params = {
        "ln_g": 1.0 + nrm((in_dim, 1)),      # GroupNorm(1, in_dim) weight
        "ln_b": nrm((in_dim, 1)),            # GroupNorm(1, in_dim) bias
        "bn_w": nrm((bn_dim, in_dim)),       # Conv1d(in_dim, bn_dim, 1)
        "bn_b": nrm((bn_dim, 1)),
        "out_a": 0.25 + nrm((1, 1), 0.05),   # nn.PReLU scalar alpha
        "out_w": nrm((out_dim, bn_dim)),     # Conv1d(bn_dim, out_dim, 1)
        "out_b": nrm((out_dim, 1)),
        "tcn": [],
    }
    for _s in range(stack):
        for layer_id in range(layers):
            d = 2 ** layer_id                # dilated=True
            params["tcn"].append({
                "dilation": d,
                "w1": nrm((hidden_dim, bn_dim)), "b1": nrm((hidden_dim, 1)),
                "a1": 0.25 + nrm((1, 1), 0.05),
                "g1": 1.0 + nrm((hidden_dim, 1)), "be1": nrm((hidden_dim, 1)),
                # depthwise Conv1d(hidden, hidden, 3, groups=hidden) taps
                "dw0": nrm((hidden_dim, 1)), "dw1": nrm((hidden_dim, 1)),
                "dw2": nrm((hidden_dim, 1)), "db": nrm((hidden_dim, 1)),
                "a2": 0.25 + nrm((1, 1), 0.05),
                "g2": 1.0 + nrm((hidden_dim, 1)), "be2": nrm((hidden_dim, 1)),
                "rw": nrm((bn_dim, hidden_dim)), "rb": nrm((bn_dim, 1)),
                "sw": nrm((bn_dim, hidden_dim)), "sb": nrm((bn_dim, 1)),
            })
    return params


def pack_params(p):
    """Pack per-block params into stacked arrays; fold GroupNorm affines."""
    tcn = p["tcn"]
    H = tcn[0]["w1"].shape[0]
    in_dim = p["bn_w"].shape[1]

    # Front fold: bn(W @ (g*xhat + b) + c) == (W*g^T) @ xhat + (W@b + c)
    bn_w_f = p["bn_w"] * p["ln_g"].reshape(1, in_dim)
    bn_b_f = p["bn_w"] @ p["ln_b"] + p["bn_b"]

    def chan_pack(b):
        # 7*H per-channel columns: [b1, g1, be1, dw0, dw1, dw2, db]
        return jnp.concatenate(
            [b["b1"], b["g1"], b["be1"], b["dw0"], b["dw1"], b["dw2"],
             b["db"]], axis=0)                                 # (7*H, 1)

    rsw, rsb = [], []
    for b in tcn:
        W = jnp.concatenate([b["rw"], b["sw"]], axis=0)        # (2*bn, H)
        c = jnp.concatenate([b["rb"], b["sb"]], axis=0)        # (2*bn, 1)
        # Fold the second GroupNorm affine (g2, be2) into the fused matmul.
        rsw.append(W * b["g2"].reshape(1, H))
        rsb.append(W @ b["be2"] + c)

    alphas = jnp.stack(
        [jnp.stack([b["a1"][0, 0], b["a2"][0, 0]]) for b in tcn])  # (L, 2)

    return {
        "dilations": tuple(int(b["dilation"]) for b in tcn),
        "bn_w": bn_w_f, "bn_b": bn_b_f,
        "w1_all": jnp.stack([b["w1"] for b in tcn]),            # (L, H, bn)
        "ch_all": jnp.stack([chan_pack(b) for b in tcn]),       # (L, 7*H, 1)
        "rsw_all": jnp.stack(rsw),                              # (L, 2*bn, H)
        "rsb_all": jnp.stack(rsb),                              # (L, 2*bn, 1)
        "alphas": alphas,                                       # (L, 2) SMEM
        "out_a": p["out_a"],                                    # (1, 1) SMEM
        "out_w": p["out_w"], "out_b": p["out_b"],
    }


# ---------------------------------------------------------------------------
# Pure-JAX reference (mirrors the PyTorch forward) for verification
# ---------------------------------------------------------------------------
def ref_forward(x, params):
    def gn(z, g, b):
        m = jnp.mean(z, axis=(1, 2), keepdims=True)
        v = jnp.mean((z - m) ** 2, axis=(1, 2), keepdims=True)
        return g[None] * ((z - m) * jax.lax.rsqrt(v + EPS)) + b[None]

    def pw(z, w, b):
        return jnp.einsum("oc,bct->bot", w, z) + b[None]

    def prelu(z, a):
        return jnp.where(z >= 0, z, a[0, 0] * z)

    T = x.shape[-1]
    x = pw(gn(x, params["ln_g"], params["ln_b"]), params["bn_w"], params["bn_b"])
    skip_c = jnp.zeros_like(x)
    for p in params["tcn"]:
        d = p["dilation"]
        h = gn(prelu(pw(x, p["w1"], p["b1"]), p["a1"]), p["g1"], p["be1"])
        hp = jnp.pad(h, ((0, 0), (0, 0), (d, d)))
        y = (p["dw0"][None] * hp[:, :, 0:T] + p["dw1"][None] * hp[:, :, d:d + T]
             + p["dw2"][None] * hp[:, :, 2 * d:2 * d + T] + p["db"][None])
        y = gn(prelu(y, p["a2"]), p["g2"], p["be2"])
        x = x + pw(y, p["rw"], p["rb"])
        skip_c = skip_c + pw(y, p["sw"], p["sb"])
    return pw(prelu(skip_c, params["out_a"]), params["out_w"], params["out_b"])


# ---------------------------------------------------------------------------
if __name__ == "__main__":
    # Separator(in_dim=16, out_dim=32, bn_dim=16, hidden_dim=32,
    #           layers=2, stack=2, kernel=3, causal=False, dilated=True)
    B, in_dim, out_dim, bn_dim, hidden_dim = 2, 16, 32, 16, 32
    layers, stack, T = 2, 2, 128

    key = jax.random.PRNGKey(0)
    pkey, xkey = jax.random.split(key)
    params = init_params(pkey, in_dim, out_dim, bn_dim, hidden_dim, layers, stack)
    x = jax.random.normal(xkey, (B, in_dim, T), dtype=jnp.float32)

    packed = pack_params(params)
    out = jax.block_until_ready(separator_forward(x, packed))

    ref = ref_forward(x, params)
    assert out.shape == (B, out_dim, T)
    max_err = float(jnp.max(jnp.abs(out - ref)))
    assert max_err < 1e-3, f"max abs err {max_err}"
    print("KERNEL_OK")
</pallas_src>

<mosaic_0001>
module attributes {stable_mosaic.version = 11 : i64} {
  func.func @_separator_kernel(%arg0: i32, %arg1: memref<1x16x128xf32, #tpu.memory_space<vmem>>, %arg2: memref<16x16xf32, #tpu.memory_space<vmem>>, %arg3: memref<16x1xf32, #tpu.memory_space<vmem>>, %arg4: memref<4x32x16xf32, #tpu.memory_space<vmem>>, %arg5: memref<4x224x1xf32, #tpu.memory_space<vmem>>, %arg6: memref<4x32x32xf32, #tpu.memory_space<vmem>>, %arg7: memref<4x32x1xf32, #tpu.memory_space<vmem>>, %arg8: memref<4x2xf32, #tpu.memory_space<smem>>, %arg9: memref<1x1xf32, #tpu.memory_space<smem>>, %arg10: memref<32x16xf32, #tpu.memory_space<vmem>>, %arg11: memref<32x1xf32, #tpu.memory_space<vmem>>, %arg12: memref<1x32x128xf32, #tpu.memory_space<vmem>>) attributes {dimension_semantics = [#tpu.dimension_semantics<parallel>], iteration_bounds = array<i64: 2>, scalar_prefetch = 0 : i64, scratch_operands = 0 : i64, tpu.core_type = #tpu.core_type<tc>, window_params = [{transform_indices = @transform_0, window_bounds = array<i64: 1, 16, 128>}, {pipeline_mode = #tpu.pipeline_mode<synchronous>, transform_indices = @transform_1, window_bounds = array<i64: 16, 16>}, {pipeline_mode = #tpu.pipeline_mode<synchronous>, transform_indices = @transform_2, window_bounds = array<i64: 16, 1>}, {pipeline_mode = #tpu.pipeline_mode<synchronous>, transform_indices = @transform_3, window_bounds = array<i64: 4, 32, 16>}, {pipeline_mode = #tpu.pipeline_mode<synchronous>, transform_indices = @transform_4, window_bounds = array<i64: 4, 224, 1>}, {pipeline_mode = #tpu.pipeline_mode<synchronous>, transform_indices = @transform_5, window_bounds = array<i64: 4, 32, 32>}, {pipeline_mode = #tpu.pipeline_mode<synchronous>, transform_indices = @transform_6, window_bounds = array<i64: 4, 32, 1>}, {transform_indices = @transform_7, window_bounds = array<i64: 4, 2>}, {transform_indices = @transform_8, window_bounds = array<i64: 1, 1>}, {pipeline_mode = #tpu.pipeline_mode<synchronous>, transform_indices = @transform_9, window_bounds = array<i64: 32, 16>}, {pipeline_mode = #tpu.pipeline_mode<synchronous>, transform_indices = @transform_10, window_bounds = array<i64: 32, 1>}, {transform_indices = @transform_11, window_bounds = array<i64: 1, 32, 128>}]} {
    %c0 = arith.constant 0 : index
    %c0_0 = arith.constant 0 : index
    %c0_1 = arith.constant 0 : index
    %0 = vector.load %arg1[%c0, %c0_0, %c0_1] : memref<1x16x128xf32, #tpu.memory_space<vmem>>, vector<1x16x128xf32>
    %1 = vector.shape_cast %0 : vector<1x16x128xf32> to vector<16x128xf32>
    %2 = arith.mulf %1, %1 : vector<16x128xf32>
    %3 = tpu.concatenate %1, %2 in 0 : vector<16x128xf32>, vector<16x128xf32> -> vector<32x128xf32>
    %cst = arith.constant dense<0.000000e+00> : vector<32xf32>
    %4 = vector.multi_reduction <add>, %3, %cst [1] : vector<32x128xf32> to vector<32xf32>
    %5 = vector.shape_cast %4 : vector<32xf32> to vector<32x1xf32>
    %6 = vector.extract_strided_slice %5 {offsets = [0, 0], sizes = [16, 1], strides = [1, 1]} : vector<32x1xf32> to vector<16x1xf32>
    %7 = vector.shape_cast %6 : vector<16x1xf32> to vector<1x16x1xf32>
    %cst_2 = arith.constant dense<0.000000e+00> : vector<1xf32>
    %8 = vector.multi_reduction <add>, %7, %cst_2 [1, 2] : vector<1x16x1xf32> to vector<1xf32>
    %9 = vector.shape_cast %8 : vector<1xf32> to vector<1x1x1xf32>
    %10 = vector.extract %9[0, 0, 0] : f32 from vector<1x1x1xf32>
    %11 = vector.broadcast %10 : f32 to vector<1x1xf32>
    %12 = vector.extract_strided_slice %5 {offsets = [16, 0], sizes = [16, 1], strides = [1, 1]} : vector<32x1xf32> to vector<16x1xf32>
    %13 = vector.shape_cast %12 : vector<16x1xf32> to vector<1x16x1xf32>
    %cst_3 = arith.constant dense<0.000000e+00> : vector<1xf32>
    %14 = vector.multi_reduction <add>, %13, %cst_3 [1, 2] : vector<1x16x1xf32> to vector<1xf32>
    %15 = vector.shape_cast %14 : vector<1xf32> to vector<1x1x1xf32>
    %16 = vector.extract %15[0, 0, 0] : f32 from vector<1x1x1xf32>
    %17 = vector.broadcast %16 : f32 to vector<1x1xf32>
    %cst_4 = arith.constant 2.048000e+03 : f32
    %18 = vector.broadcast %cst_4 : f32 to vector<1x1xf32>
    %19 = arith.divf %11, %18 : vector<1x1xf32>
    %cst_5 = arith.constant 2.048000e+03 : f32
    %20 = vector.broadcast %cst_5 : f32 to vector<1x1xf32>
    %21 = arith.divf %17, %20 : vector<1x1xf32>
    %22 = arith.mulf %19, %19 : vector<1x1xf32>
    %23 = arith.subf %21, %22 : vector<1x1xf32>
    %cst_6 = arith.constant 0.000000e+00 : f32
    %24 = vector.broadcast %cst_6 : f32 to vector<1x1xf32>
    %25 = arith.maximumf %23, %24 : vector<1x1xf32>
    %cst_7 = arith.constant 9.99999993E-9 : f32
    %26 = vector.broadcast %cst_7 : f32 to vector<1x1xf32>
    %27 = arith.addf %25, %26 : vector<1x1xf32>
    %28 = math.rsqrt %27 : vector<1x1xf32>
    %29 = vector.broadcast %19 : vector<1x1xf32> to vector<16x128xf32>
    %30 = arith.subf %1, %29 : vector<16x128xf32>
    %31 = vector.broadcast %28 : vector<1x1xf32> to vector<16x128xf32>
    %32 = arith.mulf %30, %31 : vector<16x128xf32>
    %c0_8 = arith.constant 0 : index
    %c0_9 = arith.constant 0 : index
    %33 = vector.load %arg2[%c0_8, %c0_9] : memref<16x16xf32, #tpu.memory_space<vmem>>, vector<16x16xf32>
    %cst_10 = arith.constant dense<0.000000e+00> : vector<16x128xf32>
    %34 = tpu.matmul %33, %32, %cst_10 {dimension_numbers = #tpu.dot_dimension_numbers<[1], [0], [0], [1], [0, 0, 1, 1], [], []>} : vector<16x16xf32>, vector<16x128xf32>, vector<16x128xf32> -> vector<16x128xf32>
    %c0_11 = arith.constant 0 : index
    %c0_12 = arith.constant 0 : index
    %35 = vector.load %arg3[%c0_11, %c0_12] : memref<16x1xf32, #tpu.memory_space<vmem>>, vector<16x1xf32>
    %36 = vector.broadcast %35 : vector<16x1xf32> to vector<16x128xf32>
    %37 = arith.addf %34, %36 : vector<16x128xf32>
    %cst_13 = arith.constant 0.000000e+00 : f32
    %38 = vector.broadcast %cst_13 : f32 to vector<16x128xf32>
    %c0_14 = arith.constant 0 : index
    %c0_15 = arith.constant 0 : index
    %c0_16 = arith.constant 0 : index
    %39 = vector.load %arg5[%c0_14, %c0_15, %c0_16] : memref<4x224x1xf32, #tpu.memory_space<vmem>>, vector<1x224x1xf32>
    %40 = vector.shape_cast %39 : vector<1x224x1xf32> to vector<224x1xf32>
    %41 = vector.extract_strided_slice %40 {offsets = [0, 0], sizes = [32, 1], strides = [1, 1]} : vector<224x1xf32> to vector<32x1xf32>
    %42 = vector.extract_strided_slice %40 {offsets = [32, 0], sizes = [32, 1], strides = [1, 1]} : vector<224x1xf32> to vector<32x1xf32>
    %43 = vector.extract_strided_slice %40 {offsets = [64, 0], sizes = [32, 1], strides = [1, 1]} : vector<224x1xf32> to vector<32x1xf32>
    %44 = vector.extract_strided_slice %40 {offsets = [96, 0], sizes = [32, 1], strides = [1, 1]} : vector<224x1xf32> to vector<32x1xf32>
    %45 = vector.extract_strided_slice %40 {offsets = [128, 0], sizes = [32, 1], strides = [1, 1]} : vector<224x1xf32> to vector<32x1xf32>
    %46 = vector.extract_strided_slice %40 {offsets = [160, 0], sizes = [32, 1], strides = [1, 1]} : vector<224x1xf32> to vector<32x1xf32>
    %47 = vector.extract_strided_slice %40 {offsets = [192, 0], sizes = [32, 1], strides = [1, 1]} : vector<224x1xf32> to vector<32x1xf32>
    %c0_17 = arith.constant 0 : index
    %c0_18 = arith.constant 0 : index
    %48 = memref.load %arg8[%c0_17, %c0_18] : memref<4x2xf32, #tpu.memory_space<smem>>
    %c0_19 = arith.constant 0 : index
    %c1 = arith.constant 1 : index
    %49 = memref.load %arg8[%c0_19, %c1] : memref<4x2xf32, #tpu.memory_space<smem>>
    %c0_20 = arith.constant 0 : index
    %c0_21 = arith.constant 0 : index
    %c0_22 = arith.constant 0 : index
    %50 = vector.load %arg4[%c0_20, %c0_21, %c0_22] : memref<4x32x16xf32, #tpu.memory_space<vmem>>, vector<1x32x16xf32>
    %51 = vector.shape_cast %50 : vector<1x32x16xf32> to vector<32x16xf32>
    %cst_23 = arith.constant dense<0.000000e+00> : vector<32x128xf32>
    %52 = tpu.matmul %51, %37, %cst_23 {dimension_numbers = #tpu.dot_dimension_numbers<[1], [0], [0], [1], [0, 0, 1, 1], [], []>} : vector<32x16xf32>, vector<16x128xf32>, vector<32x128xf32> -> vector<32x128xf32>
    %53 = vector.broadcast %41 : vector<32x1xf32> to vector<32x128xf32>
    %54 = arith.addf %52, %53 : vector<32x128xf32>
    %cst_24 = arith.constant 0.000000e+00 : f32
    %55 = vector.broadcast %cst_24 : f32 to vector<32x128xf32>
    %56 = arith.cmpf oge, %54, %55 : vector<32x128xf32>
    %57 = vector.broadcast %48 : f32 to vector<32x128xf32>
    %58 = arith.mulf %57, %54 : vector<32x128xf32>
    %59 = arith.select %56, %54, %58 : vector<32x128xi1>, vector<32x128xf32>
    %60 = arith.mulf %59, %59 : vector<32x128xf32>
    %61 = tpu.concatenate %59, %60 in 0 : vector<32x128xf32>, vector<32x128xf32> -> vector<64x128xf32>
    %cst_25 = arith.constant dense<0.000000e+00> : vector<64xf32>
    %62 = vector.multi_reduction <add>, %61, %cst_25 [1] : vector<64x128xf32> to vector<64xf32>
    %63 = vector.shape_cast %62 : vector<64xf32> to vector<64x1xf32>
    %64 = vector.extract_strided_slice %63 {offsets = [0, 0], sizes = [32, 1], strides = [1, 1]} : vector<64x1xf32> to vector<32x1xf32>
    %65 = vector.shape_cast %64 : vector<32x1xf32> to vector<1x32x1xf32>
    %cst_26 = arith.constant dense<0.000000e+00> : vector<1xf32>
    %66 = vector.multi_reduction <add>, %65, %cst_26 [1, 2] : vector<1x32x1xf32> to vector<1xf32>
    %67 = vector.shape_cast %66 : vector<1xf32> to vector<1x1x1xf32>
    %68 = vector.extract %67[0, 0, 0] : f32 from vector<1x1x1xf32>
    %69 = vector.broadcast %68 : f32 to vector<1x1xf32>
    %70 = vector.extract_strided_slice %63 {offsets = [32, 0], sizes = [32, 1], strides = [1, 1]} : vector<64x1xf32> to vector<32x1xf32>
    %71 = vector.shape_cast %70 : vector<32x1xf32> to vector<1x32x1xf32>
    %cst_27 = arith.constant dense<0.000000e+00> : vector<1xf32>
    %72 = vector.multi_reduction <add>, %71, %cst_27 [1, 2] : vector<1x32x1xf32> to vector<1xf32>
    %73 = vector.shape_cast %72 : vector<1xf32> to vector<1x1x1xf32>
    %74 = vector.extract %73[0, 0, 0] : f32 from vector<1x1x1xf32>
    %75 = vector.broadcast %74 : f32 to vector<1x1xf32>
    %cst_28 = arith.constant 4.096000e+03 : f32
    %76 = vector.broadcast %cst_28 : f32 to vector<1x1xf32>
    %77 = arith.divf %69, %76 : vector<1x1xf32>
    %cst_29 = arith.constant 4.096000e+03 : f32
    %78 = vector.broadcast %cst_29 : f32 to vector<1x1xf32>
    %79 = arith.divf %75, %78 : vector<1x1xf32>
    %80 = arith.mulf %77, %77 : vector<1x1xf32>
    %81 = arith.subf %79, %80 : vector<1x1xf32>
    %cst_30 = arith.constant 0.000000e+00 : f32
    %82 = vector.broadcast %cst_30 : f32 to vector<1x1xf32>
    %83 = arith.maximumf %81, %82 : vector<1x1xf32>
    %cst_31 = arith.constant 9.99999993E-9 : f32
    %84 = vector.broadcast %cst_31 : f32 to vector<1x1xf32>
    %85 = arith.addf %83, %84 : vector<1x1xf32>
    %86 = math.rsqrt %85 : vector<1x1xf32>
    %87 = vector.broadcast %86 : vector<1x1xf32> to vector<32x1xf32>
    %88 = arith.mulf %42, %87 : vector<32x1xf32>
    %89 = vector.broadcast %88 : vector<32x1xf32> to vector<32x128xf32>
    %90 = arith.mulf %59, %89 : vector<32x128xf32>
    %91 = vector.broadcast %77 : vector<1x1xf32> to vector<32x1xf32>
    %92 = arith.mulf %91, %88 : vector<32x1xf32>
    %93 = arith.subf %43, %92 : vector<32x1xf32>
    %94 = vector.broadcast %93 : vector<32x1xf32> to vector<32x128xf32>
    %95 = arith.addf %90, %94 : vector<32x128xf32>
    %cst_32 = arith.constant 0.000000e+00 : f32
    %96 = vector.broadcast %cst_32 : f32 to vector<32x1xf32>
    %97 = vector.extract_strided_slice %95 {offsets = [0, 0], sizes = [32, 127], strides = [1, 1]} : vector<32x128xf32> to vector<32x127xf32>
    %98 = tpu.concatenate %96, %97 in 1 : vector<32x1xf32>, vector<32x127xf32> -> vector<32x128xf32>
    %99 = vector.extract_strided_slice %95 {offsets = [0, 1], sizes = [32, 127], strides = [1, 1]} : vector<32x128xf32> to vector<32x127xf32>
    %100 = tpu.concatenate %99, %96 in 1 : vector<32x127xf32>, vector<32x1xf32> -> vector<32x128xf32>
    %101 = vector.broadcast %44 : vector<32x1xf32> to vector<32x128xf32>
    %102 = arith.mulf %101, %98 : vector<32x128xf32>
    %103 = vector.broadcast %45 : vector<32x1xf32> to vector<32x128xf32>
    %104 = arith.mulf %103, %95 : vector<32x128xf32>
    %105 = arith.addf %102, %104 : vector<32x128xf32>
    %106 = vector.broadcast %46 : vector<32x1xf32> to vector<32x128xf32>
    %107 = arith.mulf %106, %100 : vector<32x128xf32>
    %108 = arith.addf %105, %107 : vector<32x128xf32>
    %109 = vector.broadcast %47 : vector<32x1xf32> to vector<32x128xf32>
    %110 = arith.addf %108, %109 : vector<32x128xf32>
    %cst_33 = arith.constant 0.000000e+00 : f32
    %111 = vector.broadcast %cst_33 : f32 to vector<32x128xf32>
    %112 = arith.cmpf oge, %110, %111 : vector<32x128xf32>
    %113 = vector.broadcast %49 : f32 to vector<32x128xf32>
    %114 = arith.mulf %113, %110 : vector<32x128xf32>
    %115 = arith.select %112, %110, %114 : vector<32x128xi1>, vector<32x128xf32>
    %116 = arith.mulf %115, %115 : vector<32x128xf32>
    %117 = tpu.concatenate %115, %116 in 0 : vector<32x128xf32>, vector<32x128xf32> -> vector<64x128xf32>
    %cst_34 = arith.constant dense<0.000000e+00> : vector<64xf32>
    %118 = vector.multi_reduction <add>, %117, %cst_34 [1] : vector<64x128xf32> to vector<64xf32>
    %119 = vector.shape_cast %118 : vector<64xf32> to vector<64x1xf32>
    %120 = vector.extract_strided_slice %119 {offsets = [0, 0], sizes = [32, 1], strides = [1, 1]} : vector<64x1xf32> to vector<32x1xf32>
    %121 = vector.shape_cast %120 : vector<32x1xf32> to vector<1x32x1xf32>
    %cst_35 = arith.constant dense<0.000000e+00> : vector<1xf32>
    %122 = vector.multi_reduction <add>, %121, %cst_35 [1, 2] : vector<1x32x1xf32> to vector<1xf32>
    %123 = vector.shape_cast %122 : vector<1xf32> to vector<1x1x1xf32>
    %124 = vector.extract %123[0, 0, 0] : f32 from vector<1x1x1xf32>
    %125 = vector.broadcast %124 : f32 to vector<1x1xf32>
    %126 = vector.extract_strided_slice %119 {offsets = [32, 0], sizes = [32, 1], strides = [1, 1]} : vector<64x1xf32> to vector<32x1xf32>
    %127 = vector.shape_cast %126 : vector<32x1xf32> to vector<1x32x1xf32>
    %cst_36 = arith.constant dense<0.000000e+00> : vector<1xf32>
    %128 = vector.multi_reduction <add>, %127, %cst_36 [1, 2] : vector<1x32x1xf32> to vector<1xf32>
    %129 = vector.shape_cast %128 : vector<1xf32> to vector<1x1x1xf32>
    %130 = vector.extract %129[0, 0, 0] : f32 from vector<1x1x1xf32>
    %131 = vector.broadcast %130 : f32 to vector<1x1xf32>
    %cst_37 = arith.constant 4.096000e+03 : f32
    %132 = vector.broadcast %cst_37 : f32 to vector<1x1xf32>
    %133 = arith.divf %125, %132 : vector<1x1xf32>
    %cst_38 = arith.constant 4.096000e+03 : f32
    %134 = vector.broadcast %cst_38 : f32 to vector<1x1xf32>
    %135 = arith.divf %131, %134 : vector<1x1xf32>
    %136 = arith.mulf %133, %133 : vector<1x1xf32>
    %137 = arith.subf %135, %136 : vector<1x1xf32>
    %cst_39 = arith.constant 0.000000e+00 : f32
    %138 = vector.broadcast %cst_39 : f32 to vector<1x1xf32>
    %139 = arith.maximumf %137, %138 : vector<1x1xf32>
    %cst_40 = arith.constant 9.99999993E-9 : f32
    %140 = vector.broadcast %cst_40 : f32 to vector<1x1xf32>
    %141 = arith.addf %139, %140 : vector<1x1xf32>
    %142 = math.rsqrt %141 : vector<1x1xf32>
    %143 = vector.broadcast %133 : vector<1x1xf32> to vector<32x128xf32>
    %144 = arith.subf %115, %143 : vector<32x128xf32>
    %145 = vector.broadcast %142 : vector<1x1xf32> to vector<32x128xf32>
    %146 = arith.mulf %144, %145 : vector<32x128xf32>
    %c0_41 = arith.constant 0 : index
    %c0_42 = arith.constant 0 : index
    %c0_43 = arith.constant 0 : index
    %147 = vector.load %arg6[%c0_41, %c0_42, %c0_43] : memref<4x32x32xf32, #tpu.memory_space<vmem>>, vector<1x32x32xf32>
    %148 = vector.shape_cast %147 : vector<1x32x32xf32> to vector<32x32xf32>
    %cst_44 = arith.constant dense<0.000000e+00> : vector<32x128xf32>
    %149 = tpu.matmul %148, %146, %cst_44 {dimension_numbers = #tpu.dot_dimension_numbers<[1], [0], [0], [1], [0, 0, 1, 1], [], []>} : vector<32x32xf32>, vector<32x128xf32>, vector<32x128xf32> -> vector<32x128xf32>
    %c0_45 = arith.constant 0 : index
    %c0_46 = arith.constant 0 : index
    %c0_47 = arith.constant 0 : index
    %150 = vector.load %arg7[%c0_45, %c0_46, %c0_47] : memref<4x32x1xf32, #tpu.memory_space<vmem>>, vector<1x32x1xf32>
    %151 = vector.shape_cast %150 : vector<1x32x1xf32> to vector<32x1xf32>
    %152 = vector.broadcast %151 : vector<32x1xf32> to vector<32x128xf32>
    %153 = arith.addf %149, %152 : vector<32x128xf32>
    %154 = vector.extract_strided_slice %153 {offsets = [0, 0], sizes = [16, 128], strides = [1, 1]} : vector<32x128xf32> to vector<16x128xf32>
    %155 = arith.addf %37, %154 : vector<16x128xf32>
    %156 = vector.extract_strided_slice %153 {offsets = [16, 0], sizes = [16, 128], strides = [1, 1]} : vector<32x128xf32> to vector<16x128xf32>
    %157 = arith.addf %38, %156 : vector<16x128xf32>
    %c1_48 = arith.constant 1 : index
    %c0_49 = arith.constant 0 : index
    %c0_50 = arith.constant 0 : index
    %158 = vector.load %arg5[%c1_48, %c0_49, %c0_50] : memref<4x224x1xf32, #tpu.memory_space<vmem>>, vector<1x224x1xf32>
    %159 = vector.shape_cast %158 : vector<1x224x1xf32> to vector<224x1xf32>
    %160 = vector.extract_strided_slice %159 {offsets = [0, 0], sizes = [32, 1], strides = [1, 1]} : vector<224x1xf32> to vector<32x1xf32>
    %161 = vector.extract_strided_slice %159 {offsets = [32, 0], sizes = [32, 1], strides = [1, 1]} : vector<224x1xf32> to vector<32x1xf32>
    %162 = vector.extract_strided_slice %159 {offsets = [64, 0], sizes = [32, 1], strides = [1, 1]} : vector<224x1xf32> to vector<32x1xf32>
    %163 = vector.extract_strided_slice %159 {offsets = [96, 0], sizes = [32, 1], strides = [1, 1]} : vector<224x1xf32> to vector<32x1xf32>
    %164 = vector.extract_strided_slice %159 {offsets = [128, 0], sizes = [32, 1], strides = [1, 1]} : vector<224x1xf32> to vector<32x1xf32>
    %165 = vector.extract_strided_slice %159 {offsets = [160, 0], sizes = [32, 1], strides = [1, 1]} : vector<224x1xf32> to vector<32x1xf32>
    %166 = vector.extract_strided_slice %159 {offsets = [192, 0], sizes = [32, 1], strides = [1, 1]} : vector<224x1xf32> to vector<32x1xf32>
    %c1_51 = arith.constant 1 : index
    %c0_52 = arith.constant 0 : index
    %167 = memref.load %arg8[%c1_51, %c0_52] : memref<4x2xf32, #tpu.memory_space<smem>>
    %c1_53 = arith.constant 1 : index
    %c1_54 = arith.constant 1 : index
    %168 = memref.load %arg8[%c1_53, %c1_54] : memref<4x2xf32, #tpu.memory_space<smem>>
    %c1_55 = arith.constant 1 : index
    %c0_56 = arith.constant 0 : index
    %c0_57 = arith.constant 0 : index
    %169 = vector.load %arg4[%c1_55, %c0_56, %c0_57] : memref<4x32x16xf32, #tpu.memory_space<vmem>>, vector<1x32x16xf32>
    %170 = vector.shape_cast %169 : vector<1x32x16xf32> to vector<32x16xf32>
    %cst_58 = arith.constant dense<0.000000e+00> : vector<32x128xf32>
    %171 = tpu.matmul %170, %155, %cst_58 {dimension_numbers = #tpu.dot_dimension_numbers<[1], [0], [0], [1], [0, 0, 1, 1], [], []>} : vector<32x16xf32>, vector<16x128xf32>, vector<32x128xf32> -> vector<32x128xf32>
    %172 = vector.broadcast %160 : vector<32x1xf32> to vector<32x128xf32>
    %173 = arith.addf %171, %172 : vector<32x128xf32>
    %cst_59 = arith.constant 0.000000e+00 : f32
    %174 = vector.broadcast %cst_59 : f32 to vector<32x128xf32>
    %175 = arith.cmpf oge, %173, %174 : vector<32x128xf32>
    %176 = vector.broadcast %167 : f32 to vector<32x128xf32>
    %177 = arith.mulf %176, %173 : vector<32x128xf32>
    %178 = arith.select %175, %173, %177 : vector<32x128xi1>, vector<32x128xf32>
    %179 = arith.mulf %178, %178 : vector<32x128xf32>
    %180 = tpu.concatenate %178, %179 in 0 : vector<32x128xf32>, vector<32x128xf32> -> vector<64x128xf32>
    %cst_60 = arith.constant dense<0.000000e+00> : vector<64xf32>
    %181 = vector.multi_reduction <add>, %180, %cst_60 [1] : vector<64x128xf32> to vector<64xf32>
    %182 = vector.shape_cast %181 : vector<64xf32> to vector<64x1xf32>
    %183 = vector.extract_strided_slice %182 {offsets = [0, 0], sizes = [32, 1], strides = [1, 1]} : vector<64x1xf32> to vector<32x1xf32>
    %184 = vector.shape_cast %183 : vector<32x1xf32> to vector<1x32x1xf32>
    %cst_61 = arith.constant dense<0.000000e+00> : vector<1xf32>
    %185 = vector.multi_reduction <add>, %184, %cst_61 [1, 2] : vector<1x32x1xf32> to vector<1xf32>
    %186 = vector.shape_cast %185 : vector<1xf32> to vector<1x1x1xf32>
    %187 = vector.extract %186[0, 0, 0] : f32 from vector<1x1x1xf32>
    %188 = vector.broadcast %187 : f32 to vector<1x1xf32>
    %189 = vector.extract_strided_slice %182 {offsets = [32, 0], sizes = [32, 1], strides = [1, 1]} : vector<64x1xf32> to vector<32x1xf32>
    %190 = vector.shape_cast %189 : vector<32x1xf32> to vector<1x32x1xf32>
    %cst_62 = arith.constant dense<0.000000e+00> : vector<1xf32>
    %191 = vector.multi_reduction <add>, %190, %cst_62 [1, 2] : vector<1x32x1xf32> to vector<1xf32>
    %192 = vector.shape_cast %191 : vector<1xf32> to vector<1x1x1xf32>
    %193 = vector.extract %192[0, 0, 0] : f32 from vector<1x1x1xf32>
    %194 = vector.broadcast %193 : f32 to vector<1x1xf32>
    %cst_63 = arith.constant 4.096000e+03 : f32
    %195 = vector.broadcast %cst_63 : f32 to vector<1x1xf32>
    %196 = arith.divf %188, %195 : vector<1x1xf32>
    %cst_64 = arith.constant 4.096000e+03 : f32
    %197 = vector.broadcast %cst_64 : f32 to vector<1x1xf32>
    %198 = arith.divf %194, %197 : vector<1x1xf32>
    %199 = arith.mulf %196, %196 : vector<1x1xf32>
    %200 = arith.subf %198, %199 : vector<1x1xf32>
    %cst_65 = arith.constant 0.000000e+00 : f32
    %201 = vector.broadcast %cst_65 : f32 to vector<1x1xf32>
    %202 = arith.maximumf %200, %201 : vector<1x1xf32>
    %cst_66 = arith.constant 9.99999993E-9 : f32
    %203 = vector.broadcast %cst_66 : f32 to vector<1x1xf32>
    %204 = arith.addf %202, %203 : vector<1x1xf32>
    %205 = math.rsqrt %204 : vector<1x1xf32>
    %206 = vector.broadcast %205 : vector<1x1xf32> to vector<32x1xf32>
    %207 = arith.mulf %161, %206 : vector<32x1xf32>
    %208 = vector.broadcast %207 : vector<32x1xf32> to vector<32x128xf32>
    %209 = arith.mulf %178, %208 : vector<32x128xf32>
    %210 = vector.broadcast %196 : vector<1x1xf32> to vector<32x1xf32>
    %211 = arith.mulf %210, %207 : vector<32x1xf32>
    %212 = arith.subf %162, %211 : vector<32x1xf32>
    %213 = vector.broadcast %212 : vector<32x1xf32> to vector<32x128xf32>
    %214 = arith.addf %209, %213 : vector<32x128xf32>
    %cst_67 = arith.constant 0.000000e+00 : f32
    %215 = vector.broadcast %cst_67 : f32 to vector<32x2xf32>
    %216 = vector.extract_strided_slice %214 {offsets = [0, 0], sizes = [32, 126], strides = [1, 1]} : vector<32x128xf32> to vector<32x126xf32>
    %217 = tpu.concatenate %215, %216 in 1 : vector<32x2xf32>, vector<32x126xf32> -> vector<32x128xf32>
    %218 = vector.extract_strided_slice %214 {offsets = [0, 2], sizes = [32, 126], strides = [1, 1]} : vector<32x128xf32> to vector<32x126xf32>
    %219 = tpu.concatenate %218, %215 in 1 : vector<32x126xf32>, vector<32x2xf32> -> vector<32x128xf32>
    %220 = vector.broadcast %163 : vector<32x1xf32> to vector<32x128xf32>
    %221 = arith.mulf %220, %217 : vector<32x128xf32>
    %222 = vector.broadcast %164 : vector<32x1xf32> to vector<32x128xf32>
    %223 = arith.mulf %222, %214 : vector<32x128xf32>
    %224 = arith.addf %221, %223 : vector<32x128xf32>
    %225 = vector.broadcast %165 : vector<32x1xf32> to vector<32x128xf32>
    %226 = arith.mulf %225, %219 : vector<32x128xf32>
    %227 = arith.addf %224, %226 : vector<32x128xf32>
    %228 = vector.broadcast %166 : vector<32x1xf32> to vector<32x128xf32>
    %229 = arith.addf %227, %228 : vector<32x128xf32>
    %cst_68 = arith.constant 0.000000e+00 : f32
    %230 = vector.broadcast %cst_68 : f32 to vector<32x128xf32>
    %231 = arith.cmpf oge, %229, %230 : vector<32x128xf32>
    %232 = vector.broadcast %168 : f32 to vector<32x128xf32>
    %233 = arith.mulf %232, %229 : vector<32x128xf32>
    %234 = arith.select %231, %229, %233 : vector<32x128xi1>, vector<32x128xf32>
    %235 = arith.mulf %234, %234 : vector<32x128xf32>
    %236 = tpu.concatenate %234, %235 in 0 : vector<32x128xf32>, vector<32x128xf32> -> vector<64x128xf32>
    %cst_69 = arith.constant dense<0.000000e+00> : vector<64xf32>
    %237 = vector.multi_reduction <add>, %236, %cst_69 [1] : vector<64x128xf32> to vector<64xf32>
    %238 = vector.shape_cast %237 : vector<64xf32> to vector<64x1xf32>
    %239 = vector.extract_strided_slice %238 {offsets = [0, 0], sizes = [32, 1], strides = [1, 1]} : vector<64x1xf32> to vector<32x1xf32>
    %240 = vector.shape_cast %239 : vector<32x1xf32> to vector<1x32x1xf32>
    %cst_70 = arith.constant dense<0.000000e+00> : vector<1xf32>
    %241 = vector.multi_reduction <add>, %240, %cst_70 [1, 2] : vector<1x32x1xf32> to vector<1xf32>
    %242 = vector.shape_cast %241 : vector<1xf32> to vector<1x1x1xf32>
    %243 = vector.extract %242[0, 0, 0] : f32 from vector<1x1x1xf32>
    %244 = vector.broadcast %243 : f32 to vector<1x1xf32>
    %245 = vector.extract_strided_slice %238 {offsets = [32, 0], sizes = [32, 1], strides = [1, 1]} : vector<64x1xf32> to vector<32x1xf32>
    %246 = vector.shape_cast %245 : vector<32x1xf32> to vector<1x32x1xf32>
    %cst_71 = arith.constant dense<0.000000e+00> : vector<1xf32>
    %247 = vector.multi_reduction <add>, %246, %cst_71 [1, 2] : vector<1x32x1xf32> to vector<1xf32>
    %248 = vector.shape_cast %247 : vector<1xf32> to vector<1x1x1xf32>
    %249 = vector.extract %248[0, 0, 0] : f32 from vector<1x1x1xf32>
    %250 = vector.broadcast %249 : f32 to vector<1x1xf32>
    %cst_72 = arith.constant 4.096000e+03 : f32
    %251 = vector.broadcast %cst_72 : f32 to vector<1x1xf32>
    %252 = arith.divf %244, %251 : vector<1x1xf32>
    %cst_73 = arith.constant 4.096000e+03 : f32
    %253 = vector.broadcast %cst_73 : f32 to vector<1x1xf32>
    %254 = arith.divf %250, %253 : vector<1x1xf32>
    %255 = arith.mulf %252, %252 : vector<1x1xf32>
    %256 = arith.subf %254, %255 : vector<1x1xf32>
    %cst_74 = arith.constant 0.000000e+00 : f32
    %257 = vector.broadcast %cst_74 : f32 to vector<1x1xf32>
    %258 = arith.maximumf %256, %257 : vector<1x1xf32>
    %cst_75 = arith.constant 9.99999993E-9 : f32
    %259 = vector.broadcast %cst_75 : f32 to vector<1x1xf32>
    %260 = arith.addf %258, %259 : vector<1x1xf32>
    %261 = math.rsqrt %260 : vector<1x1xf32>
    %262 = vector.broadcast %252 : vector<1x1xf32> to vector<32x128xf32>
    %263 = arith.subf %234, %262 : vector<32x128xf32>
    %264 = vector.broadcast %261 : vector<1x1xf32> to vector<32x128xf32>
    %265 = arith.mulf %263, %264 : vector<32x128xf32>
    %c1_76 = arith.constant 1 : index
    %c0_77 = arith.constant 0 : index
    %c0_78 = arith.constant 0 : index
    %266 = vector.load %arg6[%c1_76, %c0_77, %c0_78] : memref<4x32x32xf32, #tpu.memory_space<vmem>>, vector<1x32x32xf32>
    %267 = vector.shape_cast %266 : vector<1x32x32xf32> to vector<32x32xf32>
    %cst_79 = arith.constant dense<0.000000e+00> : vector<32x128xf32>
    %268 = tpu.matmul %267, %265, %cst_79 {dimension_numbers = #tpu.dot_dimension_numbers<[1], [0], [0], [1], [0, 0, 1, 1], [], []>} : vector<32x32xf32>, vector<32x128xf32>, vector<32x128xf32> -> vector<32x128xf32>
    %c1_80 = arith.constant 1 : index
    %c0_81 = arith.constant 0 : index
    %c0_82 = arith.constant 0 : index
    %269 = vector.load %arg7[%c1_80, %c0_81, %c0_82] : memref<4x32x1xf32, #tpu.memory_space<vmem>>, vector<1x32x1xf32>
    %270 = vector.shape_cast %269 : vector<1x32x1xf32> to vector<32x1xf32>
    %271 = vector.broadcast %270 : vector<32x1xf32> to vector<32x128xf32>
    %272 = arith.addf %268, %271 : vector<32x128xf32>
    %273 = vector.extract_strided_slice %272 {offsets = [0, 0], sizes = [16, 128], strides = [1, 1]} : vector<32x128xf32> to vector<16x128xf32>
    %274 = arith.addf %155, %273 : vector<16x128xf32>
    %275 = vector.extract_strided_slice %272 {offsets = [16, 0], sizes = [16, 128], strides = [1, 1]} : vector<32x128xf32> to vector<16x128xf32>
    %276 = arith.addf %157, %275 : vector<16x128xf32>
    %c2 = arith.constant 2 : index
    %c0_83 = arith.constant 0 : index
    %c0_84 = arith.constant 0 : index
    %277 = vector.load %arg5[%c2, %c0_83, %c0_84] : memref<4x224x1xf32, #tpu.memory_space<vmem>>, vector<1x224x1xf32>
    %278 = vector.shape_cast %277 : vector<1x224x1xf32> to vector<224x1xf32>
    %279 = vector.extract_strided_slice %278 {offsets = [0, 0], sizes = [32, 1], strides = [1, 1]} : vector<224x1xf32> to vector<32x1xf32>
    %280 = vector.extract_strided_slice %278 {offsets = [32, 0], sizes = [32, 1], strides = [1, 1]} : vector<224x1xf32> to vector<32x1xf32>
    %281 = vector.extract_strided_slice %278 {offsets = [64, 0], sizes = [32, 1], strides = [1, 1]} : vector<224x1xf32> to vector<32x1xf32>
    %282 = vector.extract_strided_slice %278 {offsets = [96, 0], sizes = [32, 1], strides = [1, 1]} : vector<224x1xf32> to vector<32x1xf32>
    %283 = vector.extract_strided_slice %278 {offsets = [128, 0], sizes = [32, 1], strides = [1, 1]} : vector<224x1xf32> to vector<32x1xf32>
    %284 = vector.extract_strided_slice %278 {offsets = [160, 0], sizes = [32, 1], strides = [1, 1]} : vector<224x1xf32> to vector<32x1xf32>
    %285 = vector.extract_strided_slice %278 {offsets = [192, 0], sizes = [32, 1], strides = [1, 1]} : vector<224x1xf32> to vector<32x1xf32>
    %c2_85 = arith.constant 2 : index
    %c0_86 = arith.constant 0 : index
    %286 = memref.load %arg8[%c2_85, %c0_86] : memref<4x2xf32, #tpu.memory_space<smem>>
    %c2_87 = arith.constant 2 : index
    %c1_88 = arith.constant 1 : index
    %287 = memref.load %arg8[%c2_87, %c1_88] : memref<4x2xf32, #tpu.memory_space<smem>>
    %c2_89 = arith.constant 2 : index
    %c0_90 = arith.constant 0 : index
    %c0_91 = arith.constant 0 : index
    %288 = vector.load %arg4[%c2_89, %c0_90, %c0_91] : memref<4x32x16xf32, #tpu.memory_space<vmem>>, vector<1x32x16xf32>
    %289 = vector.shape_cast %288 : vector<1x32x16xf32> to vector<32x16xf32>
    %cst_92 = arith.constant dense<0.000000e+00> : vector<32x128xf32>
    %290 = tpu.matmul %289, %274, %cst_92 {dimension_numbers = #tpu.dot_dimension_numbers<[1], [0], [0], [1], [0, 0, 1, 1], [], []>} : vector<32x16xf32>, vector<16x128xf32>, vector<32x128xf32> -> vector<32x128xf32>
    %291 = vector.broadcast %279 : vector<32x1xf32> to vector<32x128xf32>
    %292 = arith.addf %290, %291 : vector<32x128xf32>
    %cst_93 = arith.constant 0.000000e+00 : f32
    %293 = vector.broadcast %cst_93 : f32 to vector<32x128xf32>
    %294 = arith.cmpf oge, %292, %293 : vector<32x128xf32>
    %295 = vector.broadcast %286 : f32 to vector<32x128xf32>
    %296 = arith.mulf %295, %292 : vector<32x128xf32>
    %297 = arith.select %294, %292, %296 : vector<32x128xi1>, vector<32x128xf32>
    %298 = arith.mulf %297, %297 : vector<32x128xf32>
    %299 = tpu.concatenate %297, %298 in 0 : vector<32x128xf32>, vector<32x128xf32> -> vector<64x128xf32>
    %cst_94 = arith.constant dense<0.000000e+00> : vector<64xf32>
    %300 = vector.multi_reduction <add>, %299, %cst_94 [1] : vector<64x128xf32> to vector<64xf32>
    %301 = vector.shape_cast %300 : vector<64xf32> to vector<64x1xf32>
    %302 = vector.extract_strided_slice %301 {offsets = [0, 0], sizes = [32, 1], strides = [1, 1]} : vector<64x1xf32> to vector<32x1xf32>
    %303 = vector.shape_cast %302 : vector<32x1xf32> to vector<1x32x1xf32>
    %cst_95 = arith.constant dense<0.000000e+00> : vector<1xf32>
    %304 = vector.multi_reduction <add>, %303, %cst_95 [1, 2] : vector<1x32x1xf32> to vector<1xf32>
    %305 = vector.shape_cast %304 : vector<1xf32> to vector<1x1x1xf32>
    %306 = vector.extract %305[0, 0, 0] : f32 from vector<1x1x1xf32>
    %307 = vector.broadcast %306 : f32 to vector<1x1xf32>
    %308 = vector.extract_strided_slice %301 {offsets = [32, 0], sizes = [32, 1], strides = [1, 1]} : vector<64x1xf32> to vector<32x1xf32>
    %309 = vector.shape_cast %308 : vector<32x1xf32> to vector<1x32x1xf32>
    %cst_96 = arith.constant dense<0.000000e+00> : vector<1xf32>
    %310 = vector.multi_reduction <add>, %309, %cst_96 [1, 2] : vector<1x32x1xf32> to vector<1xf32>
    %311 = vector.shape_cast %310 : vector<1xf32> to vector<1x1x1xf32>
    %312 = vector.extract %311[0, 0, 0] : f32 from vector<1x1x1xf32>
    %313 = vector.broadcast %312 : f32 to vector<1x1xf32>
    %cst_97 = arith.constant 4.096000e+03 : f32
    %314 = vector.broadcast %cst_97 : f32 to vector<1x1xf32>
    %315 = arith.divf %307, %314 : vector<1x1xf32>
    %cst_98 = arith.constant 4.096000e+03 : f32
    %316 = vector.broadcast %cst_98 : f32 to vector<1x1xf32>
    %317 = arith.divf %313, %316 : vector<1x1xf32>
    %318 = arith.mulf %315, %315 : vector<1x1xf32>
    %319 = arith.subf %317, %318 : vector<1x1xf32>
    %cst_99 = arith.constant 0.000000e+00 : f32
    %320 = vector.broadcast %cst_99 : f32 to vector<1x1xf32>
    %321 = arith.maximumf %319, %320 : vector<1x1xf32>
    %cst_100 = arith.constant 9.99999993E-9 : f32
    %322 = vector.broadcast %cst_100 : f32 to vector<1x1xf32>
    %323 = arith.addf %321, %322 : vector<1x1xf32>
    %324 = math.rsqrt %323 : vector<1x1xf32>
    %325 = vector.broadcast %324 : vector<1x1xf32> to vector<32x1xf32>
    %326 = arith.mulf %280, %325 : vector<32x1xf32>
    %327 = vector.broadcast %326 : vector<32x1xf32> to vector<32x128xf32>
    %328 = arith.mulf %297, %327 : vector<32x128xf32>
    %329 = vector.broadcast %315 : vector<1x1xf32> to vector<32x1xf32>
    %330 = arith.mulf %329, %326 : vector<32x1xf32>
    %331 = arith.subf %281, %330 : vector<32x1xf32>
    %332 = vector.broadcast %331 : vector<32x1xf32> to vector<32x128xf32>
    %333 = arith.addf %328, %332 : vector<32x128xf32>
    %cst_101 = arith.constant 0.000000e+00 : f32
    %334 = vector.broadcast %cst_101 : f32 to vector<32x1xf32>
    %335 = vector.extract_strided_slice %333 {offsets = [0, 0], sizes = [32, 127], strides = [1, 1]} : vector<32x128xf32> to vector<32x127xf32>
    %336 = tpu.concatenate %334, %335 in 1 : vector<32x1xf32>, vector<32x127xf32> -> vector<32x128xf32>
    %337 = vector.extract_strided_slice %333 {offsets = [0, 1], sizes = [32, 127], strides = [1, 1]} : vector<32x128xf32> to vector<32x127xf32>
    %338 = tpu.concatenate %337, %334 in 1 : vector<32x127xf32>, vector<32x1xf32> -> vector<32x128xf32>
    %339 = vector.broadcast %282 : vector<32x1xf32> to vector<32x128xf32>
    %340 = arith.mulf %339, %336 : vector<32x128xf32>
    %341 = vector.broadcast %283 : vector<32x1xf32> to vector<32x128xf32>
    %342 = arith.mulf %341, %333 : vector<32x128xf32>
    %343 = arith.addf %340, %342 : vector<32x128xf32>
    %344 = vector.broadcast %284 : vector<32x1xf32> to vector<32x128xf32>
    %345 = arith.mulf %344, %338 : vector<32x128xf32>
    %346 = arith.addf %343, %345 : vector<32x128xf32>
    %347 = vector.broadcast %285 : vector<32x1xf32> to vector<32x128xf32>
    %348 = arith.addf %346, %347 : vector<32x128xf32>
    %cst_102 = arith.constant 0.000000e+00 : f32
    %349 = vector.broadcast %cst_102 : f32 to vector<32x128xf32>
    %350 = arith.cmpf oge, %348, %349 : vector<32x128xf32>
    %351 = vector.broadcast %287 : f32 to vector<32x128xf32>
    %352 = arith.mulf %351, %348 : vector<32x128xf32>
    %353 = arith.select %350, %348, %352 : vector<32x128xi1>, vector<32x128xf32>
    %354 = arith.mulf %353, %353 : vector<32x128xf32>
    %355 = tpu.concatenate %353, %354 in 0 : vector<32x128xf32>, vector<32x128xf32> -> vector<64x128xf32>
    %cst_103 = arith.constant dense<0.000000e+00> : vector<64xf32>
    %356 = vector.multi_reduction <add>, %355, %cst_103 [1] : vector<64x128xf32> to vector<64xf32>
    %357 = vector.shape_cast %356 : vector<64xf32> to vector<64x1xf32>
    %358 = vector.extract_strided_slice %357 {offsets = [0, 0], sizes = [32, 1], strides = [1, 1]} : vector<64x1xf32> to vector<32x1xf32>
    %359 = vector.shape_cast %358 : vector<32x1xf32> to vector<1x32x1xf32>
    %cst_104 = arith.constant dense<0.000000e+00> : vector<1xf32>
    %360 = vector.multi_reduction <add>, %359, %cst_104 [1, 2] : vector<1x32x1xf32> to vector<1xf32>
    %361 = vector.shape_cast %360 : vector<1xf32> to vector<1x1x1xf32>
    %362 = vector.extract %361[0, 0, 0] : f32 from vector<1x1x1xf32>
    %363 = vector.broadcast %362 : f32 to vector<1x1xf32>
    %364 = vector.extract_strided_slice %357 {offsets = [32, 0], sizes = [32, 1], strides = [1, 1]} : vector<64x1xf32> to vector<32x1xf32>
    %365 = vector.shape_cast %364 : vector<32x1xf32> to vector<1x32x1xf32>
    %cst_105 = arith.constant dense<0.000000e+00> : vector<1xf32>
    %366 = vector.multi_reduction <add>, %365, %cst_105 [1, 2] : vector<1x32x1xf32> to vector<1xf32>
    %367 = vector.shape_cast %366 : vector<1xf32> to vector<1x1x1xf32>
    %368 = vector.extract %367[0, 0, 0] : f32 from vector<1x1x1xf32>
    %369 = vector.broadcast %368 : f32 to vector<1x1xf32>
    %cst_106 = arith.constant 4.096000e+03 : f32
    %370 = vector.broadcast %cst_106 : f32 to vector<1x1xf32>
    %371 = arith.divf %363, %370 : vector<1x1xf32>
    %cst_107 = arith.constant 4.096000e+03 : f32
    %372 = vector.broadcast %cst_107 : f32 to vector<1x1xf32>
    %373 = arith.divf %369, %372 : vector<1x1xf32>
    %374 = arith.mulf %371, %371 : vector<1x1xf32>
    %375 = arith.subf %373, %374 : vector<1x1xf32>
    %cst_108 = arith.constant 0.000000e+00 : f32
    %376 = vector.broadcast %cst_108 : f32 to vector<1x1xf32>
    %377 = arith.maximumf %375, %376 : vector<1x1xf32>
    %cst_109 = arith.constant 9.99999993E-9 : f32
    %378 = vector.broadcast %cst_109 : f32 to vector<1x1xf32>
    %379 = arith.addf %377, %378 : vector<1x1xf32>
    %380 = math.rsqrt %379 : vector<1x1xf32>
    %381 = vector.broadcast %371 : vector<1x1xf32> to vector<32x128xf32>
    %382 = arith.subf %353, %381 : vector<32x128xf32>
    %383 = vector.broadcast %380 : vector<1x1xf32> to vector<32x128xf32>
    %384 = arith.mulf %382, %383 : vector<32x128xf32>
    %c2_110 = arith.constant 2 : index
    %c0_111 = arith.constant 0 : index
    %c0_112 = arith.constant 0 : index
    %385 = vector.load %arg6[%c2_110, %c0_111, %c0_112] : memref<4x32x32xf32, #tpu.memory_space<vmem>>, vector<1x32x32xf32>
    %386 = vector.shape_cast %385 : vector<1x32x32xf32> to vector<32x32xf32>
    %cst_113 = arith.constant dense<0.000000e+00> : vector<32x128xf32>
    %387 = tpu.matmul %386, %384, %cst_113 {dimension_numbers = #tpu.dot_dimension_numbers<[1], [0], [0], [1], [0, 0, 1, 1], [], []>} : vector<32x32xf32>, vector<32x128xf32>, vector<32x128xf32> -> vector<32x128xf32>
    %c2_114 = arith.constant 2 : index
    %c0_115 = arith.constant 0 : index
    %c0_116 = arith.constant 0 : index
    %388 = vector.load %arg7[%c2_114, %c0_115, %c0_116] : memref<4x32x1xf32, #tpu.memory_space<vmem>>, vector<1x32x1xf32>
    %389 = vector.shape_cast %388 : vector<1x32x1xf32> to vector<32x1xf32>
    %390 = vector.broadcast %389 : vector<32x1xf32> to vector<32x128xf32>
    %391 = arith.addf %387, %390 : vector<32x128xf32>
    %392 = vector.extract_strided_slice %391 {offsets = [0, 0], sizes = [16, 128], strides = [1, 1]} : vector<32x128xf32> to vector<16x128xf32>
    %393 = arith.addf %274, %392 : vector<16x128xf32>
    %394 = vector.extract_strided_slice %391 {offsets = [16, 0], sizes = [16, 128], strides = [1, 1]} : vector<32x128xf32> to vector<16x128xf32>
    %395 = arith.addf %276, %394 : vector<16x128xf32>
    %c3 = arith.constant 3 : index
    %c0_117 = arith.constant 0 : index
    %c0_118 = arith.constant 0 : index
    %396 = vector.load %arg5[%c3, %c0_117, %c0_118] : memref<4x224x1xf32, #tpu.memory_space<vmem>>, vector<1x224x1xf32>
    %397 = vector.shape_cast %396 : vector<1x224x1xf32> to vector<224x1xf32>
    %398 = vector.extract_strided_slice %397 {offsets = [0, 0], sizes = [32, 1], strides = [1, 1]} : vector<224x1xf32> to vector<32x1xf32>
    %399 = vector.extract_strided_slice %397 {offsets = [32, 0], sizes = [32, 1], strides = [1, 1]} : vector<224x1xf32> to vector<32x1xf32>
    %400 = vector.extract_strided_slice %397 {offsets = [64, 0], sizes = [32, 1], strides = [1, 1]} : vector<224x1xf32> to vector<32x1xf32>
    %401 = vector.extract_strided_slice %397 {offsets = [96, 0], sizes = [32, 1], strides = [1, 1]} : vector<224x1xf32> to vector<32x1xf32>
    %402 = vector.extract_strided_slice %397 {offsets = [128, 0], sizes = [32, 1], strides = [1, 1]} : vector<224x1xf32> to vector<32x1xf32>
    %403 = vector.extract_strided_slice %397 {offsets = [160, 0], sizes = [32, 1], strides = [1, 1]} : vector<224x1xf32> to vector<32x1xf32>
    %404 = vector.extract_strided_slice %397 {offsets = [192, 0], sizes = [32, 1], strides = [1, 1]} : vector<224x1xf32> to vector<32x1xf32>
    %c3_119 = arith.constant 3 : index
    %c0_120 = arith.constant 0 : index
    %405 = memref.load %arg8[%c3_119, %c0_120] : memref<4x2xf32, #tpu.memory_space<smem>>
    %c3_121 = arith.constant 3 : index
    %c1_122 = arith.constant 1 : index
    %406 = memref.load %arg8[%c3_121, %c1_122] : memref<4x2xf32, #tpu.memory_space<smem>>
    %c3_123 = arith.constant 3 : index
    %c0_124 = arith.constant 0 : index
    %c0_125 = arith.constant 0 : index
    %407 = vector.load %arg4[%c3_123, %c0_124, %c0_125] : memref<4x32x16xf32, #tpu.memory_space<vmem>>, vector<1x32x16xf32>
    %408 = vector.shape_cast %407 : vector<1x32x16xf32> to vector<32x16xf32>
    %cst_126 = arith.constant dense<0.000000e+00> : vector<32x128xf32>
    %409 = tpu.matmul %408, %393, %cst_126 {dimension_numbers = #tpu.dot_dimension_numbers<[1], [0], [0], [1], [0, 0, 1, 1], [], []>} : vector<32x16xf32>, vector<16x128xf32>, vector<32x128xf32> -> vector<32x128xf32>
    %410 = vector.broadcast %398 : vector<32x1xf32> to vector<32x128xf32>
    %411 = arith.addf %409, %410 : vector<32x128xf32>
    %cst_127 = arith.constant 0.000000e+00 : f32
    %412 = vector.broadcast %cst_127 : f32 to vector<32x128xf32>
    %413 = arith.cmpf oge, %411, %412 : vector<32x128xf32>
    %414 = vector.broadcast %405 : f32 to vector<32x128xf32>
    %415 = arith.mulf %414, %411 : vector<32x128xf32>
    %416 = arith.select %413, %411, %415 : vector<32x128xi1>, vector<32x128xf32>
    %417 = arith.mulf %416, %416 : vector<32x128xf32>
    %418 = tpu.concatenate %416, %417 in 0 : vector<32x128xf32>, vector<32x128xf32> -> vector<64x128xf32>
    %cst_128 = arith.constant dense<0.000000e+00> : vector<64xf32>
    %419 = vector.multi_reduction <add>, %418, %cst_128 [1] : vector<64x128xf32> to vector<64xf32>
    %420 = vector.shape_cast %419 : vector<64xf32> to vector<64x1xf32>
    %421 = vector.extract_strided_slice %420 {offsets = [0, 0], sizes = [32, 1], strides = [1, 1]} : vector<64x1xf32> to vector<32x1xf32>
    %422 = vector.shape_cast %421 : vector<32x1xf32> to vector<1x32x1xf32>
    %cst_129 = arith.constant dense<0.000000e+00> : vector<1xf32>
    %423 = vector.multi_reduction <add>, %422, %cst_129 [1, 2] : vector<1x32x1xf32> to vector<1xf32>
    %424 = vector.shape_cast %423 : vector<1xf32> to vector<1x1x1xf32>
    %425 = vector.extract %424[0, 0, 0] : f32 from vector<1x1x1xf32>
    %426 = vector.broadcast %425 : f32 to vector<1x1xf32>
    %427 = vector.extract_strided_slice %420 {offsets = [32, 0], sizes = [32, 1], strides = [1, 1]} : vector<64x1xf32> to vector<32x1xf32>
    %428 = vector.shape_cast %427 : vector<32x1xf32> to vector<1x32x1xf32>
    %cst_130 = arith.constant dense<0.000000e+00> : vector<1xf32>
    %429 = vector.multi_reduction <add>, %428, %cst_130 [1, 2] : vector<1x32x1xf32> to vector<1xf32>
    %430 = vector.shape_cast %429 : vector<1xf32> to vector<1x1x1xf32>
    %431 = vector.extract %430[0, 0, 0] : f32 from vector<1x1x1xf32>
    %432 = vector.broadcast %431 : f32 to vector<1x1xf32>
    %cst_131 = arith.constant 4.096000e+03 : f32
    %433 = vector.broadcast %cst_131 : f32 to vector<1x1xf32>
    %434 = arith.divf %426, %433 : vector<1x1xf32>
    %cst_132 = arith.constant 4.096000e+03 : f32
    %435 = vector.broadcast %cst_132 : f32 to vector<1x1xf32>
    %436 = arith.divf %432, %435 : vector<1x1xf32>
    %437 = arith.mulf %434, %434 : vector<1x1xf32>
    %438 = arith.subf %436, %437 : vector<1x1xf32>
    %cst_133 = arith.constant 0.000000e+00 : f32
    %439 = vector.broadcast %cst_133 : f32 to vector<1x1xf32>
    %440 = arith.maximumf %438, %439 : vector<1x1xf32>
    %cst_134 = arith.constant 9.99999993E-9 : f32
    %441 = vector.broadcast %cst_134 : f32 to vector<1x1xf32>
    %442 = arith.addf %440, %441 : vector<1x1xf32>
    %443 = math.rsqrt %442 : vector<1x1xf32>
    %444 = vector.broadcast %443 : vector<1x1xf32> to vector<32x1xf32>
    %445 = arith.mulf %399, %444 : vector<32x1xf32>
    %446 = vector.broadcast %445 : vector<32x1xf32> to vector<32x128xf32>
    %447 = arith.mulf %416, %446 : vector<32x128xf32>
    %448 = vector.broadcast %434 : vector<1x1xf32> to vector<32x1xf32>
    %449 = arith.mulf %448, %445 : vector<32x1xf32>
    %450 = arith.subf %400, %449 : vector<32x1xf32>
    %451 = vector.broadcast %450 : vector<32x1xf32> to vector<32x128xf32>
    %452 = arith.addf %447, %451 : vector<32x128xf32>
    %cst_135 = arith.constant 0.000000e+00 : f32
    %453 = vector.broadcast %cst_135 : f32 to vector<32x2xf32>
    %454 = vector.extract_strided_slice %452 {offsets = [0, 0], sizes = [32, 126], strides = [1, 1]} : vector<32x128xf32> to vector<32x126xf32>
    %455 = tpu.concatenate %453, %454 in 1 : vector<32x2xf32>, vector<32x126xf32> -> vector<32x128xf32>
    %456 = vector.extract_strided_slice %452 {offsets = [0, 2], sizes = [32, 126], strides = [1, 1]} : vector<32x128xf32> to vector<32x126xf32>
    %457 = tpu.concatenate %456, %453 in 1 : vector<32x126xf32>, vector<32x2xf32> -> vector<32x128xf32>
    %458 = vector.broadcast %401 : vector<32x1xf32> to vector<32x128xf32>
    %459 = arith.mulf %458, %455 : vector<32x128xf32>
    %460 = vector.broadcast %402 : vector<32x1xf32> to vector<32x128xf32>
    %461 = arith.mulf %460, %452 : vector<32x128xf32>
    %462 = arith.addf %459, %461 : vector<32x128xf32>
    %463 = vector.broadcast %403 : vector<32x1xf32> to vector<32x128xf32>
    %464 = arith.mulf %463, %457 : vector<32x128xf32>
    %465 = arith.addf %462, %464 : vector<32x128xf32>
    %466 = vector.broadcast %404 : vector<32x1xf32> to vector<32x128xf32>
    %467 = arith.addf %465, %466 : vector<32x128xf32>
    %cst_136 = arith.constant 0.000000e+00 : f32
    %468 = vector.broadcast %cst_136 : f32 to vector<32x128xf32>
    %469 = arith.cmpf oge, %467, %468 : vector<32x128xf32>
    %470 = vector.broadcast %406 : f32 to vector<32x128xf32>
    %471 = arith.mulf %470, %467 : vector<32x128xf32>
    %472 = arith.select %469, %467, %471 : vector<32x128xi1>, vector<32x128xf32>
    %473 = arith.mulf %472, %472 : vector<32x128xf32>
    %474 = tpu.concatenate %472, %473 in 0 : vector<32x128xf32>, vector<32x128xf32> -> vector<64x128xf32>
    %cst_137 = arith.constant dense<0.000000e+00> : vector<64xf32>
    %475 = vector.multi_reduction <add>, %474, %cst_137 [1] : vector<64x128xf32> to vector<64xf32>
    %476 = vector.shape_cast %475 : vector<64xf32> to vector<64x1xf32>
    %477 = vector.extract_strided_slice %476 {offsets = [0, 0], sizes = [32, 1], strides = [1, 1]} : vector<64x1xf32> to vector<32x1xf32>
    %478 = vector.shape_cast %477 : vector<32x1xf32> to vector<1x32x1xf32>
    %cst_138 = arith.constant dense<0.000000e+00> : vector<1xf32>
    %479 = vector.multi_reduction <add>, %478, %cst_138 [1, 2] : vector<1x32x1xf32> to vector<1xf32>
    %480 = vector.shape_cast %479 : vector<1xf32> to vector<1x1x1xf32>
    %481 = vector.extract %480[0, 0, 0] : f32 from vector<1x1x1xf32>
    %482 = vector.broadcast %481 : f32 to vector<1x1xf32>
    %483 = vector.extract_strided_slice %476 {offsets = [32, 0], sizes = [32, 1], strides = [1, 1]} : vector<64x1xf32> to vector<32x1xf32>
    %484 = vector.shape_cast %483 : vector<32x1xf32> to vector<1x32x1xf32>
    %cst_139 = arith.constant dense<0.000000e+00> : vector<1xf32>
    %485 = vector.multi_reduction <add>, %484, %cst_139 [1, 2] : vector<1x32x1xf32> to vector<1xf32>
    %486 = vector.shape_cast %485 : vector<1xf32> to vector<1x1x1xf32>
    %487 = vector.extract %486[0, 0, 0] : f32 from vector<1x1x1xf32>
    %488 = vector.broadcast %487 : f32 to vector<1x1xf32>
    %cst_140 = arith.constant 4.096000e+03 : f32
    %489 = vector.broadcast %cst_140 : f32 to vector<1x1xf32>
    %490 = arith.divf %482, %489 : vector<1x1xf32>
    %cst_141 = arith.constant 4.096000e+03 : f32
    %491 = vector.broadcast %cst_141 : f32 to vector<1x1xf32>
    %492 = arith.divf %488, %491 : vector<1x1xf32>
    %493 = arith.mulf %490, %490 : vector<1x1xf32>
    %494 = arith.subf %492, %493 : vector<1x1xf32>
    %cst_142 = arith.constant 0.000000e+00 : f32
    %495 = vector.broadcast %cst_142 : f32 to vector<1x1xf32>
    %496 = arith.maximumf %494, %495 : vector<1x1xf32>
    %cst_143 = arith.constant 9.99999993E-9 : f32
    %497 = vector.broadcast %cst_143 : f32 to vector<1x1xf32>
    %498 = arith.addf %496, %497 : vector<1x1xf32>
    %499 = math.rsqrt %498 : vector<1x1xf32>
    %500 = vector.broadcast %490 : vector<1x1xf32> to vector<32x128xf32>
    %501 = arith.subf %472, %500 : vector<32x128xf32>
    %502 = vector.broadcast %499 : vector<1x1xf32> to vector<32x128xf32>
    %503 = arith.mulf %501, %502 : vector<32x128xf32>
    %c3_144 = arith.constant 3 : index
    %c0_145 = arith.constant 0 : index
    %c0_146 = arith.constant 0 : index
    %504 = vector.load %arg6[%c3_144, %c0_145, %c0_146] : memref<4x32x32xf32, #tpu.memory_space<vmem>>, vector<1x32x32xf32>
    %505 = vector.shape_cast %504 : vector<1x32x32xf32> to vector<32x32xf32>
    %cst_147 = arith.constant dense<0.000000e+00> : vector<32x128xf32>
    %506 = tpu.matmul %505, %503, %cst_147 {dimension_numbers = #tpu.dot_dimension_numbers<[1], [0], [0], [1], [0, 0, 1, 1], [], []>} : vector<32x32xf32>, vector<32x128xf32>, vector<32x128xf32> -> vector<32x128xf32>
    %c3_148 = arith.constant 3 : index
    %c0_149 = arith.constant 0 : index
    %c0_150 = arith.constant 0 : index
    %507 = vector.load %arg7[%c3_148, %c0_149, %c0_150] : memref<4x32x1xf32, #tpu.memory_space<vmem>>, vector<1x32x1xf32>
    %508 = vector.shape_cast %507 : vector<1x32x1xf32> to vector<32x1xf32>
    %509 = vector.broadcast %508 : vector<32x1xf32> to vector<32x128xf32>
    %510 = arith.addf %506, %509 : vector<32x128xf32>
    %511 = vector.extract_strided_slice %510 {offsets = [16, 0], sizes = [16, 128], strides = [1, 1]} : vector<32x128xf32> to vector<16x128xf32>
    %512 = arith.addf %395, %511 : vector<16x128xf32>
    %c0_151 = arith.constant 0 : index
    %c0_152 = arith.constant 0 : index
    %513 = memref.load %arg9[%c0_151, %c0_152] : memref<1x1xf32, #tpu.memory_space<smem>>
    %cst_153 = arith.constant 0.000000e+00 : f32
    %514 = vector.broadcast %cst_153 : f32 to vector<16x128xf32>
    %515 = arith.cmpf oge, %512, %514 : vector<16x128xf32>
    %516 = vector.broadcast %513 : f32 to vector<16x128xf32>
    %517 = arith.mulf %516, %512 : vector<16x128xf32>
    %518 = arith.select %515, %512, %517 : vector<16x128xi1>, vector<16x128xf32>
    %c0_154 = arith.constant 0 : index
    %c0_155 = arith.constant 0 : index
    %519 = vector.load %arg10[%c0_154, %c0_155] : memref<32x16xf32, #tpu.memory_space<vmem>>, vector<32x16xf32>
    %cst_156 = arith.constant dense<0.000000e+00> : vector<32x128xf32>
    %520 = tpu.matmul %519, %518, %cst_156 {dimension_numbers = #tpu.dot_dimension_numbers<[1], [0], [0], [1], [0, 0, 1, 1], [], []>} : vector<32x16xf32>, vector<16x128xf32>, vector<32x128xf32> -> vector<32x128xf32>
    %c0_157 = arith.constant 0 : index
    %c0_158 = arith.constant 0 : index
    %521 = vector.load %arg11[%c0_157, %c0_158] : memref<32x1xf32, #tpu.memory_space<vmem>>, vector<32x1xf32>
    %522 = vector.broadcast %521 : vector<32x1xf32> to vector<32x128xf32>
    %523 = arith.addf %520, %522 : vector<32x128xf32>
    %c0_159 = arith.constant 0 : index
    %c0_160 = arith.constant 0 : index
    %c0_161 = arith.constant 0 : index
    %524 = vector.load %arg12[%c0_159, %c0_160, %c0_161] : memref<1x32x128xf32, #tpu.memory_space<vmem>>, vector<1x32x128xf32>
    %525 = vector.shape_cast %524 : vector<1x32x128xf32> to vector<32x128xf32>
    %526 = vector.shape_cast %523 : vector<32x128xf32> to vector<1x32x128xf32>
    tpu.vector_store %arg12[%c0_159, %c0_160, %c0_161], %526 {strides = array<i32>} : memref<1x32x128xf32, #tpu.memory_space<vmem>>, vector<1x32x128xf32>,
    return
  }
  func.func @transform_0(%arg0: i32) -> (i32, i32, i32) {
    %c0_i32 = arith.constant 0 : i32
    %c0_i32_0 = arith.constant 0 : i32
    %c0_i32_1 = arith.constant 0 : i32
    return %arg0, %c0_i32, %c0_i32_0 : i32, i32, i32
  }
  func.func @transform_1(%arg0: i32) -> (i32, i32) {
    %c0_i32 = arith.constant 0 : i32
    %c0_i32_0 = arith.constant 0 : i32
    %c0_i32_1 = arith.constant 0 : i32
    return %c0_i32, %c0_i32_0 : i32, i32
  }
  func.func @transform_2(%arg0: i32) -> (i32, i32) {
    %c0_i32 = arith.constant 0 : i32
    %c0_i32_0 = arith.constant 0 : i32
    %c0_i32_1 = arith.constant 0 : i32
    return %c0_i32, %c0_i32_0 : i32, i32
  }
  func.func @transform_3(%arg0: i32) -> (i32, i32, i32) {
    %c0_i32 = arith.constant 0 : i32
    %c0_i32_0 = arith.constant 0 : i32
    %c0_i32_1 = arith.constant 0 : i32
    %c0_i32_2 = arith.constant 0 : i32
    return %c0_i32, %c0_i32_0, %c0_i32_1 : i32, i32, i32
  }
  func.func @transform_4(%arg0: i32) -> (i32, i32, i32) {
    %c0_i32 = arith.constant 0 : i32
    %c0_i32_0 = arith.constant 0 : i32
    %c0_i32_1 = arith.constant 0 : i32
    %c0_i32_2 = arith.constant 0 : i32
    return %c0_i32, %c0_i32_0, %c0_i32_1 : i32, i32, i32
  }
  func.func @transform_5(%arg0: i32) -> (i32, i32, i32) {
    %c0_i32 = arith.constant 0 : i32
    %c0_i32_0 = arith.constant 0 : i32
    %c0_i32_1 = arith.constant 0 : i32
    %c0_i32_2 = arith.constant 0 : i32
    return %c0_i32, %c0_i32_0, %c0_i32_1 : i32, i32, i32
  }
  func.func @transform_6(%arg0: i32) -> (i32, i32, i32) {
    %c0_i32 = arith.constant 0 : i32
    %c0_i32_0 = arith.constant 0 : i32
    %c0_i32_1 = arith.constant 0 : i32
    %c0_i32_2 = arith.constant 0 : i32
    return %c0_i32, %c0_i32_0, %c0_i32_1 : i32, i32, i32
  }
  func.func @transform_7(%arg0: i32) -> (i32, i32) {
    %c0_i32 = arith.constant 0 : i32
    %c0_i32_0 = arith.constant 0 : i32
    %c0_i32_1 = arith.constant 0 : i32
    return %c0_i32, %c0_i32_0 : i32, i32
  }
  func.func @transform_8(%arg0: i32) -> (i32, i32) {
    %c0_i32 = arith.constant 0 : i32
    %c0_i32_0 = arith.constant 0 : i32
    %c0_i32_1 = arith.constant 0 : i32
    return %c0_i32, %c0_i32_0 : i32, i32
  }
  func.func @transform_9(%arg0: i32) -> (i32, i32) {
    %c0_i32 = arith.constant 0 : i32
    %c0_i32_0 = arith.constant 0 : i32
    %c0_i32_1 = arith.constant 0 : i32
    return %c0_i32, %c0_i32_0 : i32, i32
  }
  func.func @transform_10(%arg0: i32) -> (i32, i32) {
    %c0_i32 = arith.constant 0 : i32
    %c0_i32_0 = arith.constant 0 : i32
    %c0_i32_1 = arith.constant 0 : i32
    return %c0_i32, %c0_i32_0 : i32, i32
  }
  func.func @transform_11(%arg0: i32) -> (i32, i32, i32) {
    %c0_i32 = arith.constant 0 : i32
    %c0_i32_0 = arith.constant 0 : i32
    %c0_i32_1 = arith.constant 0 : i32
    return %arg0, %c0_i32, %c0_i32_0 : i32, i32, i32
  }
}

</mosaic_0001>

<bundles_post_ra>
// kernel: tpu_custom_call.1
= control target key start
LH: loop header
LB: loop body
LE: loop exit
PB: predicated region body
PF: predicated region fallthrough
CT: control target
= control target key end

     0   :  { %s4393_s0 = inlined_call_operand.vmem [shape: f32[2,16,128], index: 0, kind: input, shape index: {}]   ;;  %s4394_s1 = inlined_call_operand.vmem [shape: f32[16,16], index: 1, kind: input, shape index: {}]   ;;  %s4395_s2 = inlined_call_operand.vmem [shape: f32[16,1], index: 2, kind: input, shape index: {}]   ;;  %s4396_s3 = inlined_call_operand.vmem [shape: f32[4,32,16], index: 3, kind: input, shape index: {}]   ;;  %s4397_s4 = inlined_call_operand.vmem [shape: f32[4,224,1], index: 4, kind: input, shape index: {}]   ;;  %s4398_s5 = inlined_call_operand.vmem [shape: f32[4,32,32], index: 5, kind: input, shape index: {}]   ;;  %s4399_s6 = inlined_call_operand.vmem [shape: f32[4,32,1], index: 6, kind: input, shape index: {}]   ;;  %s4400_s7 = inlined_call_operand.vmem [shape: f32[4,2], index: 7, kind: input, shape index: {}]   ;;  %s4401_s8 = inlined_call_operand.<no memory space> [shape: f32[1,1], index: 8, kind: input, shape index: {}]   ;;  %s4402_s9 = inlined_call_operand.vmem [shape: f32[32,16], index: 9, kind: input, shape index: {}]   ;;  %s4403_s10 = inlined_call_operand.vmem [shape: f32[32,1], index: 10, kind: input, shape index: {}]   ;;  %s4404_s11 = inlined_call_operand.hbm [shape: f32[2,32,128], index: 11, kind: output, shape index: {}]  }
   0x1   :  { %4411 = sst [smem:[#allocation9_spill]] %s4393_s0 }
   0x2   :  { %16 = sst [smem:[#allocation2]] %s4401_s8 }
   0x3   :  { %17 = vsyncpa [#allocation5], 0 }
   0x4   :  { %18 = vsyncpa [#allocation4], 0 }
   0x5   :  { %20 = vsyncpa [#allocation4 + $0x1], 0  ;;  %s3327_s19 = smov 0   ;;  %s3329_s20 = smov 0  }
   0x6   :  { %s3331_s21 = smov 0   ;;  %s3333_s22 = smov 0  }
   0x7 LB: > { %s3348_s8 = sadd.s32 4294967295, %s3252_s22   ;;  %s2866_s23 = sadd.s32 4294967294, %s3252_s22   ;;  %s3252_s22 = sphi %s3333_s22, %s4421_s22   ;;  %s3248_s21 = sphi %s3331_s21, %s4420_s21   ;;  %s3244_s20 = sphi %s3329_s20, %s4419_s20   ;;  %s3240_s19 = sphi %s3327_s19, %s4418_s19  }
   0x8   : > { %s3352_s24 = sadd.s32 1, %s3252_s22   ;;  %s269_s25 = sadd.s32 1, %s3248_s21 }
   0x9   : > { %s266_s26 = ssub.s32 %s3252_s22, %s3352_s24  ;;  %p279_p0 = scmp.ne.s32.totalorder %s3248_s21, %s3244_s20 }
   0xa   : > { %p267_p1 = scmp.eq.s32.totalorder %s266_s26, 0  ;;  %p280_p2 = scmp.eq.s32.totalorder %s3348_s8, 1 }
   0xb   : > { %p285_p3 = scmp.ne.s32.totalorder %s3244_s20, %s3240_s19  ;;  %p286_p4 = scmp.eq.s32.totalorder %s2866_s23, 1 }
   0xc   : > { %s3363_s27 = scalar_select %p267_p1, %s3248_s21, %s269_s25  }
   0xd   : > { %p3365_p5 = por %p280_p2, %p279_p0  ;;  %p3369_p6 = por %p286_p4, %p285_p3 }
   0xe   : > { %p2867_p7 = scmp.ge.s32.totalorder %s3252_s22, 1  ;;  %p293_p8 = scmp.lt.s32.totalorder %s3252_s22, 3 }
   0xf   : > { %p3101_p9 = scmp.eq.s32.totalorder %s3348_s8, 0  ;;  %s323_s13 = sshll.u32 %s4400_s7, 4  ;;  %s324_s13 = int_to_ptr.vmem [resolvable:$true] %s323_s13 }
  0x10   : > { %p294_p10 = pnand %p2867_p7, %p293_p8  ;;  %s3254_s14 = smov [#allocation3]  }
  0x12   : > { %p3093_p11 = pneg %p294_p10  ;;  %353 = sbr.rel (%p294_p10) target bundleno = 5677 (0x162d), region = 64 }
  0x14   : > { %p3094_p12 = pnand %p3101_p9, %p3093_p11 }
  0x16   : > { %3096 = dma.vmem_to_smem (!%p3094_p12), %s324_s13, 64, %s3254_s14, [#allocation5]  }
  0x17   : > { %3231 = dma.done.wait (%p3101_p9), [#allocation5], 64  }
  0x18   : > { %3233 = vsyncadd (%p3101_p9), [#allocation5], 4294967232 }
  0x19   : > { %360 = sfence }
  0x1a   : > { %p395_p13 = scmp.lt.s32.totalorder %s3348_s8, 1  ;;  %s4414_s0 = sld [smem:[#allocation9_spill]]  ;;  %vm412_vm0 = vcmask 7168   ;;  %v3255_v28 = vmov 2048.0   ;;  %v468_v38 = vld [vmem:[%s4395_s2] sm:$0xff]  ;;  %v469_v39 = vld [vmem:[%s4395_s2 + $0x8] sm:$0xff] }
  0x1b   : > { %3149 = vrcp.f32 %v3255_v28  ;;  %v3256_v42 = vmov 0   ;;  %v512_v46 = vld [vmem:[%s4397_s4 + $0x10] sm:$0xff]  ;;  %v467_v58 = vld [vmem:[%s4394_s1 + $0x8] sm:$0xff]  ;;  %vm480_vm5 = vcmask 130048   ;;  %v466_v59 = vld [vmem:[%s4394_s1] sm:$0xff]  ;;  %s538_s13 = sld [smem:[#allocation3]] }
  0x1c   : > { %s396_s15 = scalar_select %p395_p13, %s3348_s8, 1  ;;  %3147 = vset.pattern.permute.xlu1 %v3256_v42  ;;  %3146 = vset.pattern.permute.xlu0 %v3256_v42  ;;  %v510_v60 = vld [vmem:[%s4397_s4] sm:$0xff]  ;;  %v511_v61 = vld [vmem:[%s4397_s4 + $0x8] sm:$0xff]  ;;  %v513_v62 = vld [vmem:[%s4397_s4 + $0x18] sm:$0xff]  ;;  %vm787_vm14 = vcmask 1039360  }
  0x1d   : > { %3148 = vset.pattern.permute.xlu2 %v3256_v42  ;;  %s4405_s14 = smov 127   ;;  %s2877_s30 = sld [smem:[#allocation3 + $0x1]] }
  0x1e   : > { %s3045_s16 = sshll.u32 %s396_s15, 4  ;;  %s2964_s12 = sld [smem:[#allocation3 + $0x100]] }
  0x20   : > { %s399_s23 = scalar_lea.vmem %s4414_s0, %s3045_s16 }
  0x21   : > { %v3384_v0 = vld [vmem:[%s399_s23] sm:$0xff]  ;;  %v3389_v2 = vld [vmem:[%s399_s23 + $0x8] sm:$0xff]  ;;  %v3150_v29 = vpop.eup %3149  ;;  %s2915_s23 = sld [smem:[#allocation3 + $0x81]] }
  0x22   : > { %404 = vadd.xlane.f32.xlu0 %v3384_v0  ;;  %v402_v1 = vmul.f32 %v3384_v0, %v3384_v0  ;;  %v403_v3 = vmul.f32 %v3389_v2, %v3389_v2  ;;  %v440_v30 = vmul.f32 2048.0, %v3150_v29  ;;  %vm444_vm1 = vweird.f32 %v3150_v29 }
  0x24   : > { %408 = vadd.xlane.f32.xlu1 %v402_v1  ;;  %v441_v31 = vsub.f32 1.0, %v440_v30 }
  0x26   : > { %v442_v32 = vmul.f32 %v3150_v29, %v441_v31 }
  0x28   : > { %v443_v33 = vadd.f32 %v3150_v29, %v442_v32 }
  0x2a   : > { %406 = vadd.xlane.f32.xlu0 %v3389_v2  ;;  %v445_v35 = vsel %vm444_vm1, %v3150_v29, %v443_v33 }
  0x2c   : > { %410 = vadd.xlane.f32.xlu1 %v403_v3 }
  0x3e   : > { %477 = vperm.xlu0 %3146, %v469_v39  }
  0x45   : > { %472 = vperm.xlu1 %3147, %v468_v38  }
  0x4d   : > { %556 = vperm.xlu1 %3147, %v512_v46  }
  0x95   : > { %v405_v4 = vpop.xlane.xlu0 %404 }
  0x96   : > { %v413_v7 = vsel %vm412_vm0, %v405_v4, 0.0 }
  0x97   : > { %v409_v5 = vpop.xlane.xlu1 %408 }
  0x98   : > { %v426_v12 = vsel %vm412_vm0, %v409_v5, 0.0  ;;  %v540_v5 = vld [vmem:[%s4396_s3] sm:$0xff] }
  0x9d   : > { %v407_v6 = vpop.xlane.xlu0 %406 }
  0x9e   : > { %v414_v8 = vsel %vm412_vm0, %v407_v6, 0.0  ;;  %v542_v6 = vld [vmem:[%s4396_s3 + $0x10] sm:$0xff] }
  0x9f   : > { %v415_v9 = vadd.f32 %v414_v8, %v413_v7  ;;  %v411_v10 = vpop.xlane.xlu1 %410  ;;  %v541_v7 = vld [vmem:[%s4396_s3 + $0x8] sm:$0xff]  ;;  %v543_v8 = vld [vmem:[%s4396_s3 + $0x18] sm:$0xff] }
  0xa0   : > { %v427_v11 = vsel %vm412_vm0, %v411_v10, 0.0 }
  0xa1   : > { %416 = vadd.xlane.f32.xlu2 %v415_v9  ;;  %v428_v13 = vadd.f32 %v427_v11, %v426_v12  ;;  %v609_v11 = vstv %s538_s13 }
  0xa9   : > { %429 = vadd.xlane.f32.xlu2 %v428_v13 }
  0xb0   : > { %v478_v63 = vpop.permute.xlu0 %477 }
  0xb7   : > { %v473_v1 = vpop.permute.xlu1 %472 }
  0xc1   : > { %546 = vperm.xlu2 %3148, %v510_v60   ;;  %v523_v60 = vld [vmem:[%s4397_s4 + $0x68] sm:$0xff] }
  0xc9   : > { %551 = vperm.xlu2 %3148, %v511_v61   ;;  %v524_v61 = vld [vmem:[%s4397_s4 + $0x70] sm:$0xff] }
  0xd1   : > { %561 = vperm.xlu2 %3148, %v513_v62  }
 0x114   : > { %v417_v14 = vpop.xlane.xlu2 %416 }
 0x115   : > { %v418_v15 = vrot.slane %v417_v14, 4 }
 0x117   : > { %v419_v16 = vadd.f32 %v418_v15, %v417_v14 }
 0x119   : > { %v420_v17 = vrot.slane %v419_v16, 2 }
 0x11b   : > { %v421_v18 = vadd.f32 %v420_v17, %v419_v16  ;;  %v557_v16 = vpop.permute.xlu1 %556 }
 0x11c   : > { %v430_v19 = vpop.xlane.xlu2 %429 }
 0x11d   : > { %v431_v20 = vrot.slane %v430_v19, 4  ;;  %v422_v21 = vrot.slane %v421_v18, 1 }
 0x11f   : > { %v432_v22 = vadd.f32 %v431_v20, %v430_v19  ;;  %v423_v23 = vadd.f32 %v422_v21, %v421_v18 }
 0x121   : > { %3051 = vpush %v423_v23  ;;  %v433_v24 = vrot.slane %v432_v22, 2 }
 0x123   : > { %v434_v25 = vadd.f32 %v433_v24, %v432_v22 }
 0x124   : > { %v547_v9 = vpop.permute.xlu2 %546 }
 0x125   : > { %v435_v26 = vrot.slane %v434_v25, 1 }
 0x127   : > { %v436_v27 = vadd.f32 %v435_v26, %v434_v25 }
 0x129   : > { %3053 = vpush %v436_v27 }
 0x12c   : > { %v552_v14 = vpop.permute.xlu2 %551 }
 0x134   : > { %v562_v26 = vpop.permute.xlu2 %561 }
 0x152   : > { %s3052_s25 = spop %3051 }
 0x153   : > { %v425_v34 = vstv %s3052_s25 }
 0x154   : > { %v446_v36 = vmul.f32 %v445_v35, %v425_v34  ;;  %v522_v34 = vld [vmem:[%s4397_s4 + $0x60] sm:$0xff] }
 0x156   : > { %v448_v41 = vmul.f32 %v446_v36, %v446_v36  ;;  %v463_v53 = vsub.f32 %v3389_v2, %v446_v36  ;;  %v462_v56 = vsub.f32 %v3384_v0, %v446_v36 }
 0x15a   : > { %s3054_s26 = spop %3053 }
 0x15b   : > { %v438_v37 = vstv %s3054_s26  ;;  %s4409_s26 = smov 2  }
 0x15c   : > { %v447_v40 = vmul.f32 %v445_v35, %v438_v37  ;;  %v527_v35 = vld [vmem:[%s4397_s4 + $0x88] sm:$0xff] }
 0x15e   : > { %v449_v43 = vsub.f32 %v447_v40, %v448_v41 }
 0x160   : > { %v450_v44 = vmax.f32 %v449_v43, 0.0 }
 0x162   : > { %v451_v45 = vadd.f32 1e-08, %v450_v44 }
 0x164   : > { %3151 = vrsqrt.f32 %v451_v45  ;;  %vm458_vm3 = vweird.f32 %v451_v45 }
 0x16a   : > { %v3152_v47 = vpop.eup %3151 }
 0x16b   : > { %v453_v48 = vmul.f32 %v3152_v47, %v451_v45  ;;  %vm459_vm2 = vweird.f32 %v3152_v47 }
 0x16c   : > { %vm460_vm4 = vmor %vm458_vm3, %vm459_vm2 }
 0x16d   : > { %v454_v49 = vmul.f32 %v3152_v47, %v453_v48 }
 0x16f   : > { %v455_v50 = vmul.f32 0.5, %v454_v49 }
 0x171   : > { %v456_v51 = vsub.f32 1.5, %v455_v50 }
 0x173   : > { %v457_v52 = vmul.f32 %v3152_v47, %v456_v51 }
 0x175   : > { %v461_v54 = vsel %vm460_vm4, %v3152_v47, %v457_v52 }
 0x176   : > { %v465_v55 = vmul.f32 %v463_v53, %v461_v54  ;;  %v464_v57 = vmul.f32 %v462_v56, %v461_v54 }
 0x178   : > { %501 = vmatpush.msra.mxu0 %v465_v55  ;;  %3047 = vmatpush.msra.mxu2 %v465_v55 }
 0x17a   : > { %502 = vmatpush.msra.mxu0 %v464_v57  ;;  %3048 = vmatpush.msra.mxu2 %v464_v57 }
 0x17b   : > { %2876 = vmatmul.msk.f32.vlgmr.msra.gmra.mxu2 %vm480_vm5, %v467_v58  ;;  %2875 = vmatmul.msk.f32.vlgmr.msra.gmra.mxu0 %vm480_vm5, %v466_v59  ;;  %v526_v58 = vld [vmem:[%s4397_s4 + $0x80] sm:$0xff]  ;;  %v528_v59 = vld [vmem:[%s4397_s4 + $0x90] sm:$0xff] }
 0x1f8   : > { %v504_v0 = vpop.f32.mrf.mxu0 }
 0x1f9   : > { %v3428_v4 = vadd.f32 %v504_v0, %v473_v1 }
 0x1fe   : > { %v507_v2 = vpop.f32.mrf.mxu2 }
 0x1ff   : > { %v3426_v3 = vadd.f32 %v507_v2, %v478_v63 }
 0x201   : > { %590 = vmatpush.msra.mxu1 %v3426_v3  ;;  %3049 = vmatpush.msra.mxu3 %v3426_v3 }
 0x203   : > { %591 = vmatpush.msra.mxu1 %v3428_v4  ;;  %3050 = vmatpush.msra.mxu3 %v3428_v4 }
 0x204   : > { %2878 = vmatmul.msk.f32.vlgmr.msra.gmra.mxu1 %vm480_vm5, %v540_v5  ;;  %2880 = vmatmul.msk.f32.vlgmr.msra.gmra.mxu3 %vm480_vm5, %v542_v6 }
 0x20c   : > { %2879 = vmatmul.msk.f32.gmra.mxu1 %vm480_vm5, %v541_v7  ;;  %2881 = vmatmul.msk.f32.gmra.mxu3 %vm480_vm5, %v543_v8 }
 0x281   : > { %v593_v10 = vpop.f32.mrf.mxu1 }
 0x282   : > { %v594_v12 = vadd.f32 %v593_v10, %v547_v9 }
 0x284   : > { %v610_v13 = vmul.f32 %v609_v11, %v594_v12  ;;  %vm605_vm6 = vcmp.ge.f32.partialorder %v594_v12, 0.0 }
 0x286   : > { %v3450_v15 = vsel %vm605_vm6, %v594_v12, %v610_v13 }
 0x287   : > { %v599_v17 = vpop.f32.mrf.mxu3  ;;  %622 = vadd.xlane.f32.xlu1 %v3450_v15  ;;  %v618_v24 = vmul.f32 %v3450_v15, %v3450_v15 }
 0x288   : > { %v600_v18 = vadd.f32 %v599_v17, %v557_v16 }
 0x289   : > { %v596_v19 = vpop.f32.mrf.mxu1 }
 0x28a   : > { %v612_v20 = vmul.f32 %v609_v11, %v600_v18  ;;  %v597_v21 = vadd.f32 %v596_v19, %v552_v14  ;;  %vm607_vm7 = vcmp.ge.f32.partialorder %v600_v18, 0.0  ;;  %v3257_v14 = vmov 4096.0  }
 0x28b   : > { %3153 = vrcp.f32 %v3257_v14 }
 0x28c   : > { %v611_v22 = vmul.f32 %v609_v11, %v597_v21  ;;  %v3453_v23 = vsel %vm607_vm7, %v600_v18, %v612_v20  ;;  %vm606_vm8 = vcmp.ge.f32.partialorder %v597_v21, 0.0 }
 0x28d   : > { %626 = vadd.xlane.f32.xlu2 %v3453_v23  ;;  %v620_v31 = vmul.f32 %v3453_v23, %v3453_v23 }
 0x28e   : > { %v3458_v25 = vsel %vm606_vm8, %v597_v21, %v611_v22  ;;  %vm1015_vm8 = vcmask 261120  }
 0x28f   : > { %v602_v27 = vpop.f32.mrf.mxu3  ;;  %624 = vadd.xlane.f32.xlu0 %v3458_v25  ;;  %630 = vadd.xlane.f32.xlu1 %v618_v24  ;;  %v619_v30 = vmul.f32 %v3458_v25, %v3458_v25 }
 0x290   : > { %v603_v28 = vadd.f32 %v602_v27, %v562_v26 }
 0x291   : > { %v3154_v16 = vpop.eup %3153 }
 0x292   : > { %v613_v29 = vmul.f32 %v609_v11, %v603_v28  ;;  %vm608_vm9 = vcmp.ge.f32.partialorder %v603_v28, 0.0  ;;  %v673_v17 = vmul.f32 4096.0, %v3154_v16  ;;  %vm677_vm10 = vweird.f32 %v3154_v16 }
 0x294   : > { %v3465_v32 = vsel %vm608_vm9, %v603_v28, %v613_v29  ;;  %v674_v18 = vsub.f32 1.0, %v673_v17 }
 0x295   : > { %632 = vadd.xlane.f32.xlu2 %v619_v30  ;;  %v621_v33 = vmul.f32 %v3465_v32, %v3465_v32 }
 0x296   : > { %v675_v19 = vmul.f32 %v3154_v16, %v674_v18 }
 0x297   : > { %628 = vadd.xlane.f32.xlu0 %v3465_v32  ;;  %634 = vadd.xlane.f32.xlu1 %v620_v31 }
 0x298   : > { %v676_v20 = vadd.f32 %v3154_v16, %v675_v19 }
 0x29a   : > { %v3496_v22 = vsel %vm677_vm10, %v3154_v16, %v676_v20 }
 0x29d   : > { %636 = vadd.xlane.f32.xlu2 %v621_v33 }
 0x2b5   : > { %794 = vperm.xlu2 %3148, %v522_v34  }
 0x2bd   : > { %823 = vperm.xlu2 %3148, %v527_v35  }
 0x2fa   : > { %v623_v36 = vpop.xlane.xlu1 %622 }
 0x2fb   : > { %v638_v41 = vsel %vm412_vm0, %v623_v36, 0.0 }
 0x300   : > { %v627_v37 = vpop.xlane.xlu2 %626 }
 0x301   : > { %v641_v44 = vsel %vm412_vm0, %v627_v37, 0.0 }
 0x302   : > { %v625_v38 = vpop.xlane.xlu0 %624  ;;  %v631_v39 = vpop.xlane.xlu1 %630 }
 0x303   : > { %v639_v40 = vsel %vm412_vm0, %v625_v38, 0.0  ;;  %v655_v49 = vsel %vm412_vm0, %v631_v39, 0.0  ;;  %v516_v38 = vld [vmem:[%s4397_s4 + $0x30] sm:$0xff] }
 0x304   : > { %v640_v42 = vadd.f32 %v639_v40, %v638_v41  ;;  %v515_v40 = vld [vmem:[%s4397_s4 + $0x28] sm:$0xff]  ;;  %v514_v41 = vld [vmem:[%s4397_s4 + $0x20] sm:$0xff] }
 0x306   : > { %v642_v48 = vadd.f32 %v641_v44, %v640_v42 }
 0x308   : > { %v633_v43 = vpop.xlane.xlu2 %632 }
 0x309   : > { %v656_v45 = vsel %vm412_vm0, %v633_v43, 0.0 }
 0x30a   : > { %v629_v46 = vpop.xlane.xlu0 %628  ;;  %v635_v47 = vpop.xlane.xlu1 %634  ;;  %v657_v51 = vadd.f32 %v656_v45, %v655_v49  ;;  %v518_v49 = vld [vmem:[%s4397_s4 + $0x40] sm:$0xff] }
 0x30b   : > { %v643_v50 = vsel %vm412_vm0, %v629_v46, 0.0  ;;  %v658_v53 = vsel %vm412_vm0, %v635_v47, 0.0  ;;  %v517_v47 = vld [vmem:[%s4397_s4 + $0x38] sm:$0xff] }
 0x30c   : > { %v644_v52 = vadd.f32 %v643_v50, %v642_v48  ;;  %v659_v54 = vadd.f32 %v658_v53, %v657_v51  ;;  %v519_v50 = vld [vmem:[%s4397_s4 + $0x48] sm:$0xff] }
 0x30e   : > { %645 = vadd.xlane.f32.xlu0 %v644_v52 }
 0x310   : > { %v637_v55 = vpop.xlane.xlu2 %636 }
 0x311   : > { %v660_v56 = vsel %vm412_vm0, %v637_v55, 0.0 }
 0x312   : > { %v661_v57 = vadd.f32 %v660_v56, %v659_v54  ;;  %v520_v56 = vld [vmem:[%s4397_s4 + $0x50] sm:$0xff] }
 0x314   : > { %662 = vadd.xlane.f32.xlu1 %v661_v57  ;;  %v521_v57 = vld [vmem:[%s4397_s4 + $0x58] sm:$0xff] }
 0x322   : > { %818 = vperm.xlu0 %3146, %v526_v58   ;;  %v531_v58 = vld [vmem:[%s4397_s4 + $0xa8] sm:$0xff] }
 0x32a   : > { %828 = vperm.xlu0 %3146, %v528_v59  }
 0x32d   : > { %799 = vperm.xlu1 %3147, %v523_v60  }
 0x335   : > { %804 = vperm.xlu1 %3147, %v524_v61   ;;  %v525_v61 = vld [vmem:[%s4397_s4 + $0x78] sm:$0xff] }
 0x381   : > { %v646_v62 = vpop.xlane.xlu0 %645 }
 0x382   : > { %v647_v63 = vrot.slane %v646_v62, 4 }
 0x384   : > { %v648_v0 = vadd.f32 %v647_v63, %v646_v62  ;;  %v529_v62 = vld [vmem:[%s4397_s4 + $0x98] sm:$0xff]  ;;  %v530_v63 = vld [vmem:[%s4397_s4 + $0xa0] sm:$0xff] }
 0x386   : > { %v649_v1 = vrot.slane %v648_v0, 2 }
 0x387   : > { %v663_v2 = vpop.xlane.xlu1 %662 }
 0x388   : > { %v664_v5 = vrot.slane %v663_v2, 4  ;;  %v650_v6 = vadd.f32 %v649_v1, %v648_v0  ;;  %v533_v0 = vld [vmem:[%s4397_s4 + $0xb8] sm:$0xff]  ;;  %v532_v1 = vld [vmem:[%s4397_s4 + $0xb0] sm:$0xff] }
 0x38a   : > { %v665_v7 = vadd.f32 %v664_v5, %v663_v2  ;;  %v651_v8 = vrot.slane %v650_v6, 1  ;;  %v534_v2 = vld [vmem:[%s4397_s4 + $0xc0] sm:$0xff]  ;;  %v795_v5 = vpop.permute.xlu2 %794 }
 0x38c   : > { %v652_v9 = vadd.f32 %v651_v8, %v650_v6  ;;  %v666_v10 = vrot.slane %v665_v7, 2 }
 0x38e   : > { %3055 = vpush %v652_v9  ;;  %v667_v11 = vadd.f32 %v666_v10, %v665_v7 }
 0x390   : > { %v668_v12 = vrot.slane %v667_v11, 1 }
 0x392   : > { %v669_v13 = vadd.f32 %v668_v12, %v667_v11  ;;  %v3545_v7 = vpop.permute.xlu2 %823 }
 0x394   : > { %3057 = vpush %v669_v13  ;;  %v819_v6 = vpop.permute.xlu0 %818 }
 0x39c   : > { %v3549_v9 = vpop.permute.xlu0 %828 }
 0x39f   : > { %v3547_v8 = vpop.permute.xlu1 %799 }
 0x3a7   : > { %v805_v11 = vpop.permute.xlu1 %804 }
 0x3bf   : > { %s3056_s15 = spop %3055 }
 0x3c0   : > { %v654_v21 = vstv %s3056_s15  ;;  %s3259_s15 = smov 1  }
 0x3c1   : > { %v679_v24 = vmul.f32 %v3496_v22, %v654_v21 }
 0x3c3   : > { %v681_v28 = vmul.f32 %v679_v24, %v679_v24 }
 0x3c5   : > { %s3058_s16 = spop %3057 }
 0x3c6   : > { %v671_v26 = vstv %s3058_s16 }
 0x3c7   : > { %v680_v27 = vmul.f32 %v3496_v22, %v671_v26 }
 0x3c9   : > { %v682_v29 = vsub.f32 %v680_v27, %v681_v28 }
 0x3cb   : > { %v683_v30 = vmax.f32 %v682_v29, 0.0 }
 0x3cd   : > { %v684_v31 = vadd.f32 1e-08, %v683_v30 }
 0x3cf   : > { %3155 = vrsqrt.f32 %v684_v31  ;;  %vm691_vm12 = vweird.f32 %v684_v31 }
 0x3d5   : > { %v3156_v33 = vpop.eup %3155 }
 0x3d6   : > { %v686_v34 = vmul.f32 %v3156_v33, %v684_v31  ;;  %vm692_vm11 = vweird.f32 %v3156_v33 }
 0x3d7   : > { %vm693_vm13 = vmor %vm691_vm12, %vm692_vm11 }
 0x3d8   : > { %v687_v35 = vmul.f32 %v3156_v33, %v686_v34 }
 0x3da   : > { %v688_v36 = vmul.f32 0.5, %v687_v35 }
 0x3dc   : > { %v689_v37 = vsub.f32 1.5, %v688_v36 }
 0x3de   : > { %v690_v39 = vmul.f32 %v3156_v33, %v689_v37 }
 0x3e0   : > { %v694_v42 = vsel %vm693_vm13, %v3156_v33, %v690_v39 }
 0x3e1   : > { %v697_v43 = vmul.f32 %v694_v42, %v516_v38  ;;  %v696_v44 = vmul.f32 %v694_v42, %v515_v40  ;;  %v695_v45 = vmul.f32 %v694_v42, %v514_v41  ;;  %v698_v51 = vmul.f32 %v694_v42, %v517_v47 }
 0x3e3   : > { %711 = vperm.xlu1 %3147, %v697_v43   ;;  %706 = vperm.xlu0 %3146, %v696_v44   ;;  %v723_v46 = vmul.f32 %v695_v45, %v679_v24  ;;  %v724_v48 = vmul.f32 %v696_v44, %v679_v24  ;;  %v725_v54 = vmul.f32 %v697_v43, %v679_v24 }
 0x3e4   : > { %701 = vperm.xlu2 %3148, %v695_v45   ;;  %v726_v55 = vmul.f32 %v698_v51, %v679_v24 }
 0x3e5   : > { %v727_v52 = vsub.f32 %v518_v49, %v723_v46  ;;  %v728_v53 = vsub.f32 %v519_v50, %v724_v48  ;;  %v729_v59 = vsub.f32 %v520_v56, %v725_v54  ;;  %v900_v49 = vstv %s2877_s30  ;;  %s2914_s30 = sld [smem:[#allocation3 + $0x80]] }
 0x3e6   : > { %v730_v60 = vsub.f32 %v521_v57, %v726_v55 }
 0x3eb   : > { %716 = vperm.xlu1 %3147, %v698_v51   ;;  %733 = vperm.xlu0 %3146, %v727_v52  }
 0x3ec   : > { %738 = vperm.xlu2 %3148, %v728_v53  }
 0x3f3   : > { %851 = vperm.xlu1 %3147, %v531_v58   ;;  %743 = vperm.xlu0 %3146, %v729_v59  }
 0x3f4   : > { %748 = vperm.xlu2 %3148, %v730_v60  }
 0x3fb   : > { %809 = vperm.xlu1 %3147, %v525_v61   ;;  %833 = vperm.xlu0 %3146, %v529_v62  }
 0x3fc   : > { %846 = vperm.xlu2 %3148, %v530_v63  }
 0x403   : > { %861 = vperm.xlu0 %3146, %v533_v0  }
 0x404   : > { %856 = vperm.xlu2 %3148, %v532_v1  }
 0x40c   : > { %874 = vperm.xlu2 %3148, %v534_v2  }
 0x43e   : > { %v702_v10 = vpop.permute.xlu2 %701 }
 0x43f   : > { %v719_v18 = vmul.f32 %v702_v10, %v3450_v15  ;;  %v537_v15 = vld [vmem:[%s4397_s4 + $0xd8] sm:$0xff] }
 0x446   : > { %v739_v14 = vpop.permute.xlu2 %738 }
 0x44e   : > { %v749_v28 = vpop.permute.xlu2 %748 }
 0x455   : > { %v707_v12 = vpop.permute.xlu0 %706  ;;  %v712_v16 = vpop.permute.xlu1 %711 }
 0x456   : > { %v720_v13 = vmul.f32 %v707_v12, %v3458_v25  ;;  %v721_v25 = vmul.f32 %v712_v16, %v3453_v23  ;;  %v536_v23 = vld [vmem:[%s4397_s4 + $0xd0] sm:$0xff]  ;;  %v847_v30 = vpop.permute.xlu2 %846 }
 0x458   : > { %v3552_v17 = vadd.f32 %v739_v14, %v720_v13 }
 0x45a   : > { %777 = vrot.lane.b32.xlu2 %v3552_v17, %s4405_s14  ;;  %761 = vrot.lane.b32.xlu0 %v3552_v17, %s3259_s15 }
 0x45d   : > { %v734_v19 = vpop.permute.xlu0 %733  ;;  %v717_v21 = vpop.permute.xlu1 %716 }
 0x45e   : > { %v751_v20 = vadd.f32 %v734_v19, %v719_v18  ;;  %v722_v24 = vmul.f32 %v717_v21, %v3465_v32  ;;  %v535_v32 = vld [vmem:[%s4397_s4 + $0xc8] sm:$0xff]  ;;  %v857_v34 = vpop.permute.xlu2 %856 }
 0x460   : > { %759 = vrot.lane.b32.xlu1 %v751_v20, %s3259_s15  ;;  %v754_v29 = vadd.f32 %v749_v28, %v722_v24  ;;  %v836_v42 = vmul.f32 %v819_v6, %v751_v20  ;;  %v837_v6 = vmul.f32 %v3545_v7, %v3552_v17 }
 0x462   : > { %775 = vrot.lane.b32.xlu0 %v751_v20, %s4405_s14 }
 0x465   : > { %v744_v26 = vpop.permute.xlu0 %743  ;;  %v852_v33 = vpop.permute.xlu1 %851 }
 0x466   : > { %v753_v27 = vadd.f32 %v744_v26, %v721_v25  ;;  %v875_v37 = vpop.permute.xlu2 %874 }
 0x468   : > { %779 = vrot.lane.b32.xlu2 %v753_v27, %s4405_s14  ;;  %763 = vrot.lane.b32.xlu1 %v753_v27, %s3259_s15  ;;  %v838_v57 = vmul.f32 %v3549_v9, %v753_v27 }
 0x46a   : > { %765 = vrot.lane.b32.xlu0 %v754_v29, %s3259_s15 }
 0x46d   : > { %v834_v31 = vpop.permute.xlu0 %833  ;;  %v810_v36 = vpop.permute.xlu1 %809 }
 0x46e   : > { %v839_v2 = vmul.f32 %v834_v31, %v754_v29 }
 0x470   : > { %889 = vperm.xlu2 %3148, %v537_v15   ;;  %781 = vrot.lane.b32.xlu1 %v754_v29, %s4405_s14  ;;  %s4407_s14 = smov 126  }
 0x472   : > { %884 = vperm.xlu0 %3146, %v536_v23  }
 0x475   : > { %v862_v35 = vpop.permute.xlu0 %861 }
 0x478   : > { %879 = vperm.xlu1 %3147, %v535_v32  }
 0x4b4   : > { %v778_v40 = vpop.permute.xlu2 %777 }
 0x4c2   : > { %v780_v52 = vpop.permute.xlu2 %779 }
 0x4c3   : > { %v790_v59 = vsel %vm787_vm14, %v780_v52, 0.0 }
 0x4c4   : > { %v866_v0 = vmul.f32 %v857_v34, %v790_v59  ;;  %v2887_v34 = vld [vmem:[%s4397_s4 + $0xe8] sm:$0xff]  ;;  %v2888_v59 = vld [vmem:[%s4397_s4 + $0xf0] sm:$0xff] }
 0x4ca   : > { %v890_v25 = vpop.permute.xlu2 %889 }
 0x4cc   : > { %v762_v38 = vpop.permute.xlu0 %761 }
 0x4cd   : > { %v772_v60 = vsel %vm412_vm0, 0.0, %v762_v38 }
 0x4ce   : > { %v813_v1 = vmul.f32 %v3547_v8, %v772_v60  ;;  %v2886_v60 = vld [vmem:[%s4397_s4 + $0xe0] sm:$0xff] }
 0x4d0   : > { %v841_v16 = vadd.f32 %v837_v6, %v813_v1 }
 0x4d2   : > { %v760_v39 = vpop.permute.xlu1 %759 }
 0x4d3   : > { %v771_v41 = vsel %vm412_vm0, 0.0, %v760_v39 }
 0x4d4   : > { %v812_v43 = vmul.f32 %v795_v5, %v771_v41  ;;  %v776_v44 = vpop.permute.xlu0 %775 }
 0x4d5   : > { %v788_v45 = vsel %vm787_vm14, %v776_v44, 0.0 }
 0x4d6   : > { %v840_v46 = vadd.f32 %v836_v42, %v812_v43  ;;  %v864_v47 = vmul.f32 %v847_v30, %v788_v45 }
 0x4d8   : > { %v868_v48 = vadd.f32 %v864_v47, %v840_v46 }
 0x4da   : > { %v764_v50 = vpop.permute.xlu1 %763  ;;  %v892_v51 = vadd.f32 %v875_v37, %v868_v48 }
 0x4db   : > { %v773_v53 = vsel %vm412_vm0, 0.0, %v764_v50 }
 0x4dc   : > { %v814_v54 = vmul.f32 %v805_v11, %v773_v53  ;;  %v766_v55 = vpop.permute.xlu0 %765  ;;  %vm896_vm15 = vcmp.ge.f32.partialorder %v892_v51, 0.0  ;;  %v901_v56 = vmul.f32 %v900_v49, %v892_v51  ;;  %v789_v11 = vsel %vm787_vm14, %v778_v40, 0.0 }
 0x4dd   : > { %v774_v58 = vsel %vm412_vm0, 0.0, %v766_v55  ;;  %v865_v8 = vmul.f32 %v852_v33, %v789_v11  ;;  %v992_v33 = vld [vmem:[%s4399_s6 + $0x8] sm:$0xff] }
 0x4de   : > { %v3583_v61 = vsel %vm896_vm15, %v892_v51, %v901_v56  ;;  %v842_v62 = vadd.f32 %v838_v57, %v814_v54  ;;  %v815_v63 = vmul.f32 %v810_v36, %v774_v58  ;;  %v991_v58 = vld [vmem:[%s4399_s6] sm:$0xff] }
 0x4df   : > { %913 = vadd.xlane.f32.xlu1 %v3583_v61  ;;  %v909_v19 = vmul.f32 %v3583_v61, %v3583_v61  ;;  %v869_v17 = vadd.f32 %v865_v8, %v841_v16 }
 0x4e0   : > { %v870_v10 = vadd.f32 %v866_v0, %v842_v62  ;;  %v843_v12 = vadd.f32 %v839_v2, %v815_v63 }
 0x4e2   : > { %v782_v5 = vpop.permute.xlu1 %781 }
 0x4e3   : > { %v791_v9 = vsel %vm787_vm14, %v782_v5, 0.0 }
 0x4e4   : > { %v867_v13 = vmul.f32 %v862_v35, %v791_v9  ;;  %v885_v14 = vpop.permute.xlu0 %884  ;;  %v2889_v35 = vld [vmem:[%s4397_s4 + $0xf8] sm:$0xff] }
 0x4e5   : > { %v894_v18 = vadd.f32 %v885_v14, %v870_v10 }
 0x4e6   : > { %v871_v20 = vadd.f32 %v867_v13, %v843_v12 }
 0x4e7   : > { %921 = vadd.xlane.f32.xlu1 %v909_v19  ;;  %vm898_vm1 = vcmp.ge.f32.partialorder %v894_v18, 0.0  ;;  %v903_v21 = vmul.f32 %v900_v49, %v894_v18 }
 0x4e8   : > { %v895_v24 = vadd.f32 %v890_v25, %v871_v20 }
 0x4e9   : > { %v3593_v7 = vsel %vm898_vm1, %v894_v18, %v903_v21 }
 0x4ea   : > { %917 = vadd.xlane.f32.xlu2 %v3593_v7  ;;  %v880_v26 = vpop.permute.xlu1 %879  ;;  %v911_v28 = vmul.f32 %v3593_v7, %v3593_v7  ;;  %v904_v15 = vmul.f32 %v900_v49, %v895_v24  ;;  %vm899_vm3 = vcmp.ge.f32.partialorder %v895_v24, 0.0 }
 0x4eb   : > { %v893_v27 = vadd.f32 %v880_v26, %v869_v17 }
 0x4ec   : > { %v3601_v32 = vsel %vm899_vm3, %v895_v24, %v904_v15  ;;  %vm1317_vm3 = vcmask 15360  }
 0x4ed   : > { %vm897_vm2 = vcmp.ge.f32.partialorder %v893_v27, 0.0  ;;  %v902_v29 = vmul.f32 %v900_v49, %v893_v27  ;;  %v912_v31 = vmul.f32 %v3601_v32, %v3601_v32 }
 0x4ef   : > { %925 = vadd.xlane.f32.xlu1 %v911_v28  ;;  %v3598_v23 = vsel %vm897_vm2, %v893_v27, %v902_v29  ;;  %vm1334_vm2 = vcmask 1031168  }
 0x4f0   : > { %915 = vadd.xlane.f32.xlu0 %v3598_v23  ;;  %v910_v30 = vmul.f32 %v3598_v23, %v3598_v23 }
 0x4f2   : > { %919 = vadd.xlane.f32.xlu2 %v3601_v32 }
 0x4f8   : > { %923 = vadd.xlane.f32.xlu0 %v910_v30 }
 0x500   : > { %927 = vadd.xlane.f32.xlu0 %v912_v31 }
 0x514   : > { %1002 = vperm.xlu0 %3146, %v992_v33  }
 0x51c   : > { %1104 = vperm.xlu0 %3146, %v2887_v34  }
 0x524   : > { %1114 = vperm.xlu0 %3146, %v2889_v35  }
 0x552   : > { %v914_v36 = vpop.xlane.xlu1 %913 }
 0x553   : > { %v929_v39 = vsel %vm412_vm0, %v914_v36, 0.0 }
 0x55a   : > { %v922_v41 = vpop.xlane.xlu1 %921 }
 0x55b   : > { %v946_v50 = vsel %vm412_vm0, %v922_v41, 0.0  ;;  %v987_v41 = vld [vmem:[%s4398_s5] sm:$0xff] }
 0x55d   : > { %v918_v37 = vpop.xlane.xlu2 %917 }
 0x55e   : > { %v932_v44 = vsel %vm412_vm0, %v918_v37, 0.0 }
 0x562   : > { %v926_v51 = vpop.xlane.xlu1 %925 }
 0x563   : > { %v916_v38 = vpop.xlane.xlu0 %915  ;;  %v949_v53 = vsel %vm412_vm0, %v926_v51, 0.0  ;;  %v1162_v51 = vstv %s2914_s30  ;;  %s4416_s30 = smov 2  }
 0x564   : > { %v930_v40 = vsel %vm412_vm0, %v916_v38, 0.0 }
 0x565   : > { %v931_v42 = vadd.f32 %v930_v40, %v929_v39  ;;  %v920_v43 = vpop.xlane.xlu2 %919 }
 0x566   : > { %v934_v46 = vsel %vm412_vm0, %v920_v43, 0.0 }
 0x567   : > { %v933_v45 = vadd.f32 %v932_v44, %v931_v42 }
 0x569   : > { %v935_v47 = vadd.f32 %v934_v46, %v933_v45 }
 0x56b   : > { %v924_v48 = vpop.xlane.xlu0 %923  ;;  %936 = vadd.xlane.f32.xlu2 %v935_v47  ;;  %v2916_v47 = vld [vmem:[%s4396_s3 + $0x20] sm:$0xff] }
 0x56c   : > { %v947_v49 = vsel %vm412_vm0, %v924_v48, 0.0  ;;  %v2917_v48 = vld [vmem:[%s4396_s3 + $0x28] sm:$0xff] }
 0x56d   : > { %v948_v52 = vadd.f32 %v947_v49, %v946_v50 }
 0x56f   : > { %v950_v55 = vadd.f32 %v949_v53, %v948_v52 }
 0x573   : > { %v928_v54 = vpop.xlane.xlu0 %927 }
 0x574   : > { %v951_v56 = vsel %vm412_vm0, %v928_v54, 0.0 }
 0x575   : > { %v952_v57 = vadd.f32 %v951_v56, %v950_v55 }
 0x577   : > { %953 = vadd.xlane.f32.xlu1 %v952_v57 }
 0x583   : > { %997 = vperm.xlu2 %3148, %v991_v58  }
 0x58b   : > { %1109 = vperm.xlu2 %3148, %v2888_v59  }
 0x590   : > { %1099 = vperm.xlu1 %3147, %v2886_v60  }
 0x5de   : > { %v937_v62 = vpop.xlane.xlu2 %936 }
 0x5df   : > { %v938_v63 = vrot.slane %v937_v62, 4 }
 0x5e1   : > { %v939_v0 = vadd.f32 %v938_v63, %v937_v62 }
 0x5e3   : > { %v940_v1 = vrot.slane %v939_v0, 2 }
 0x5e5   : > { %v941_v2 = vadd.f32 %v940_v1, %v939_v0 }
 0x5e6   : > { %v998_v42 = vpop.permute.xlu2 %997 }
 0x5e7   : > { %v942_v5 = vrot.slane %v941_v2, 1 }
 0x5e9   : > { %v943_v6 = vadd.f32 %v942_v5, %v941_v2 }
 0x5ea   : > { %v954_v9 = vpop.xlane.xlu1 %953 }
 0x5eb   : > { %v955_v10 = vrot.slane %v954_v9, 4  ;;  %3059 = vpush %v943_v6 }
 0x5ed   : > { %v956_v11 = vadd.f32 %v955_v10, %v954_v9 }
 0x5ee   : > { %v1110_v62 = vpop.permute.xlu2 %1109 }
 0x5ef   : > { %v957_v12 = vrot.slane %v956_v11, 2 }
 0x5f1   : > { %v958_v13 = vadd.f32 %v957_v12, %v956_v11 }
 0x5f3   : > { %v959_v14 = vrot.slane %v958_v13, 1 }
 0x5f5   : > { %v960_v16 = vadd.f32 %v959_v14, %v958_v13 }
 0x5f7   : > { %3061 = vpush %v960_v16  ;;  %v2898_v16 = vld [vmem:[%s4397_s4 + $0x140] sm:$0xff] }
 0x602   : > { %v1100_v49 = vpop.permute.xlu1 %1099 }
 0x61c   : > { %s3060_s17 = spop %3059 }
 0x61d   : > { %v945_v18 = vstv %s3060_s17 }
 0x61e   : > { %v963_v19 = vmul.f32 %v945_v18, %v3496_v22  ;;  %v2903_v18 = vld [vmem:[%s4397_s4 + $0x168] sm:$0xff] }
 0x620   : > { %v965_v21 = vmul.f32 %v963_v19, %v963_v19  ;;  %v982_v31 = vsub.f32 %v3601_v32, %v963_v19  ;;  %v981_v35 = vsub.f32 %v3593_v7, %v963_v19  ;;  %v980_v37 = vsub.f32 %v3598_v23, %v963_v19  ;;  %v988_v7 = vld [vmem:[%s4398_s5 + $0x8] sm:$0xff]  ;;  %v1003_v32 = vpop.permute.xlu0 %1002 }
 0x621   : > { %v979_v39 = vsub.f32 %v3583_v61, %v963_v19 }
 0x628   : > { %s3062_s18 = spop %3061  ;;  %v1105_v55 = vpop.permute.xlu0 %1104 }
 0x629   : > { %v962_v20 = vstv %s3062_s18 }
 0x62a   : > { %v964_v8 = vmul.f32 %v962_v20, %v3496_v22 }
 0x62c   : > { %v966_v25 = vsub.f32 %v964_v8, %v965_v21 }
 0x62e   : > { %v967_v17 = vmax.f32 %v966_v25, 0.0 }
 0x630   : > { %v968_v24 = vadd.f32 1e-08, %v967_v17  ;;  %v1115_v9 = vpop.permute.xlu0 %1114 }
 0x632   : > { %3157 = vrsqrt.f32 %v968_v24  ;;  %vm975_vm6 = vweird.f32 %v968_v24 }
 0x638   : > { %v3158_v26 = vpop.eup %3157 }
 0x639   : > { %v970_v27 = vmul.f32 %v3158_v26, %v968_v24  ;;  %vm976_vm4 = vweird.f32 %v3158_v26 }
 0x63a   : > { %vm977_vm7 = vmor %vm975_vm6, %vm976_vm4 }
 0x63b   : > { %v971_v28 = vmul.f32 %v3158_v26, %v970_v27 }
 0x63d   : > { %v972_v29 = vmul.f32 0.5, %v971_v28 }
 0x63f   : > { %v973_v15 = vsub.f32 1.5, %v972_v29 }
 0x641   : > { %v974_v30 = vmul.f32 %v3158_v26, %v973_v15 }
 0x643   : > { %v978_v33 = vsel %vm977_vm7, %v3158_v26, %v974_v30 }
 0x644   : > { %v986_v34 = vmul.f32 %v982_v31, %v978_v33  ;;  %v985_v36 = vmul.f32 %v981_v35, %v978_v33  ;;  %v984_v38 = vmul.f32 %v980_v37, %v978_v33  ;;  %v983_v40 = vmul.f32 %v979_v39, %v978_v33 }
 0x646   : > { %1040 = vmatpush.msrb.mxu2 %v986_v34 }
 0x648   : > { %1041 = vmatpush.msrb.mxu2 %v985_v36 }
 0x64a   : > { %1042 = vmatpush.msrb.mxu2 %v984_v38 }
 0x64c   : > { %1043 = vmatpush.msrb.mxu2 %v983_v40 }
 0x64d   : > { %2882 = vmatmul.msk.f32.vlgmr.msrb.gmra.mxu2 %vm1015_vm8, %v987_v41  ;;  %v2899_v41 = vld [vmem:[%s4397_s4 + $0x148] sm:$0xff] }
 0x655   : > { %2883 = vmatmul.msk.f32.gmra.mxu2 %vm1015_vm8, %v988_v7  ;;  %v2902_v7 = vld [vmem:[%s4397_s4 + $0x160] sm:$0xff] }
 0x6d0   : > { %v1045_v23 = vpop.f32.mrf.mxu2 }
 0x6d1   : > { %v1046_v43 = vadd.f32 %v1045_v23, %v998_v42  ;;  %v2900_v23 = vld [vmem:[%s4397_s4 + $0x150] sm:$0xff] }
 0x6d3   : > { %v3653_v46 = vadd.f32 %v1046_v43, %v3428_v4  ;;  %v2919_v4 = vld [vmem:[%s4396_s3 + $0x38] sm:$0xff] }
 0x6d8   : > { %v1048_v61 = vpop.f32.mrf.mxu2 }
 0x6d9   : > { %v1049_v44 = vadd.f32 %v1048_v61, %v1003_v32  ;;  %v2904_v32 = vld [vmem:[%s4397_s4 + $0x170] sm:$0xff] }
 0x6db   : > { %v3649_v45 = vadd.f32 %v1049_v44, %v3426_v3  ;;  %v2918_v3 = vld [vmem:[%s4396_s3 + $0x30] sm:$0xff] }
 0x6dd   : > { %1143 = vmatpush.msrb.mxu3 %v3649_v45 }
 0x6df   : > { %1144 = vmatpush.msrb.mxu3 %v3653_v46 }
 0x6e0   : > { %2920 = vmatmul.msk.f32.vlgmr.msrb.gmra.mxu3 %vm480_vm5, %v2916_v47 }
 0x6e8   : > { %2921 = vmatmul.msk.f32.gmra.mxu3 %vm480_vm5, %v2917_v48 }
 0x6f0   : > { %2922 = vmatmul.msk.f32.gmra.mxu3 %vm480_vm5, %v2918_v3 }
 0x6f8   : > { %2923 = vmatmul.msk.f32.gmra.mxu3 %vm480_vm5, %v2919_v4 }
 0x763   : > { %v1146_v50 = vpop.f32.mrf.mxu3 }
 0x764   : > { %v1147_v52 = vadd.f32 %v1146_v50, %v1100_v49 }
 0x766   : > { %v1163_v53 = vmul.f32 %v1162_v51, %v1147_v52  ;;  %vm1158_vm9 = vcmp.ge.f32.partialorder %v1147_v52, 0.0 }
 0x768   : > { %v3672_v54 = vsel %vm1158_vm9, %v1147_v52, %v1163_v53 }
 0x769   : > { %1175 = vadd.xlane.f32.xlu1 %v3672_v54  ;;  %v1171_v59 = vmul.f32 %v3672_v54, %v3672_v54 }
 0x76b   : > { %v1149_v56 = vpop.f32.mrf.mxu3 }
 0x76c   : > { %v1150_v57 = vadd.f32 %v1149_v56, %v1105_v55 }
 0x76e   : > { %v1164_v58 = vmul.f32 %v1162_v51, %v1150_v57  ;;  %vm1159_vm10 = vcmp.ge.f32.partialorder %v1150_v57, 0.0 }
 0x770   : > { %v3677_v60 = vsel %vm1159_vm10, %v1150_v57, %v1164_v58 }
 0x771   : > { %1177 = vadd.xlane.f32.xlu2 %v3677_v60  ;;  %1183 = vadd.xlane.f32.xlu1 %v1171_v59  ;;  %v1172_v2 = vmul.f32 %v3677_v60, %v3677_v60 }
 0x773   : > { %v1152_v63 = vpop.f32.mrf.mxu3 }
 0x774   : > { %v1153_v0 = vadd.f32 %v1152_v63, %v1110_v62 }
 0x776   : > { %v1165_v1 = vmul.f32 %v1162_v51, %v1153_v0  ;;  %vm1160_vm11 = vcmp.ge.f32.partialorder %v1153_v0, 0.0 }
 0x778   : > { %v3682_v5 = vsel %vm1160_vm11, %v1153_v0, %v1165_v1 }
 0x779   : > { %1179 = vadd.xlane.f32.xlu0 %v3682_v5  ;;  %1185 = vadd.xlane.f32.xlu2 %v1172_v2  ;;  %v1173_v6 = vmul.f32 %v3682_v5, %v3682_v5 }
 0x77b   : > { %v1155_v10 = vpop.f32.mrf.mxu3  ;;  %1187 = vadd.xlane.f32.xlu1 %v1173_v6 }
 0x77c   : > { %v1156_v11 = vadd.f32 %v1155_v10, %v1115_v9 }
 0x77e   : > { %v1166_v12 = vmul.f32 %v1162_v51, %v1156_v11  ;;  %vm1161_vm12 = vcmp.ge.f32.partialorder %v1156_v11, 0.0 }
 0x780   : > { %v3687_v13 = vsel %vm1161_vm12, %v1156_v11, %v1166_v12  ;;  %v2892_v12 = vld [vmem:[%s4397_s4 + $0x110] sm:$0xff] }
 0x781   : > { %1181 = vadd.xlane.f32.xlu0 %v3687_v13  ;;  %v1174_v14 = vmul.f32 %v3687_v13, %v3687_v13 }
 0x783   : > { %1189 = vadd.xlane.f32.xlu2 %v1174_v14 }
 0x79b   : > { %1341 = vperm.xlu2 %3148, %v2898_v16   ;;  %v2891_v16 = vld [vmem:[%s4397_s4 + $0x108] sm:$0xff] }
 0x7a3   : > { %1370 = vperm.xlu2 %3148, %v2903_v18   ;;  %v2890_v18 = vld [vmem:[%s4397_s4 + $0x100] sm:$0xff] }
 0x7dc   : > { %v1176_v19 = vpop.xlane.xlu1 %1175 }
 0x7dd   : > { %v1191_v27 = vsel %vm412_vm0, %v1176_v19, 0.0 }
 0x7e4   : > { %v1178_v20 = vpop.xlane.xlu2 %1177  ;;  %v1184_v8 = vpop.xlane.xlu1 %1183 }
 0x7e5   : > { %v1192_v17 = vsel %vm412_vm0, %v1178_v20, 0.0  ;;  %v1208_v28 = vsel %vm412_vm0, %v1184_v8, 0.0 }
 0x7e6   : > { %v1193_v15 = vadd.f32 %v1192_v17, %v1191_v27  ;;  %v2896_v17 = vld [vmem:[%s4397_s4 + $0x130] sm:$0xff]  ;;  %v2895_v27 = vld [vmem:[%s4397_s4 + $0x128] sm:$0xff] }
 0x7ec   : > { %v1180_v21 = vpop.xlane.xlu0 %1179  ;;  %v1186_v25 = vpop.xlane.xlu2 %1185 }
 0x7ed   : > { %v1209_v24 = vsel %vm412_vm0, %v1186_v25, 0.0  ;;  %v1194_v29 = vsel %vm412_vm0, %v1180_v21, 0.0 }
 0x7ee   : > { %v1188_v26 = vpop.xlane.xlu1 %1187  ;;  %v1210_v30 = vadd.f32 %v1209_v24, %v1208_v28  ;;  %v1195_v33 = vadd.f32 %v1194_v29, %v1193_v15  ;;  %v2893_v24 = vld [vmem:[%s4397_s4 + $0x118] sm:$0xff] }
 0x7ef   : > { %v1211_v31 = vsel %vm412_vm0, %v1188_v26, 0.0 }
 0x7f0   : > { %v1212_v36 = vadd.f32 %v1211_v31, %v1210_v30 }
 0x7f4   : > { %v1182_v34 = vpop.xlane.xlu0 %1181 }
 0x7f5   : > { %v1196_v35 = vsel %vm412_vm0, %v1182_v34, 0.0  ;;  %v2897_v34 = vld [vmem:[%s4397_s4 + $0x138] sm:$0xff] }
 0x7f6   : > { %v1190_v37 = vpop.xlane.xlu2 %1189  ;;  %v1197_v38 = vadd.f32 %v1196_v35, %v1195_v33  ;;  %v2894_v33 = vld [vmem:[%s4397_s4 + $0x120] sm:$0xff]  ;;  %v2905_v35 = vld [vmem:[%s4397_s4 + $0x178] sm:$0xff] }
 0x7f7   : > { %v1213_v39 = vsel %vm412_vm0, %v1190_v37, 0.0 }
 0x7f8   : > { %1198 = vadd.xlane.f32.xlu0 %v1197_v38  ;;  %v1214_v40 = vadd.f32 %v1213_v39, %v1212_v36  ;;  %v2909_v38 = vld [vmem:[%s4397_s4 + $0x198] sm:$0xff]  ;;  %v2907_v39 = vld [vmem:[%s4397_s4 + $0x188] sm:$0xff] }
 0x7fa   : > { %1215 = vadd.xlane.f32.xlu1 %v1214_v40  ;;  %v2906_v40 = vld [vmem:[%s4397_s4 + $0x180] sm:$0xff] }
 0x80c   : > { %1346 = vperm.xlu0 %3146, %v2899_v41   ;;  %v2901_v41 = vld [vmem:[%s4397_s4 + $0x158] sm:$0xff] }
 0x813   : > { %1365 = vperm.xlu1 %3147, %v2902_v7   ;;  %v2908_v7 = vld [vmem:[%s4397_s4 + $0x190] sm:$0xff] }
 0x814   : > { %1351 = vperm.xlu0 %3146, %v2900_v23   ;;  %v2910_v23 = vld [vmem:[%s4397_s4 + $0x1a0] sm:$0xff] }
 0x81b   : > { %1375 = vperm.xlu1 %3147, %v2904_v32   ;;  %v1342_v32 = vpop.permute.xlu2 %1341 }
 0x86b   : > { %v1199_v42 = vpop.xlane.xlu0 %1198 }
 0x86c   : > { %v1200_v61 = vrot.slane %v1199_v42, 4 }
 0x86d   : > { %v1216_v43 = vpop.xlane.xlu1 %1215 }
 0x86e   : > { %v1201_v44 = vadd.f32 %v1200_v61, %v1199_v42  ;;  %v1217_v47 = vrot.slane %v1216_v43, 4 }
 0x870   : > { %v1218_v48 = vadd.f32 %v1217_v47, %v1216_v43  ;;  %v1202_v3 = vrot.slane %v1201_v44, 2  ;;  %v3767_v43 = vpop.permute.xlu2 %1370 }
 0x872   : > { %v1203_v4 = vadd.f32 %v1202_v3, %v1201_v44  ;;  %v1219_v49 = vrot.slane %v1218_v48, 2 }
 0x874   : > { %v1204_v50 = vrot.slane %v1203_v4, 1  ;;  %v1220_v51 = vadd.f32 %v1219_v49, %v1218_v48 }
 0x876   : > { %v1205_v52 = vadd.f32 %v1204_v50, %v1203_v4  ;;  %v1221_v53 = vrot.slane %v1220_v51, 1 }
 0x878   : > { %3063 = vpush %v1205_v52  ;;  %v1222_v55 = vadd.f32 %v1221_v53, %v1220_v51 }
 0x87a   : > { %3065 = vpush %v1222_v55 }
 0x87e   : > { %v3765_v42 = vpop.permute.xlu0 %1346 }
 0x885   : > { %v1366_v61 = vpop.permute.xlu1 %1365 }
 0x886   : > { %v3769_v44 = vpop.permute.xlu0 %1351 }
 0x88d   : > { %v1376_v47 = vpop.permute.xlu1 %1375 }
 0x8a9   : > { %s3064_s17 = spop %3063 }
 0x8aa   : > { %v1207_v56 = vstv %s3064_s17 }
 0x8ab   : > { %v1225_v57 = vmul.f32 %v1207_v56, %v3496_v22  ;;  %s3066_s18 = spop %3065 }
 0x8ac   : > { %v1224_v58 = vstv %s3066_s18  ;;  %s3015_s18 = sld [smem:[#allocation3 + $0x181]] }
 0x8ad   : > { %v1226_v59 = vmul.f32 %v1224_v58, %v3496_v22  ;;  %v1227_v62 = vmul.f32 %v1225_v57, %v1225_v57 }
 0x8af   : > { %v1228_v63 = vsub.f32 %v1226_v59, %v1227_v62  ;;  %v2913_v59 = vld [vmem:[%s4397_s4 + $0x1b8] sm:$0xff] }
 0x8b1   : > { %v1229_v0 = vmax.f32 %v1228_v63, 0.0 }
 0x8b3   : > { %v1230_v1 = vadd.f32 1e-08, %v1229_v0  ;;  %v2911_v0 = vld [vmem:[%s4397_s4 + $0x1a8] sm:$0xff] }
 0x8b5   : > { %3159 = vrsqrt.f32 %v1230_v1  ;;  %vm1237_vm15 = vweird.f32 %v1230_v1 }
 0x8bb   : > { %v3160_v2 = vpop.eup %3159 }
 0x8bc   : > { %v1232_v6 = vmul.f32 %v3160_v2, %v1230_v1  ;;  %vm1238_vm13 = vweird.f32 %v3160_v2 }
 0x8bd   : > { %vm1239_vm1 = vmor %vm1237_vm15, %vm1238_vm13 }
 0x8be   : > { %v1233_v9 = vmul.f32 %v3160_v2, %v1232_v6 }
 0x8c0   : > { %v1234_v10 = vmul.f32 0.5, %v1233_v9 }
 0x8c2   : > { %v1235_v11 = vsub.f32 1.5, %v1234_v10 }
 0x8c4   : > { %v1236_v14 = vmul.f32 %v3160_v2, %v1235_v11 }
 0x8c6   : > { %v1240_v19 = vsel %vm1239_vm1, %v3160_v2, %v1236_v14 }
 0x8c7   : > { %v1243_v20 = vmul.f32 %v2892_v12, %v1240_v19  ;;  %v1242_v8 = vmul.f32 %v2891_v16, %v1240_v19  ;;  %v1241_v21 = vmul.f32 %v2890_v18, %v1240_v19  ;;  %v1244_v29 = vmul.f32 %v2893_v24, %v1240_v19 }
 0x8c9   : > { %1257 = vperm.xlu1 %3147, %v1243_v20   ;;  %1252 = vperm.xlu0 %3146, %v1242_v8   ;;  %v1271_v25 = vmul.f32 %v1243_v20, %v1225_v57  ;;  %v1270_v26 = vmul.f32 %v1242_v8, %v1225_v57  ;;  %v1269_v30 = vmul.f32 %v1241_v21, %v1225_v57 }
 0x8ca   : > { %1247 = vperm.xlu2 %3148, %v1241_v21   ;;  %v1272_v31 = vmul.f32 %v1244_v29, %v1225_v57 }
 0x8cb   : > { %v1275_v28 = vsub.f32 %v2896_v17, %v1271_v25  ;;  %v1274_v15 = vsub.f32 %v2895_v27, %v1270_v26  ;;  %v1273_v36 = vsub.f32 %v2894_v33, %v1269_v30  ;;  %v1447_v27 = vstv %s2915_s23 }
 0x8cc   : > { %v1276_v37 = vsub.f32 %v2897_v34, %v1272_v31 }
 0x8d1   : > { %1289 = vperm.xlu1 %3147, %v1275_v28   ;;  %1262 = vperm.xlu0 %3146, %v1244_v29  }
 0x8d2   : > { %1284 = vperm.xlu2 %3148, %v1274_v15  }
 0x8d9   : > { %1380 = vperm.xlu1 %3147, %v2905_v35   ;;  %1279 = vperm.xlu0 %3146, %v1273_v36  }
 0x8da   : > { %1294 = vperm.xlu2 %3148, %v1276_v37  }
 0x8e1   : > { %1408 = vperm.xlu1 %3147, %v2909_v38   ;;  %1398 = vperm.xlu0 %3146, %v2907_v39  }
 0x8e2   : > { %1393 = vperm.xlu2 %3148, %v2906_v40  }
 0x8e9   : > { %1356 = vperm.xlu0 %3146, %v2901_v41  }
 0x8ea   : > { %1403 = vperm.xlu2 %3148, %v2908_v7  }
 0x8f2   : > { %1421 = vperm.xlu2 %3148, %v2910_v23  }
 0x924   : > { %v1248_v48 = vpop.permute.xlu2 %1247 }
 0x92c   : > { %v1285_v50 = vpop.permute.xlu2 %1284 }
 0x934   : > { %v1295_v63 = vpop.permute.xlu2 %1294 }
 0x93b   : > { %v1253_v3 = vpop.permute.xlu0 %1252  ;;  %v1258_v4 = vpop.permute.xlu1 %1257 }
 0x93c   : > { %v1266_v49 = vmul.f32 %v1253_v3, %v3677_v60  ;;  %v1267_v55 = vmul.f32 %v1258_v4, %v3682_v5  ;;  %v1265_v60 = vmul.f32 %v1248_v48, %v3672_v54  ;;  %v2912_v54 = vld [vmem:[%s4397_s4 + $0x1b0] sm:$0xff] }
 0x93e   : > { %v3772_v51 = vadd.f32 %v1285_v50, %v1266_v49 }
 0x940   : > { %1324 = vrot.lane.b32.xlu2 %v3772_v51, %s4407_s14  ;;  %1307 = vrot.lane.b32.xlu1 %v3772_v51, %s4409_s26 }
 0x943   : > { %v1263_v52 = vpop.permute.xlu0 %1262  ;;  %v1290_v53 = vpop.permute.xlu1 %1289 }
 0x944   : > { %v1299_v56 = vadd.f32 %v1290_v53, %v1267_v55  ;;  %v1268_v62 = vmul.f32 %v1263_v52, %v3687_v13  ;;  %v1394_v13 = vpop.permute.xlu2 %1393 }
 0x946   : > { %v1300_v5 = vadd.f32 %v1295_v63, %v1268_v62  ;;  %v1385_v33 = vmul.f32 %v1376_v47, %v1299_v56 }
 0x948   : > { %1326 = vrot.lane.b32.xlu2 %v1299_v56, %s4407_s14 }
 0x94b   : > { %v1280_v57 = vpop.permute.xlu0 %1279  ;;  %v1381_v1 = vpop.permute.xlu1 %1380 }
 0x94c   : > { %v1297_v58 = vadd.f32 %v1280_v57, %v1265_v60  ;;  %v1404_v2 = vpop.permute.xlu2 %1403 }
 0x94e   : > { %1322 = vrot.lane.b32.xlu1 %v1297_v58, %s4407_s14  ;;  %1305 = vrot.lane.b32.xlu0 %v1297_v58, %s4409_s26  ;;  %v1383_v8 = vmul.f32 %v1366_v61, %v1297_v58 }
 0x950   : > { %1436 = vperm.xlu2 %3148, %v2913_v59  }
 0x953   : > { %v1399_v6 = vpop.permute.xlu0 %1398  ;;  %v1409_v9 = vpop.permute.xlu1 %1408 }
 0x954   : > { %v1422_v10 = vpop.permute.xlu2 %1421 }
 0x956   : > { %1311 = vrot.lane.b32.xlu1 %v1300_v5, %s4409_s26  ;;  %1309 = vrot.lane.b32.xlu0 %v1299_v56, %s4409_s26  ;;  %s4415_s26 = smov 127  }
 0x95b   : > { %v1357_v11 = vpop.permute.xlu0 %1356 }
 0x95e   : > { %1431 = vperm.xlu1 %3147, %v2912_v54   ;;  %1328 = vrot.lane.b32.xlu0 %v1300_v5, %s4407_s14 }
 0x966   : > { %1426 = vperm.xlu0 %3146, %v2911_v0  }
 0x99a   : > { %v1325_v14 = vpop.permute.xlu2 %1324 }
 0x99b   : > { %v1336_v4 = vsel %vm1334_vm2, %v1325_v14, 0.0 }
 0x99c   : > { %v1412_v56 = vmul.f32 %v1399_v6, %v1336_v4  ;;  %v2938_v6 = vld [vmem:[%s4397_s4 + $0x1d0] sm:$0xff] }
 0x9a2   : > { %v1327_v24 = vpop.permute.xlu2 %1326 }
 0x9a3   : > { %v1337_v30 = vsel %vm1334_vm2, %v1327_v24, 0.0 }
 0x9a4   : > { %v1413_v37 = vmul.f32 %v1404_v2, %v1337_v30  ;;  %v2929_v2 = vld [vmem:[%s4399_s6 + $0x28] sm:$0xff] }
 0x9aa   : > { %v1437_v60 = vpop.permute.xlu2 %1436 }
 0x9b2   : > { %v1308_v12 = vpop.permute.xlu1 %1307 }
 0x9b3   : > { %v1319_v38 = vsel %vm1317_vm3, 0.0, %v1308_v12 }
 0x9b4   : > { %v1360_v23 = vmul.f32 %v3765_v42, %v1319_v38 }
 0x9c0   : > { %v1306_v16 = vpop.permute.xlu0 %1305  ;;  %v1323_v18 = vpop.permute.xlu1 %1322 }
 0x9c1   : > { %v1318_v19 = vsel %vm1317_vm3, 0.0, %v1306_v16  ;;  %v1335_v20 = vsel %vm1334_vm2, %v1323_v18, 0.0 }
 0x9c2   : > { %v1359_v21 = vmul.f32 %v1342_v32, %v1318_v19  ;;  %v1411_v17 = vmul.f32 %v1394_v13, %v1335_v20  ;;  %v1386_v32 = vmul.f32 %v1381_v1, %v1300_v5 }
 0x9c4   : > { %v1387_v25 = vadd.f32 %v1383_v8, %v1359_v21 }
 0x9c6   : > { %v1415_v26 = vadd.f32 %v1411_v17, %v1387_v25 }
 0x9c8   : > { %v1439_v28 = vadd.f32 %v1422_v10, %v1415_v26  ;;  %v1310_v29 = vpop.permute.xlu0 %1309  ;;  %v1312_v15 = vpop.permute.xlu1 %1311 }
 0x9c9   : > { %v1320_v31 = vsel %vm1317_vm3, 0.0, %v1310_v29  ;;  %v1321_v36 = vsel %vm1317_vm3, 0.0, %v1312_v15 }
 0x9ca   : > { %v1361_v34 = vmul.f32 %v3769_v44, %v1320_v31  ;;  %vm1443_vm4 = vcmp.ge.f32.partialorder %v1439_v28, 0.0  ;;  %v1448_v35 = vmul.f32 %v1447_v27, %v1439_v28  ;;  %v1362_v41 = vmul.f32 %v1357_v11, %v1321_v36  ;;  %v2936_v36 = vld [vmem:[%s4397_s4 + $0x1c0] sm:$0xff] }
 0x9cb   : > { %v1384_v44 = vmul.f32 %v3767_v43, %v3772_v51 }
 0x9cc   : > { %v3803_v39 = vsel %vm1443_vm4, %v1439_v28, %v1448_v35  ;;  %v1389_v40 = vadd.f32 %v1385_v33, %v1361_v34  ;;  %v1390_v49 = vadd.f32 %v1386_v32, %v1362_v41  ;;  %v2928_v34 = vld [vmem:[%s4399_s6 + $0x20] sm:$0xff]  ;;  %v2937_v35 = vld [vmem:[%s4397_s4 + $0x1c8] sm:$0xff] }
 0x9cd   : > { %1460 = vadd.xlane.f32.xlu0 %v3803_v39  ;;  %v1388_v52 = vadd.f32 %v1384_v44, %v1360_v23  ;;  %v1456_v55 = vmul.f32 %v3803_v39, %v3803_v39 }
 0x9ce   : > { %v1417_v7 = vadd.f32 %v1413_v37, %v1389_v40  ;;  %v2939_v37 = vld [vmem:[%s4397_s4 + $0x1d8] sm:$0xff] }
 0x9cf   : > { %v1416_v51 = vadd.f32 %v1412_v56, %v1388_v52 }
 0x9d0   : > { %v1329_v61 = vpop.permute.xlu0 %1328  ;;  %v1432_v47 = vpop.permute.xlu1 %1431 }
 0x9d1   : > { %v1338_v48 = vsel %vm1334_vm2, %v1329_v61, 0.0  ;;  %v1441_v3 = vadd.f32 %v1432_v47, %v1417_v7 }
 0x9d2   : > { %v1414_v50 = vmul.f32 %v1409_v9, %v1338_v48 }
 0x9d3   : > { %v1450_v53 = vmul.f32 %v1447_v27, %v1441_v3  ;;  %vm1445_vm6 = vcmp.ge.f32.partialorder %v1441_v3, 0.0 }
 0x9d4   : > { %v1418_v42 = vadd.f32 %v1414_v50, %v1390_v49 }
 0x9d5   : > { %1468 = vadd.xlane.f32.xlu0 %v1456_v55  ;;  %v3813_v57 = vsel %vm1445_vm6, %v1441_v3, %v1450_v53 }
 0x9d6   : > { %1464 = vadd.xlane.f32.xlu2 %v3813_v57  ;;  %v1442_v43 = vadd.f32 %v1437_v60, %v1418_v42  ;;  %v1458_v5 = vmul.f32 %v3813_v57, %v3813_v57 }
 0x9d8   : > { %v1427_v58 = vpop.permute.xlu0 %1426  ;;  %v1451_v62 = vmul.f32 %v1447_v27, %v1442_v43  ;;  %vm1446_vm7 = vcmp.ge.f32.partialorder %v1442_v43, 0.0 }
 0x9d9   : > { %v1440_v59 = vadd.f32 %v1427_v58, %v1416_v51 }
 0x9da   : > { %v3820_v0 = vsel %vm1446_vm7, %v1442_v43, %v1451_v62 }
 0x9db   : > { %v1449_v63 = vmul.f32 %v1447_v27, %v1440_v59  ;;  %vm1444_vm9 = vcmp.ge.f32.partialorder %v1440_v59, 0.0  ;;  %v1459_v1 = vmul.f32 %v3820_v0, %v3820_v0 }
 0x9dd   : > { %1472 = vadd.xlane.f32.xlu0 %v1458_v5  ;;  %v3818_v54 = vsel %vm1444_vm9, %v1440_v59, %v1449_v63 }
 0x9de   : > { %1462 = vadd.xlane.f32.xlu1 %v3818_v54  ;;  %1466 = vadd.xlane.f32.xlu2 %v3820_v0  ;;  %v1457_v13 = vmul.f32 %v3818_v54, %v3818_v54 }
 0x9e6   : > { %1470 = vadd.xlane.f32.xlu1 %v1457_v13 }
 0x9ee   : > { %1474 = vadd.xlane.f32.xlu1 %v1459_v1 }
 0xa07   : > { %1551 = vperm.xlu1 %3147, %v2929_v2  }
 0xa0f   : > { %1657 = vperm.xlu1 %3147, %v2938_v6  }
 0xa40   : > { %v1461_v9 = vpop.xlane.xlu0 %1460 }
 0xa41   : > { %v1476_v12 = vsel %vm412_vm0, %v1461_v9, 0.0 }
 0xa48   : > { %v1469_v16 = vpop.xlane.xlu0 %1468 }
 0xa49   : > { %v1465_v10 = vpop.xlane.xlu2 %1464  ;;  %v1493_v26 = vsel %vm412_vm0, %v1469_v16, 0.0 }
 0xa4a   : > { %v1479_v20 = vsel %vm412_vm0, %v1465_v10, 0.0 }
 0xa50   : > { %v1473_v27 = vpop.xlane.xlu0 %1472 }
 0xa51   : > { %v1463_v11 = vpop.xlane.xlu1 %1462  ;;  %v1467_v18 = vpop.xlane.xlu2 %1466  ;;  %v1496_v29 = vsel %vm412_vm0, %v1473_v27, 0.0 }
 0xa52   : > { %v1477_v14 = vsel %vm412_vm0, %v1463_v11, 0.0  ;;  %v1481_v21 = vsel %vm412_vm0, %v1467_v18, 0.0  ;;  %v2924_v18 = vld [vmem:[%s4398_s5 + $0x20] sm:$0xff] }
 0xa53   : > { %v1478_v19 = vadd.f32 %v1477_v14, %v1476_v12 }
 0xa55   : > { %v1480_v8 = vadd.f32 %v1479_v20, %v1478_v19 }
 0xa57   : > { %v1482_v25 = vadd.f32 %v1481_v21, %v1480_v8 }
 0xa59   : > { %1483 = vadd.xlane.f32.xlu2 %v1482_v25  ;;  %v1471_v17 = vpop.xlane.xlu1 %1470 }
 0xa5a   : > { %v1494_v24 = vsel %vm412_vm0, %v1471_v17, 0.0  ;;  %v2966_v17 = vld [vmem:[%s4396_s3 + $0x40] sm:$0xff] }
 0xa5b   : > { %v1495_v28 = vadd.f32 %v1494_v24, %v1493_v26  ;;  %v2967_v24 = vld [vmem:[%s4396_s3 + $0x48] sm:$0xff] }
 0xa5d   : > { %v1497_v30 = vadd.f32 %v1496_v29, %v1495_v28  ;;  %v1710_v28 = vstv %s2964_s12 }
 0xa61   : > { %v1475_v15 = vpop.xlane.xlu1 %1474 }
 0xa62   : > { %v1498_v31 = vsel %vm412_vm0, %v1475_v15, 0.0 }
 0xa63   : > { %v1499_v33 = vadd.f32 %v1498_v31, %v1497_v30 }
 0xa65   : > { %1500 = vadd.xlane.f32.xlu0 %v1499_v33 }
 0xa71   : > { %1546 = vperm.xlu2 %3148, %v2928_v34  }
 0xa79   : > { %1652 = vperm.xlu2 %3148, %v2937_v35   ;;  %1647 = vperm.xlu0 %3146, %v2936_v36  }
 0xa81   : > { %1662 = vperm.xlu0 %3146, %v2939_v37  }
 0xacc   : > { %v1484_v38 = vpop.xlane.xlu2 %1483 }
 0xacd   : > { %v1485_v40 = vrot.slane %v1484_v38, 4 }
 0xacf   : > { %v1486_v41 = vadd.f32 %v1485_v40, %v1484_v38 }
 0xad1   : > { %v1487_v7 = vrot.slane %v1486_v41, 2 }
 0xad3   : > { %v1488_v23 = vadd.f32 %v1487_v7, %v1486_v41 }
 0xad4   : > { %v1547_v19 = vpop.permute.xlu2 %1546 }
 0xad5   : > { %v1489_v32 = vrot.slane %v1488_v23, 1 }
 0xad7   : > { %v1490_v61 = vadd.f32 %v1489_v32, %v1488_v23 }
 0xad8   : > { %v1501_v47 = vpop.xlane.xlu0 %1500 }
 0xad9   : > { %v1502_v44 = vrot.slane %v1501_v47, 4  ;;  %3067 = vpush %v1490_v61 }
 0xadb   : > { %v1503_v48 = vadd.f32 %v1502_v44, %v1501_v47 }
 0xadc   : > { %v1653_v31 = vpop.permute.xlu2 %1652 }
 0xadd   : > { %v1504_v3 = vrot.slane %v1503_v48, 2 }
 0xadf   : > { %v1505_v4 = vadd.f32 %v1504_v3, %v1503_v48 }
 0xae1   : > { %v1506_v49 = vrot.slane %v1505_v4, 1 }
 0xae3   : > { %v1507_v50 = vadd.f32 %v1506_v49, %v1505_v4 }
 0xae5   : > { %3069 = vpush %v1507_v50  ;;  %v2948_v50 = vld [vmem:[%s4397_s4 + $0x220] sm:$0xff] }
 0xaeb   : > { %v1648_v26 = vpop.permute.xlu0 %1647 }
 0xaf3   : > { %v1663_v47 = vpop.permute.xlu0 %1662 }
 0xb0a   : > { %s3068_s16 = spop %3067 }
 0xb0b   : > { %v1492_v52 = vstv %s3068_s16 }
 0xb0c   : > { %v1510_v53 = vmul.f32 %v1492_v52, %v3496_v22  ;;  %v2953_v52 = vld [vmem:[%s4397_s4 + $0x248] sm:$0xff] }
 0xb0e   : > { %v1512_v56 = vmul.f32 %v1510_v53, %v1510_v53  ;;  %v1529_v1 = vsub.f32 %v3820_v0, %v1510_v53  ;;  %v1528_v9 = vsub.f32 %v3813_v57, %v1510_v53  ;;  %v1527_v11 = vsub.f32 %v3818_v54, %v1510_v53  ;;  %v2925_v57 = vld [vmem:[%s4398_s5 + $0x28] sm:$0xff]  ;;  %v1552_v0 = vpop.permute.xlu1 %1551 }
 0xb0f   : > { %v1526_v14 = vsub.f32 %v3803_v39, %v1510_v53 }
 0xb16   : > { %s3070_s17 = spop %3069  ;;  %v1658_v38 = vpop.permute.xlu1 %1657 }
 0xb17   : > { %v1509_v55 = vstv %s3070_s17  ;;  %s2695_s17 = sld [smem:[#allocation2]] }
 0xb18   : > { %v1511_v42 = vmul.f32 %v1509_v55, %v3496_v22 }
 0xb1a   : > { %v1513_v60 = vsub.f32 %v1511_v42, %v1512_v56 }
 0xb1c   : > { %v1514_v43 = vmax.f32 %v1513_v60, 0.0 }
 0xb1e   : > { %v1515_v51 = vadd.f32 1e-08, %v1514_v43 }
 0xb20   : > { %3161 = vrsqrt.f32 %v1515_v51  ;;  %vm1522_vm11 = vweird.f32 %v1515_v51 }
 0xb26   : > { %v3162_v58 = vpop.eup %3161 }
 0xb27   : > { %v1517_v59 = vmul.f32 %v3162_v58, %v1515_v51  ;;  %vm1523_vm10 = vweird.f32 %v3162_v58 }
 0xb28   : > { %vm1524_vm12 = vmor %vm1522_vm11, %vm1523_vm10 }
 0xb29   : > { %v1518_v62 = vmul.f32 %v3162_v58, %v1517_v59 }
 0xb2b   : > { %v1519_v63 = vmul.f32 0.5, %v1518_v62 }
 0xb2d   : > { %v1520_v5 = vsub.f32 1.5, %v1519_v63 }
 0xb2f   : > { %v1521_v13 = vmul.f32 %v3162_v58, %v1520_v5 }
 0xb31   : > { %v1525_v2 = vsel %vm1524_vm12, %v3162_v58, %v1521_v13 }
 0xb32   : > { %v1533_v6 = vmul.f32 %v1529_v1, %v1525_v2  ;;  %v1532_v10 = vmul.f32 %v1528_v9, %v1525_v2  ;;  %v1531_v12 = vmul.f32 %v1527_v11, %v1525_v2  ;;  %v1530_v16 = vmul.f32 %v1526_v14, %v1525_v2 }
 0xb34   : > { %1588 = vmatpush.msrb.mxu0 %v1533_v6 }
 0xb36   : > { %1589 = vmatpush.msrb.mxu0 %v1532_v10 }
 0xb38   : > { %1590 = vmatpush.msrb.mxu0 %v1531_v12 }
 0xb3a   : > { %1591 = vmatpush.msrb.mxu0 %v1530_v16 }
 0xb3b   : > { %2932 = vmatmul.msk.f32.vlgmr.msrb.gmra.mxu0 %vm1015_vm8, %v2924_v18  ;;  %v2952_v18 = vld [vmem:[%s4397_s4 + $0x240] sm:$0xff] }
 0xb43   : > { %2933 = vmatmul.msk.f32.gmra.mxu0 %vm1015_vm8, %v2925_v57  ;;  %v2949_v57 = vld [vmem:[%s4397_s4 + $0x228] sm:$0xff] }
 0xbb8   : > { %v1593_v54 = vpop.f32.mrf.mxu0 }
 0xbb9   : > { %v1594_v39 = vadd.f32 %v1593_v54, %v1547_v19  ;;  %v2954_v54 = vld [vmem:[%s4397_s4 + $0x250] sm:$0xff] }
 0xbbb   : > { %v3873_v25 = vadd.f32 %v1594_v39, %v3653_v46  ;;  %v2969_v46 = vld [vmem:[%s4396_s3 + $0x58] sm:$0xff] }
 0xbc0   : > { %v1596_v20 = vpop.f32.mrf.mxu0 }
 0xbc1   : > { %v1597_v8 = vadd.f32 %v1596_v20, %v1552_v0  ;;  %v2950_v0 = vld [vmem:[%s4397_s4 + $0x230] sm:$0xff] }
 0xbc3   : > { %v3869_v21 = vadd.f32 %v1597_v8, %v3649_v45  ;;  %v2968_v45 = vld [vmem:[%s4396_s3 + $0x50] sm:$0xff] }
 0xbc5   : > { %1691 = vmatpush.msrb.mxu1 %v3869_v21 }
 0xbc7   : > { %1692 = vmatpush.msrb.mxu1 %v3873_v25 }
 0xbc8   : > { %2970 = vmatmul.msk.f32.vlgmr.msrb.gmra.mxu1 %vm480_vm5, %v2966_v17 }
 0xbd0   : > { %2971 = vmatmul.msk.f32.gmra.mxu1 %vm480_vm5, %v2967_v24 }
 0xbd8   : > { %2972 = vmatmul.msk.f32.gmra.mxu1 %vm480_vm5, %v2968_v45 }
 0xbe0   : > { %2973 = vmatmul.msk.f32.gmra.mxu1 %vm480_vm5, %v2969_v46 }
 0xc45   : > { %v1694_v27 = vpop.f32.mrf.mxu1 }
 0xc46   : > { %v1695_v29 = vadd.f32 %v1694_v27, %v1648_v26 }
 0xc48   : > { %v1711_v15 = vmul.f32 %v1710_v28, %v1695_v29  ;;  %vm1706_vm13 = vcmp.ge.f32.partialorder %v1695_v29, 0.0 }
 0xc4a   : > { %v3892_v30 = vsel %vm1706_vm13, %v1695_v29, %v1711_v15 }
 0xc4b   : > { %1723 = vadd.xlane.f32.xlu2 %v3892_v30  ;;  %v1719_v36 = vmul.f32 %v3892_v30, %v3892_v30 }
 0xc4d   : > { %v1697_v33 = vpop.f32.mrf.mxu1 }
 0xc4e   : > { %v1698_v34 = vadd.f32 %v1697_v33, %v1653_v31 }
 0xc50   : > { %v1712_v35 = vmul.f32 %v1710_v28, %v1698_v34  ;;  %vm1707_vm15 = vcmp.ge.f32.partialorder %v1698_v34, 0.0 }
 0xc52   : > { %v3897_v37 = vsel %vm1707_vm15, %v1698_v34, %v1712_v35 }
 0xc53   : > { %1725 = vadd.xlane.f32.xlu1 %v3897_v37  ;;  %1731 = vadd.xlane.f32.xlu2 %v1719_v36  ;;  %v1720_v23 = vmul.f32 %v3897_v37, %v3897_v37 }
 0xc55   : > { %v1700_v40 = vpop.f32.mrf.mxu1 }
 0xc56   : > { %v1701_v41 = vadd.f32 %v1700_v40, %v1658_v38 }
 0xc58   : > { %v1713_v7 = vmul.f32 %v1710_v28, %v1701_v41  ;;  %vm1708_vm1 = vcmp.ge.f32.partialorder %v1701_v41, 0.0 }
 0xc5a   : > { %v3902_v32 = vsel %vm1708_vm1, %v1701_v41, %v1713_v7 }
 0xc5b   : > { %1733 = vadd.xlane.f32.xlu1 %v1720_v23  ;;  %1727 = vadd.xlane.f32.xlu0 %v3902_v32  ;;  %v1721_v61 = vmul.f32 %v3902_v32, %v3902_v32 }
 0xc5d   : > { %v1703_v44 = vpop.f32.mrf.mxu1  ;;  %1735 = vadd.xlane.f32.xlu2 %v1721_v61 }
 0xc5e   : > { %v1704_v48 = vadd.f32 %v1703_v44, %v1663_v47 }
 0xc60   : > { %v1714_v3 = vmul.f32 %v1710_v28, %v1704_v48  ;;  %vm1709_vm4 = vcmp.ge.f32.partialorder %v1704_v48, 0.0 }
 0xc62   : > { %v3907_v4 = vsel %vm1709_vm4, %v1704_v48, %v1714_v3 }
 0xc63   : > { %1729 = vadd.xlane.f32.xlu0 %v3907_v4  ;;  %v1722_v49 = vmul.f32 %v3907_v4, %v3907_v4 }
 0xc65   : > { %1737 = vadd.xlane.f32.xlu1 %v1722_v49  ;;  %v2942_v49 = vld [vmem:[%s4397_s4 + $0x1f0] sm:$0xff] }
 0xc7e   : > { %1887 = vperm.xlu1 %3147, %v2948_v50   ;;  %v2941_v50 = vld [vmem:[%s4397_s4 + $0x1e8] sm:$0xff] }
 0xc86   : > { %1916 = vperm.xlu1 %3147, %v2953_v52   ;;  %v2940_v52 = vld [vmem:[%s4397_s4 + $0x1e0] sm:$0xff] }
 0xcbe   : > { %v1724_v53 = vpop.xlane.xlu2 %1723 }
 0xcbf   : > { %v1739_v59 = vsel %vm412_vm0, %v1724_v53, 0.0 }
 0xcc6   : > { %v1726_v55 = vpop.xlane.xlu1 %1725  ;;  %v1732_v42 = vpop.xlane.xlu2 %1731 }
 0xcc7   : > { %v1740_v43 = vsel %vm412_vm0, %v1726_v55, 0.0  ;;  %v1756_v62 = vsel %vm412_vm0, %v1732_v42, 0.0 }
 0xcc8   : > { %v1741_v5 = vadd.f32 %v1740_v43, %v1739_v59  ;;  %v2943_v43 = vld [vmem:[%s4397_s4 + $0x1f8] sm:$0xff]  ;;  %v2945_v59 = vld [vmem:[%s4397_s4 + $0x208] sm:$0xff] }
 0xcce   : > { %v1728_v56 = vpop.xlane.xlu0 %1727  ;;  %v1734_v60 = vpop.xlane.xlu1 %1733 }
 0xccf   : > { %v1757_v51 = vsel %vm412_vm0, %v1734_v60, 0.0  ;;  %v1742_v63 = vsel %vm412_vm0, %v1728_v56, 0.0 }
 0xcd0   : > { %v1736_v58 = vpop.xlane.xlu2 %1735  ;;  %v1758_v13 = vadd.f32 %v1757_v51, %v1756_v62  ;;  %v1743_v2 = vadd.f32 %v1742_v63, %v1741_v5 }
 0xcd1   : > { %v1759_v1 = vsel %vm412_vm0, %v1736_v58, 0.0  ;;  %v2944_v58 = vld [vmem:[%s4397_s4 + $0x200] sm:$0xff] }
 0xcd2   : > { %v1760_v10 = vadd.f32 %v1759_v1, %v1758_v13 }
 0xcd6   : > { %v1730_v6 = vpop.xlane.xlu0 %1729 }
 0xcd7   : > { %v1744_v9 = vsel %vm412_vm0, %v1730_v6, 0.0  ;;  %v2947_v6 = vld [vmem:[%s4397_s4 + $0x218] sm:$0xff] }
 0xcd8   : > { %v1738_v11 = vpop.xlane.xlu1 %1737  ;;  %v1745_v12 = vadd.f32 %v1744_v9, %v1743_v2  ;;  %v2946_v2 = vld [vmem:[%s4397_s4 + $0x210] sm:$0xff]  ;;  %v2957_v9 = vld [vmem:[%s4397_s4 + $0x268] sm:$0xff] }
 0xcd9   : > { %v1761_v14 = vsel %vm412_vm0, %v1738_v11, 0.0 }
 0xcda   : > { %1746 = vadd.xlane.f32.xlu0 %v1745_v12  ;;  %v1762_v16 = vadd.f32 %v1761_v14, %v1760_v10  ;;  %v2951_v12 = vld [vmem:[%s4397_s4 + $0x238] sm:$0xff] }
 0xcdb   : > { %v2955_v14 = vld [vmem:[%s4397_s4 + $0x258] sm:$0xff] }
 0xcdc   : > { %1763 = vadd.xlane.f32.xlu2 %v1762_v16  ;;  %v2956_v16 = vld [vmem:[%s4397_s4 + $0x260] sm:$0xff] }
 0xcee   : > { %1911 = vperm.xlu0 %3146, %v2952_v18   ;;  %v2959_v18 = vld [vmem:[%s4397_s4 + $0x278] sm:$0xff] }
 0xcf4   : > { %1892 = vperm.xlu2 %3148, %v2949_v57   ;;  %v2958_v57 = vld [vmem:[%s4397_s4 + $0x270] sm:$0xff] }
 0xcf6   : > { %1921 = vperm.xlu0 %3146, %v2954_v54   ;;  %v2960_v54 = vld [vmem:[%s4397_s4 + $0x280] sm:$0xff] }
 0xcfc   : > { %1897 = vperm.xlu2 %3148, %v2950_v0  }
 0xd4d   : > { %v1747_v19 = vpop.xlane.xlu0 %1746 }
 0xd4e   : > { %v1748_v20 = vrot.slane %v1747_v19, 4 }
 0xd4f   : > { %v1764_v39 = vpop.xlane.xlu2 %1763 }
 0xd50   : > { %v1749_v8 = vadd.f32 %v1748_v20, %v1747_v19  ;;  %v1765_v17 = vrot.slane %v1764_v39, 4  ;;  %v1888_v19 = vpop.permute.xlu1 %1887 }
 0xd52   : > { %v1750_v24 = vrot.slane %v1749_v8, 2  ;;  %v1766_v45 = vadd.f32 %v1765_v17, %v1764_v39 }
 0xd54   : > { %v1767_v46 = vrot.slane %v1766_v45, 2  ;;  %v1751_v26 = vadd.f32 %v1750_v24, %v1749_v8 }
 0xd56   : > { %v1752_v27 = vrot.slane %v1751_v26, 1  ;;  %v1768_v28 = vadd.f32 %v1767_v46, %v1766_v45 }
 0xd57   : > { %v1893_v20 = vpop.permute.xlu2 %1892 }
 0xd58   : > { %v1753_v29 = vadd.f32 %v1752_v27, %v1751_v26  ;;  %v1769_v15 = vrot.slane %v1768_v28, 1  ;;  %v1917_v8 = vpop.permute.xlu1 %1916 }
 0xd5a   : > { %3071 = vpush %v1753_v29  ;;  %v1770_v31 = vadd.f32 %v1769_v15, %v1768_v28 }
 0xd5c   : > { %3073 = vpush %v1770_v31 }
 0xd5f   : > { %v3985_v45 = vpop.permute.xlu2 %1897 }
 0xd60   : > { %v1912_v0 = vpop.permute.xlu0 %1911 }
 0xd68   : > { %v1922_v39 = vpop.permute.xlu0 %1921 }
 0xd8b   : > { %s3072_s23 = spop %3071 }
 0xd8c   : > { %v1755_v33 = vstv %s3072_s23 }
 0xd8d   : > { %v1773_v34 = vmul.f32 %v1755_v33, %v3496_v22  ;;  %s3074_s25 = spop %3073 }
 0xd8e   : > { %v1772_v35 = vstv %s3074_s25  ;;  %s3014_s25 = sld [smem:[#allocation3 + $0x180]] }
 0xd8f   : > { %v1774_v36 = vmul.f32 %v1772_v35, %v3496_v22  ;;  %v1775_v38 = vmul.f32 %v1773_v34, %v1773_v34 }
 0xd91   : > { %v1776_v40 = vsub.f32 %v1774_v36, %v1775_v38 }
 0xd93   : > { %v1777_v41 = vmax.f32 %v1776_v40, 0.0 }
 0xd95   : > { %v1778_v7 = vadd.f32 1e-08, %v1777_v41 }
 0xd97   : > { %3163 = vrsqrt.f32 %v1778_v7  ;;  %vm1785_vm7 = vweird.f32 %v1778_v7 }
 0xd9d   : > { %v3164_v23 = vpop.eup %3163 }
 0xd9e   : > { %v1780_v61 = vmul.f32 %v3164_v23, %v1778_v7  ;;  %vm1786_vm6 = vweird.f32 %v3164_v23  ;;  %v2963_v7 = vld [vmem:[%s4397_s4 + $0x298] sm:$0xff] }
 0xd9f   : > { %vm1787_vm9 = vmor %vm1785_vm7, %vm1786_vm6 }
 0xda0   : > { %v1781_v47 = vmul.f32 %v3164_v23, %v1780_v61 }
 0xda2   : > { %v1782_v44 = vmul.f32 0.5, %v1781_v47 }
 0xda4   : > { %v1783_v48 = vsub.f32 1.5, %v1782_v44 }
 0xda6   : > { %v1784_v3 = vmul.f32 %v3164_v23, %v1783_v48 }
 0xda8   : > { %v1788_v53 = vsel %vm1787_vm9, %v3164_v23, %v1784_v3  ;;  %v2962_v23 = vld [vmem:[%s4397_s4 + $0x290] sm:$0xff] }
 0xda9   : > { %v1791_v55 = vmul.f32 %v2942_v49, %v1788_v53  ;;  %v1790_v42 = vmul.f32 %v2941_v50, %v1788_v53  ;;  %v1789_v56 = vmul.f32 %v2940_v52, %v1788_v53  ;;  %v1792_v62 = vmul.f32 %v2943_v43, %v1788_v53 }
 0xdab   : > { %1805 = vperm.xlu2 %3148, %v1791_v55   ;;  %1800 = vperm.xlu0 %3146, %v1790_v42   ;;  %v1817_v60 = vmul.f32 %v1789_v56, %v1773_v34  ;;  %v1818_v51 = vmul.f32 %v1790_v42, %v1773_v34  ;;  %v1819_v13 = vmul.f32 %v1791_v55, %v1773_v34 }
 0xdac   : > { %1795 = vperm.xlu1 %3147, %v1789_v56   ;;  %v1820_v1 = vmul.f32 %v1792_v62, %v1773_v34 }
 0xdad   : > { %v1821_v63 = vsub.f32 %v2944_v58, %v1817_v60  ;;  %v1822_v5 = vsub.f32 %v2945_v59, %v1818_v51  ;;  %v1823_v10 = vsub.f32 %v2946_v2, %v1819_v13 }
 0xdae   : > { %v1824_v11 = vsub.f32 %v2947_v6, %v1820_v1 }
 0xdb3   : > { %1810 = vperm.xlu2 %3148, %v1792_v62   ;;  %1827 = vperm.xlu0 %3146, %v1821_v63  }
 0xdb4   : > { %1832 = vperm.xlu1 %3147, %v1822_v5  }
 0xdbb   : > { %1944 = vperm.xlu2 %3148, %v2957_v9   ;;  %1837 = vperm.xlu0 %3146, %v1823_v10  }
 0xdbc   : > { %1842 = vperm.xlu1 %3147, %v1824_v11  }
 0xdc3   : > { %1902 = vperm.xlu2 %3148, %v2951_v12   ;;  %1926 = vperm.xlu0 %3146, %v2955_v14  }
 0xdc4   : > { %1939 = vperm.xlu1 %3147, %v2956_v16  }
 0xdcb   : > { %1954 = vperm.xlu0 %3146, %v2959_v18  }
 0xdcc   : > { %1949 = vperm.xlu1 %3147, %v2958_v57  }
 0xdd4   : > { %1967 = vperm.xlu1 %3147, %v2960_v54  }
 0xe05   : > { %v1806_v15 = vpop.permute.xlu2 %1805 }
 0xe06   : > { %v1815_v34 = vmul.f32 %v1806_v15, %v3902_v32  ;;  %v2961_v32 = vld [vmem:[%s4397_s4 + $0x288] sm:$0xff] }
 0xe1d   : > { %v1801_v17 = vpop.permute.xlu0 %1800 }
 0xe1e   : > { %v1796_v24 = vpop.permute.xlu1 %1795  ;;  %v1814_v26 = vmul.f32 %v1801_v17, %v3897_v37 }
 0xe1f   : > { %v1813_v46 = vmul.f32 %v1796_v24, %v3892_v30  ;;  %v1811_v30 = vpop.permute.xlu2 %1810 }
 0xe20   : > { %v1816_v40 = vmul.f32 %v1811_v30, %v3907_v4 }
 0xe25   : > { %v1828_v27 = vpop.permute.xlu0 %1827 }
 0xe26   : > { %v1845_v28 = vadd.f32 %v1828_v27, %v1813_v46  ;;  %v1833_v29 = vpop.permute.xlu1 %1832 }
 0xe27   : > { %v1846_v31 = vadd.f32 %v1833_v29, %v1814_v26  ;;  %v1945_v4 = vpop.permute.xlu2 %1944 }
 0xe28   : > { %1853 = vrot.lane.b32.xlu2 %v1845_v28, %s3259_s15  ;;  %v1929_v1 = vmul.f32 %v1912_v0, %v1845_v28 }
 0xe29   : > { %v1930_v33 = vmul.f32 %v1917_v8, %v1846_v31  ;;  %1871 = vrot.lane.b32.xlu1 %v1846_v31, %s4415_s26  ;;  %1855 = vrot.lane.b32.xlu0 %v1846_v31, %s3259_s15 }
 0xe2d   : > { %v1838_v35 = vpop.permute.xlu0 %1837 }
 0xe2e   : > { %v1847_v36 = vadd.f32 %v1838_v35, %v1815_v34  ;;  %v1843_v37 = vpop.permute.xlu1 %1842 }
 0xe2f   : > { %v1848_v41 = vadd.f32 %v1843_v37, %v1816_v40  ;;  %v1903_v61 = vpop.permute.xlu2 %1902 }
 0xe30   : > { %v3993_v38 = vmul.f32 %v1922_v39, %v1847_v36  ;;  %1857 = vrot.lane.b32.xlu2 %v1847_v36, %s3259_s15 }
 0xe31   : > { %1873 = vrot.lane.b32.xlu1 %v1847_v36, %s4415_s26  ;;  %1869 = vrot.lane.b32.xlu0 %v1845_v28, %s4415_s26 }
 0xe35   : > { %v1927_v48 = vpop.permute.xlu0 %1926 }
 0xe36   : > { %v1940_v47 = vpop.permute.xlu1 %1939  ;;  %v1932_v24 = vmul.f32 %v1927_v48, %v1848_v41 }
 0xe38   : > { %1875 = vrot.lane.b32.xlu2 %v1848_v41, %s4415_s26  ;;  %s392_s26 = sand.u32 1, %s3244_s20  }
 0xe39   : > { %1982 = vperm.xlu1 %3147, %v2963_v7   ;;  %1859 = vrot.lane.b32.xlu0 %v1848_v41, %s3259_s15  ;;  %s2965_s15 = sld [smem:[#allocation3 + $0x101]]  ;;  %s2872_s16 = sshll.u32 %s392_s26, 5 }
 0xe3d   : > { %v1955_v50 = vpop.permute.xlu0 %1954 }
 0xe3e   : > { %v1950_v3 = vpop.permute.xlu1 %1949 }
 0xe3f   : > { %v1993_v13 = vstv %s2965_s15 }
 0xe40   : > { %1972 = vperm.xlu2 %3148, %v2961_v32  }
 0xe41   : > { %1977 = vperm.xlu0 %3146, %v2962_v23  }
 0xe46   : > { %v1968_v52 = vpop.permute.xlu1 %1967 }
 0xe82   : > { %v1854_v44 = vpop.permute.xlu2 %1853 }
 0xe83   : > { %v1865_v51 = vsel %vm412_vm0, 0.0, %v1854_v44 }
 0xe84   : > { %v1905_v62 = vmul.f32 %v1888_v19, %v1865_v51 }
 0xe86   : > { %v1933_v10 = vadd.f32 %v1929_v1, %v1905_v62 }
 0xe8a   : > { %v1858_v49 = vpop.permute.xlu2 %1857 }
 0xe8b   : > { %v1867_v57 = vsel %vm412_vm0, 0.0, %v1858_v49 }
 0xe8c   : > { %v1907_v39 = vmul.f32 %v3985_v45, %v1867_v57 }
 0xe8e   : > { %v1935_v31 = vadd.f32 %v3993_v38, %v1907_v39 }
 0xe92   : > { %v1876_v53 = vpop.permute.xlu2 %1875 }
 0xe93   : > { %v1884_v8 = vsel %vm787_vm14, %v1876_v53, 0.0 }
 0xe94   : > { %v1960_v29 = vmul.f32 %v1955_v50, %v1884_v8 }
 0xe9a   : > { %v1973_v5 = vpop.permute.xlu2 %1972 }
 0xe9b   : > { %v1856_v55 = vpop.permute.xlu0 %1855  ;;  %v1872_v42 = vpop.permute.xlu1 %1871 }
 0xe9c   : > { %v1866_v56 = vsel %vm412_vm0, 0.0, %v1856_v55  ;;  %v1882_v60 = vsel %vm787_vm14, %v1872_v42, 0.0 }
 0xe9d   : > { %v1906_v43 = vmul.f32 %v1893_v20, %v1866_v56  ;;  %v1958_v59 = vmul.f32 %v1945_v4, %v1882_v60  ;;  %v2979_v4 = vld [vmem:[%s4399_s6 + $0x48] sm:$0xff] }
 0xe9f   : > { %v1934_v58 = vadd.f32 %v1930_v33, %v1906_v43 }
 0xea1   : > { %v1962_v63 = vadd.f32 %v1958_v59, %v1934_v58 }
 0xea3   : > { %v1986_v2 = vadd.f32 %v1973_v5, %v1962_v63  ;;  %v1870_v6 = vpop.permute.xlu0 %1869  ;;  %v1874_v18 = vpop.permute.xlu1 %1873 }
 0xea4   : > { %v1881_v9 = vsel %vm787_vm14, %v1870_v6, 0.0  ;;  %v1883_v19 = vsel %vm787_vm14, %v1874_v18, 0.0 }
 0xea5   : > { %v1957_v11 = vmul.f32 %v1940_v47, %v1881_v9  ;;  %vm1990_vm10 = vcmp.ge.f32.partialorder %v1986_v2, 0.0  ;;  %v1995_v12 = vmul.f32 %v1993_v13, %v1986_v2  ;;  %v1959_v27 = vmul.f32 %v1950_v3, %v1883_v19  ;;  %v2989_v47 = vld [vmem:[%s4397_s4 + $0x2b8] sm:$0xff]  ;;  %v2986_v9 = vld [vmem:[%s4397_s4 + $0x2a0] sm:$0xff] }
 0xea7   : > { %v1961_v14 = vadd.f32 %v1957_v11, %v1933_v10  ;;  %v4014_v16 = vsel %vm1990_vm10, %v1986_v2, %v1995_v12  ;;  %v1963_v34 = vadd.f32 %v1959_v27, %v1935_v31  ;;  %v2978_v10 = vld [vmem:[%s4399_s6 + $0x40] sm:$0xff]  ;;  %v2988_v11 = vld [vmem:[%s4397_s4 + $0x2b0] sm:$0xff] }
 0xea8   : > { %2008 = vadd.xlane.f32.xlu0 %v4014_v16  ;;  %v2003_v28 = vmul.f32 %v4014_v16, %v4014_v16 }
 0xea9   : > { %v1985_v54 = vadd.f32 %v1968_v52, %v1961_v14 }
 0xeab   : > { %v1860_v0 = vpop.permute.xlu0 %1859  ;;  %vm1989_vm11 = vcmp.ge.f32.partialorder %v1985_v54, 0.0  ;;  %v1994_v20 = vmul.f32 %v1993_v13, %v1985_v54  ;;  %v1983_v33 = vpop.permute.xlu1 %1982 }
 0xeac   : > { %v1868_v17 = vsel %vm412_vm0, 0.0, %v1860_v0 }
 0xead   : > { %v1908_v46 = vmul.f32 %v1903_v61, %v1868_v17  ;;  %v4022_v26 = vsel %vm1989_vm11, %v1985_v54, %v1994_v20  ;;  %v2987_v61 = vld [vmem:[%s4397_s4 + $0x2a8] sm:$0xff] }
 0xeae   : > { %2006 = vadd.xlane.f32.xlu2 %v4022_v26  ;;  %v2002_v37 = vmul.f32 %v4022_v26, %v4022_v26 }
 0xeaf   : > { %v1936_v15 = vadd.f32 %v1932_v24, %v1908_v46 }
 0xeb0   : > { %2016 = vadd.xlane.f32.xlu0 %v2003_v28 }
 0xeb1   : > { %v1964_v45 = vadd.f32 %v1960_v29, %v1936_v15 }
 0xeb3   : > { %v1988_v35 = vadd.f32 %v1983_v33, %v1964_v45  ;;  %v1978_v36 = vpop.permute.xlu0 %1977 }
 0xeb4   : > { %v1987_v30 = vadd.f32 %v1978_v36, %v1963_v34  ;;  %v989_v36 = vld [vmem:[%s4398_s5 + $0x10] sm:$0xff] }
 0xeb5   : > { %vm1992_vm14 = vcmp.ge.f32.partialorder %v1988_v35, 0.0  ;;  %v1997_v40 = vmul.f32 %v1993_v13, %v1988_v35  ;;  %2884 = vmatmul.msk.f32.gmra.mxu2 %vm1015_vm8, %v989_v36 }
 0xeb6   : > { %v1996_v41 = vmul.f32 %v1993_v13, %v1987_v30  ;;  %2014 = vadd.xlane.f32.xlu2 %v2002_v37  ;;  %vm1991_vm12 = vcmp.ge.f32.partialorder %v1987_v30, 0.0 }
 0xeb7   : > { %v4030_v7 = vsel %vm1992_vm14, %v1988_v35, %v1997_v40 }
 0xeb8   : > { %v4032_v32 = vsel %vm1991_vm12, %v1987_v30, %v1996_v41  ;;  %v2005_v38 = vmul.f32 %v4030_v7, %v4030_v7 }
 0xeb9   : > { %2010 = vadd.xlane.f32.xlu1 %v4032_v32  ;;  %v2004_v23 = vmul.f32 %v4032_v32, %v4032_v32 }
 0xeba   : > { %2020 = vadd.xlane.f32.xlu0 %v2005_v38 }
 0xebe   : > { %2018 = vadd.xlane.f32.xlu2 %v2004_v23 }
 0xec1   : > { %2012 = vadd.xlane.f32.xlu1 %v4030_v7 }
 0xece   : > { %2097 = vperm.xlu0 %3146, %v2979_v4  }
 0xed6   : > { %2198 = vperm.xlu0 %3146, %v2987_v61  }
 0xede   : > { %2208 = vperm.xlu0 %3146, %v2989_v47  }
 0xf1b   : > { %v2009_v44 = vpop.xlane.xlu0 %2008 }
 0xf1c   : > { %v2023_v42 = vsel %vm412_vm0, %v2009_v44, 0.0 }
 0xf21   : > { %v2007_v48 = vpop.xlane.xlu2 %2006 }
 0xf22   : > { %v2022_v53 = vsel %vm412_vm0, %v2007_v48, 0.0 }
 0xf23   : > { %v2017_v3 = vpop.xlane.xlu0 %2016  ;;  %v2024_v58 = vadd.f32 %v2023_v42, %v2022_v53  ;;  %v2974_v53 = vld [vmem:[%s4398_s5 + $0x40] sm:$0xff] }
 0xf24   : > { %v2040_v55 = vsel %vm412_vm0, %v2017_v3, 0.0 }
 0xf29   : > { %v2015_v49 = vpop.xlane.xlu2 %2014 }
 0xf2a   : > { %v2039_v52 = vsel %vm412_vm0, %v2015_v49, 0.0 }
 0xf2b   : > { %v2041_v56 = vadd.f32 %v2040_v55, %v2039_v52 }
 0xf2c   : > { %v2011_v50 = vpop.xlane.xlu1 %2010 }
 0xf2d   : > { %v2025_v60 = vsel %vm412_vm0, %v2011_v50, 0.0  ;;  %v2021_v43 = vpop.xlane.xlu0 %2020 }
 0xf2e   : > { %v2026_v63 = vadd.f32 %v2025_v60, %v2024_v58  ;;  %v2044_v5 = vsel %vm412_vm0, %v2021_v43, 0.0  ;;  %v3016_v58 = vld [vmem:[%s4396_s3 + $0x60] sm:$0xff] }
 0xf31   : > { %v2019_v51 = vpop.xlane.xlu2 %2018 }
 0xf32   : > { %v2042_v59 = vsel %vm412_vm0, %v2019_v51, 0.0 }
 0xf33   : > { %v2043_v62 = vadd.f32 %v2042_v59, %v2041_v56  ;;  %v3017_v59 = vld [vmem:[%s4396_s3 + $0x68] sm:$0xff] }
 0xf34   : > { %v2013_v13 = vpop.xlane.xlu1 %2012 }
 0xf35   : > { %v2045_v1 = vadd.f32 %v2044_v5, %v2043_v62  ;;  %v2027_v2 = vsel %vm412_vm0, %v2013_v13, 0.0 }
 0xf36   : > { %v2028_v6 = vadd.f32 %v2027_v2, %v2026_v63 }
 0xf37   : > { %2046 = vadd.xlane.f32.xlu2 %v2045_v1  ;;  %v2256_v1 = vstv %s3014_s25 }
 0xf38   : > { %2029 = vadd.xlane.f32.xlu1 %v2028_v6  ;;  %v4106_v62 = vpop.f32.mrf.mxu2 }
 0xf4f   : > { %2193 = vperm.xlu2 %3148, %v2986_v9  }
 0xf51   : > { %2092 = vperm.xlu1 %3147, %v2978_v10  }
 0xf59   : > { %2203 = vperm.xlu1 %3147, %v2988_v11  }
 0xfaa   : > { %v2047_v12 = vpop.xlane.xlu2 %2046 }
 0xfab   : > { %v2048_v14 = vrot.slane %v2047_v12, 4  ;;  %v2030_v18 = vpop.xlane.xlu1 %2029 }
 0xfac   : > { %v2031_v57 = vrot.slane %v2030_v18, 4 }
 0xfad   : > { %v2049_v54 = vadd.f32 %v2048_v14, %v2047_v12 }
 0xfae   : > { %v2032_v19 = vadd.f32 %v2031_v57, %v2030_v18 }
 0xfaf   : > { %v2050_v0 = vrot.slane %v2049_v54, 2 }
 0xfb0   : > { %v2033_v20 = vrot.slane %v2032_v19, 2 }
 0xfb1   : > { %v2051_v39 = vadd.f32 %v2050_v0, %v2049_v54 }
 0xfb2   : > { %v2034_v8 = vadd.f32 %v2033_v20, %v2032_v19  ;;  %v2194_v5 = vpop.permute.xlu2 %2193 }
 0xfb3   : > { %v2052_v17 = vrot.slane %v2051_v39, 1 }
 0xfb4   : > { %v2035_v24 = vrot.slane %v2034_v8, 1 }
 0xfb5   : > { %v2053_v46 = vadd.f32 %v2052_v17, %v2051_v39 }
 0xfb6   : > { %v2036_v27 = vadd.f32 %v2035_v24, %v2034_v8 }
 0xfb8   : > { %3075 = vpush %v2036_v27 }
 0xfb9   : > { %3077 = vpush %v2053_v46 }
 0xfc3   : > { %v2093_v55 = vpop.permute.xlu1 %2092 }
 0xfcb   : > { %v2204_v54 = vpop.permute.xlu1 %2203 }
 0xfe9   : > { %s3076_s13 = spop %3075 }
 0xfea   : > { %v2038_v28 = vstv %s3076_s13  ;;  %s3078_s14 = spop %3077  ;;  %s2777_s13 = scalar_lea.sflag [#allocation4], %s392_s26 }
 0xfeb   : > { %v2056_v29 = vmul.f32 %v2038_v28, %v3496_v22  ;;  %v2055_v15 = vstv %s3078_s14 }
 0xfec   : > { %v2057_v31 = vmul.f32 %v2055_v15, %v3496_v22 }
 0xfed   : > { %v2058_v45 = vmul.f32 %v2056_v29, %v2056_v29  ;;  %v2075_v4 = vsub.f32 %v4030_v7, %v2056_v29  ;;  %v2074_v44 = vsub.f32 %v4032_v32, %v2056_v29  ;;  %v2073_v3 = vsub.f32 %v4014_v16, %v2056_v29  ;;  %v2975_v7 = vld [vmem:[%s4398_s5 + $0x48] sm:$0xff]  ;;  %v990_v16 = vld [vmem:[%s4398_s5 + $0x18] sm:$0xff]  ;;  %v2098_v32 = vpop.permute.xlu0 %2097 }
 0xfee   : > { %v2072_v50 = vsub.f32 %v4022_v26, %v2056_v29  ;;  %2885 = vmatmul.msk.f32.gmra.mxu2 %vm1015_vm8, %v990_v16 }
 0xfef   : > { %v2059_v33 = vsub.f32 %v2057_v31, %v2058_v45  ;;  %v2998_v31 = vld [vmem:[%s4397_s4 + $0x300] sm:$0xff]  ;;  %v3003_v45 = vld [vmem:[%s4397_s4 + $0x328] sm:$0xff] }
 0xff1   : > { %v2060_v34 = vmax.f32 %v2059_v33, 0.0 }
 0xff3   : > { %v2061_v35 = vadd.f32 1e-08, %v2060_v34 }
 0xff5   : > { %3165 = vrsqrt.f32 %v2061_v35  ;;  %vm2068_vm15 = vweird.f32 %v2061_v35  ;;  %v2199_v10 = vpop.permute.xlu0 %2198 }
 0xffb   : > { %v3166_v30 = vpop.eup %3165 }
 0xffc   : > { %v2063_v37 = vmul.f32 %v3166_v30, %v2061_v35  ;;  %vm2069_vm13 = vweird.f32 %v3166_v30 }
 0xffd   : > { %vm2070_vm1 = vmor %vm2068_vm15, %vm2069_vm13  ;;  %v2209_v24 = vpop.permute.xlu0 %2208 }
 0xffe   : > { %v2064_v40 = vmul.f32 %v3166_v30, %v2063_v37 }
0x1000   : > { %v2065_v41 = vmul.f32 0.5, %v2064_v40 }
0x1002   : > { %v2066_v38 = vsub.f32 1.5, %v2065_v41 }
0x1004   : > { %v2067_v23 = vmul.f32 %v3166_v30, %v2066_v38 }
0x1006   : > { %v2071_v61 = vsel %vm2070_vm1, %v3166_v30, %v2067_v23 }
0x1007   : > { %v2079_v47 = vmul.f32 %v2075_v4, %v2071_v61  ;;  %v2078_v48 = vmul.f32 %v2074_v44, %v2071_v61  ;;  %v2077_v49 = vmul.f32 %v2073_v3, %v2071_v61  ;;  %v2076_v52 = vmul.f32 %v2072_v50, %v2071_v61 }
0x1009   : > { %2134 = vmatpush.msra.mxu3 %v2079_v47 }
0x100b   : > { %2135 = vmatpush.msra.mxu3 %v2078_v48 }
0x100d   : > { %2136 = vmatpush.msra.mxu3 %v2077_v49 }
0x100f   : > { %2137 = vmatpush.msra.mxu3 %v2076_v52 }
0x1010   : > { %2982 = vmatmul.msk.f32.vlgmr.msra.gmra.mxu3 %vm1015_vm8, %v2974_v53 }
0x1018   : > { %2983 = vmatmul.msk.f32.gmra.mxu3 %vm1015_vm8, %v2975_v7 }
0x1071   : > { %v4108_v63 = vpop.f32.mrf.mxu2 }
0x1093   : > { %v2139_v26 = vpop.f32.mrf.mxu3 }
0x1094   : > { %v2140_v56 = vadd.f32 %v2139_v26, %v2093_v55  ;;  %v3002_v26 = vld [vmem:[%s4397_s4 + $0x320] sm:$0xff]  ;;  %v3004_v55 = vld [vmem:[%s4397_s4 + $0x330] sm:$0xff] }
0x1096   : > { %v2151_v51 = vadd.f32 %v2140_v56, %v3873_v25  ;;  %v3019_v25 = vld [vmem:[%s4396_s3 + $0x78] sm:$0xff] }
0x109b   : > { %v2142_v42 = vpop.f32.mrf.mxu3 }
0x109c   : > { %v2143_v60 = vadd.f32 %v2142_v42, %v2098_v32  ;;  %v2999_v32 = vld [vmem:[%s4397_s4 + $0x308] sm:$0xff]  ;;  %v3000_v42 = vld [vmem:[%s4397_s4 + $0x310] sm:$0xff] }
0x109e   : > { %v2152_v43 = vadd.f32 %v2143_v60, %v3869_v21  ;;  %v3018_v21 = vld [vmem:[%s4396_s3 + $0x70] sm:$0xff] }
0x10a0   : > { %2237 = vmatpush.msra.mxu2 %v2152_v43 }
0x10a2   : > { %2238 = vmatpush.msra.mxu2 %v2151_v51 }
0x10a3   : > { %3020 = vmatmul.msk.f32.vlgmr.msra.gmra.mxu2 %vm480_vm5, %v3016_v58 }
0x10ab   : > { %3021 = vmatmul.msk.f32.gmra.mxu2 %vm480_vm5, %v3017_v59 }
0x10b3   : > { %3022 = vmatmul.msk.f32.gmra.mxu2 %vm480_vm5, %v3018_v21 }
0x10bb   : > { %3023 = vmatmul.msk.f32.gmra.mxu2 %vm480_vm5, %v3019_v25 }
0x1126   : > { %v2240_v13 = vpop.f32.mrf.mxu2 }
0x1127   : > { %v2241_v2 = vadd.f32 %v2240_v13, %v2194_v5 }
0x1129   : > { %v2257_v6 = vmul.f32 %v2256_v1, %v2241_v2  ;;  %vm2252_vm4 = vcmp.ge.f32.partialorder %v2241_v2, 0.0 }
0x112b   : > { %v4110_v9 = vsel %vm2252_vm4, %v2241_v2, %v2257_v6 }
0x112c   : > { %2269 = vadd.xlane.f32.xlu2 %v4110_v9  ;;  %v2265_v18 = vmul.f32 %v4110_v9, %v4110_v9 }
0x112e   : > { %v2243_v11 = vpop.f32.mrf.mxu2 }
0x112f   : > { %v2244_v12 = vadd.f32 %v2243_v11, %v2199_v10 }
0x1131   : > { %v2258_v14 = vmul.f32 %v2256_v1, %v2244_v12  ;;  %vm2253_vm6 = vcmp.ge.f32.partialorder %v2244_v12, 0.0 }
0x1133   : > { %v4115_v57 = vsel %vm2253_vm6, %v2244_v12, %v2258_v14 }
0x1134   : > { %2271 = vadd.xlane.f32.xlu1 %v4115_v57  ;;  %2277 = vadd.xlane.f32.xlu2 %v2265_v18  ;;  %v2266_v39 = vmul.f32 %v4115_v57, %v4115_v57 }
0x1136   : > { %v2246_v19 = vpop.f32.mrf.mxu2 }
0x1137   : > { %v2247_v0 = vadd.f32 %v2246_v19, %v2204_v54 }
0x1139   : > { %v2259_v20 = vmul.f32 %v2256_v1, %v2247_v0  ;;  %vm2254_vm7 = vcmp.ge.f32.partialorder %v2247_v0, 0.0 }
0x113b   : > { %v4120_v8 = vsel %vm2254_vm7, %v2247_v0, %v2259_v20 }
0x113c   : > { %2279 = vadd.xlane.f32.xlu1 %v2266_v39  ;;  %2273 = vadd.xlane.f32.xlu0 %v4120_v8  ;;  %v2267_v17 = vmul.f32 %v4120_v8, %v4120_v8 }
0x113e   : > { %v2249_v46 = vpop.f32.mrf.mxu2  ;;  %2281 = vadd.xlane.f32.xlu2 %v2267_v17 }
0x113f   : > { %v2250_v27 = vadd.f32 %v2249_v46, %v2209_v24 }
0x1141   : > { %v2260_v28 = vmul.f32 %v2256_v1, %v2250_v27  ;;  %vm2255_vm9 = vcmp.ge.f32.partialorder %v2250_v27, 0.0 }
0x1143   : > { %v4125_v29 = vsel %vm2255_vm9, %v2250_v27, %v2260_v28 }
0x1144   : > { %2275 = vadd.xlane.f32.xlu0 %v4125_v29  ;;  %v2268_v15 = vmul.f32 %v4125_v29, %v4125_v29 }
0x1146   : > { %2283 = vadd.xlane.f32.xlu1 %v2268_v15  ;;  %v2992_v15 = vld [vmem:[%s4397_s4 + $0x2d0] sm:$0xff] }
0x115f   : > { %2433 = vperm.xlu1 %3147, %v2998_v31   ;;  %v2991_v31 = vld [vmem:[%s4397_s4 + $0x2c8] sm:$0xff] }
0x1167   : > { %2462 = vperm.xlu1 %3147, %v3003_v45   ;;  %v2990_v45 = vld [vmem:[%s4397_s4 + $0x2c0] sm:$0xff] }
0x119f   : > { %v2270_v33 = vpop.xlane.xlu2 %2269 }
0x11a0   : > { %v2285_v38 = vsel %vm412_vm0, %v2270_v33, 0.0 }
0x11a7   : > { %v2272_v34 = vpop.xlane.xlu1 %2271  ;;  %v2278_v35 = vpop.xlane.xlu2 %2277 }
0x11a8   : > { %v2286_v37 = vsel %vm412_vm0, %v2272_v34, 0.0  ;;  %v2302_v23 = vsel %vm412_vm0, %v2278_v35, 0.0 }
0x11a9   : > { %v2287_v61 = vadd.f32 %v2286_v37, %v2285_v38  ;;  %v2993_v37 = vld [vmem:[%s4397_s4 + $0x2d8] sm:$0xff]  ;;  %v2995_v38 = vld [vmem:[%s4397_s4 + $0x2e8] sm:$0xff] }
0x11af   : > { %v2274_v36 = vpop.xlane.xlu0 %2273  ;;  %v2280_v30 = vpop.xlane.xlu1 %2279 }
0x11b0   : > { %v2303_v40 = vsel %vm412_vm0, %v2280_v30, 0.0  ;;  %v2288_v4 = vsel %vm412_vm0, %v2274_v36, 0.0 }
0x11b1   : > { %v2282_v41 = vpop.xlane.xlu2 %2281  ;;  %v2304_v47 = vadd.f32 %v2303_v40, %v2302_v23  ;;  %v2289_v48 = vadd.f32 %v2288_v4, %v2287_v61 }
0x11b2   : > { %v2305_v44 = vsel %vm412_vm0, %v2282_v41, 0.0  ;;  %v2994_v41 = vld [vmem:[%s4397_s4 + $0x2e0] sm:$0xff] }
0x11b3   : > { %v2306_v50 = vadd.f32 %v2305_v44, %v2304_v47 }
0x11b7   : > { %v2276_v3 = vpop.xlane.xlu0 %2275 }
0x11b8   : > { %v2290_v49 = vsel %vm412_vm0, %v2276_v3, 0.0  ;;  %v2997_v3 = vld [vmem:[%s4397_s4 + $0x2f8] sm:$0xff] }
0x11b9   : > { %v2291_v52 = vadd.f32 %v2290_v49, %v2289_v48  ;;  %v2284_v53 = vpop.xlane.xlu1 %2283  ;;  %v2996_v48 = vld [vmem:[%s4397_s4 + $0x2f0] sm:$0xff]  ;;  %v3007_v49 = vld [vmem:[%s4397_s4 + $0x348] sm:$0xff] }
0x11ba   : > { %v2307_v7 = vsel %vm412_vm0, %v2284_v53, 0.0  ;;  %v3001_v53 = vld [vmem:[%s4397_s4 + $0x318] sm:$0xff] }
0x11bb   : > { %v2308_v16 = vadd.f32 %v2307_v7, %v2306_v50  ;;  %2292 = vadd.xlane.f32.xlu0 %v2291_v52  ;;  %v3005_v7 = vld [vmem:[%s4397_s4 + $0x338] sm:$0xff] }
0x11bd   : > { %2309 = vadd.xlane.f32.xlu2 %v2308_v16  ;;  %v3006_v16 = vld [vmem:[%s4397_s4 + $0x340] sm:$0xff] }
0x11cf   : > { %2457 = vperm.xlu0 %3146, %v3002_v26   ;;  %v3009_v26 = vld [vmem:[%s4397_s4 + $0x358] sm:$0xff] }
0x11d5   : > { %2438 = vperm.xlu2 %3148, %v2999_v32   ;;  %v3008_v32 = vld [vmem:[%s4397_s4 + $0x350] sm:$0xff] }
0x11d7   : > { %2467 = vperm.xlu0 %3146, %v3004_v55   ;;  %v3010_v55 = vld [vmem:[%s4397_s4 + $0x360] sm:$0xff] }
0x11dd   : > { %2443 = vperm.xlu2 %3148, %v3000_v42  }
0x122e   : > { %v2293_v56 = vpop.xlane.xlu0 %2292 }
0x122f   : > { %v2294_v60 = vrot.slane %v2293_v56, 4 }
0x1230   : > { %v2310_v43 = vpop.xlane.xlu2 %2309 }
0x1231   : > { %v2295_v51 = vadd.f32 %v2294_v60, %v2293_v56  ;;  %v2311_v58 = vrot.slane %v2310_v43, 4  ;;  %v2434_v56 = vpop.permute.xlu1 %2433 }
0x1233   : > { %v2296_v59 = vrot.slane %v2295_v51, 2  ;;  %v2312_v21 = vadd.f32 %v2311_v58, %v2310_v43 }
0x1235   : > { %v2313_v25 = vrot.slane %v2312_v21, 2  ;;  %v2297_v5 = vadd.f32 %v2296_v59, %v2295_v51 }
0x1237   : > { %v2298_v13 = vrot.slane %v2297_v5, 1  ;;  %v2314_v1 = vadd.f32 %v2313_v25, %v2312_v21 }
0x1238   : > { %v2439_v60 = vpop.permute.xlu2 %2438 }
0x1239   : > { %v2299_v2 = vadd.f32 %v2298_v13, %v2297_v5  ;;  %v2315_v6 = vrot.slane %v2314_v1, 1  ;;  %v2463_v51 = vpop.permute.xlu1 %2462 }
0x123b   : > { %3079 = vpush %v2299_v2  ;;  %v2316_v10 = vadd.f32 %v2315_v6, %v2314_v1 }
0x123d   : > { %3081 = vpush %v2316_v10 }
0x1240   : > { %v4205_v21 = vpop.permute.xlu2 %2443 }
0x1241   : > { %v4203_v42 = vpop.permute.xlu0 %2457 }
0x1249   : > { %v2468_v43 = vpop.permute.xlu0 %2467 }
0x126c   : > { %s3080_s15 = spop %3079 }
0x126d   : > { %v2301_v11 = vstv %s3080_s15  ;;  %s4417_s15 = smov 126  }
0x126e   : > { %v2319_v12 = vmul.f32 %v2301_v11, %v3496_v22  ;;  %s3082_s12 = spop %3081 }
0x126f   : > { %v2318_v14 = vstv %s3082_s12 }
0x1270   : > { %v2320_v18 = vmul.f32 %v2318_v14, %v3496_v22  ;;  %v2321_v54 = vmul.f32 %v2319_v12, %v2319_v12 }
0x1272   : > { %v2322_v19 = vsub.f32 %v2320_v18, %v2321_v54 }
0x1274   : > { %v2323_v0 = vmax.f32 %v2322_v19, 0.0 }
0x1276   : > { %v2324_v20 = vadd.f32 1e-08, %v2323_v0 }
0x1278   : > { %3167 = vrsqrt.f32 %v2324_v20  ;;  %vm2331_vm11 = vweird.f32 %v2324_v20 }
0x127e   : > { %v3168_v39 = vpop.eup %3167 }
0x127f   : > { %v2326_v17 = vmul.f32 %v3168_v39, %v2324_v20  ;;  %vm2332_vm10 = vweird.f32 %v3168_v39  ;;  %v3013_v20 = vld [vmem:[%s4397_s4 + $0x378] sm:$0xff] }
0x1280   : > { %vm2333_vm14 = vmor %vm2331_vm11, %vm2332_vm10 }
0x1281   : > { %v2327_v24 = vmul.f32 %v3168_v39, %v2326_v17 }
0x1283   : > { %v2328_v46 = vmul.f32 0.5, %v2327_v24 }
0x1285   : > { %v2329_v27 = vsub.f32 1.5, %v2328_v46 }
0x1287   : > { %v2330_v28 = vmul.f32 %v3168_v39, %v2329_v27 }
0x1289   : > { %v2334_v33 = vsel %vm2333_vm14, %v3168_v39, %v2330_v28  ;;  %v3012_v39 = vld [vmem:[%s4397_s4 + $0x370] sm:$0xff] }
0x128a   : > { %v2337_v34 = vmul.f32 %v2992_v15, %v2334_v33  ;;  %v2336_v35 = vmul.f32 %v2991_v31, %v2334_v33  ;;  %v2335_v36 = vmul.f32 %v2990_v45, %v2334_v33  ;;  %v2338_v23 = vmul.f32 %v2993_v37, %v2334_v33 }
0x128c   : > { %2351 = vperm.xlu2 %3148, %v2337_v34   ;;  %2346 = vperm.xlu0 %3146, %v2336_v35   ;;  %v2363_v30 = vmul.f32 %v2335_v36, %v2319_v12  ;;  %v2364_v40 = vmul.f32 %v2336_v35, %v2319_v12  ;;  %v2365_v47 = vmul.f32 %v2337_v34, %v2319_v12 }
0x128d   : > { %2341 = vperm.xlu1 %3147, %v2335_v36   ;;  %v2366_v44 = vmul.f32 %v2338_v23, %v2319_v12 }
0x128e   : > { %v2367_v4 = vsub.f32 %v2994_v41, %v2363_v30  ;;  %v2368_v61 = vsub.f32 %v2995_v38, %v2364_v40  ;;  %v2369_v50 = vsub.f32 %v2996_v48, %v2365_v47  ;;  %v2926_v47 = vld [vmem:[%s4398_s5 + $0x30] sm:$0xff]  ;;  %v2539_v48 = vstv %s3015_s18 }
0x128f   : > { %v2370_v52 = vsub.f32 %v2997_v3, %v2366_v44  ;;  %2934 = vmatmul.msk.f32.gmra.mxu0 %vm1015_vm8, %v2926_v47 }
0x1294   : > { %2356 = vperm.xlu2 %3148, %v2338_v23   ;;  %2373 = vperm.xlu0 %3146, %v2367_v4  }
0x1295   : > { %2378 = vperm.xlu1 %3147, %v2368_v61   ;;  %v2976_v61 = vld [vmem:[%s4398_s5 + $0x50] sm:$0xff] }
0x1296   : > { %2984 = vmatmul.msk.f32.gmra.mxu3 %vm1015_vm8, %v2976_v61 }
0x129c   : > { %2490 = vperm.xlu2 %3148, %v3007_v49   ;;  %2383 = vperm.xlu0 %3146, %v2369_v50  }
0x129d   : > { %2388 = vperm.xlu1 %3147, %v2370_v52  }
0x12a4   : > { %2448 = vperm.xlu2 %3148, %v3001_v53   ;;  %2472 = vperm.xlu0 %3146, %v3005_v7  }
0x12a5   : > { %2485 = vperm.xlu1 %3147, %v3006_v16  }
0x12ac   : > { %2500 = vperm.xlu0 %3146, %v3009_v26  }
0x12ad   : > { %2495 = vperm.xlu1 %3147, %v3008_v32  }
0x12b5   : > { %2513 = vperm.xlu1 %3147, %v3010_v55   ;;  %v2977_v55 = vld [vmem:[%s4398_s5 + $0x58] sm:$0xff] }
0x12b6   : > { %2985 = vmatmul.msk.f32.gmra.mxu3 %vm1015_vm8, %v2977_v55  ;;  %v2931_v55 = vld [vmem:[%s4399_s6 + $0x38] sm:$0xff] }
0x12e6   : > { %v2352_v6 = vpop.permute.xlu2 %2351 }
0x12e7   : > { %v2361_v12 = vmul.f32 %v2352_v6, %v4120_v8  ;;  %v3011_v8 = vld [vmem:[%s4397_s4 + $0x368] sm:$0xff] }
0x12fe   : > { %v2347_v58 = vpop.permute.xlu0 %2346 }
0x12ff   : > { %v2342_v59 = vpop.permute.xlu1 %2341  ;;  %v2360_v5 = vmul.f32 %v2347_v58, %v4115_v57 }
0x1300   : > { %v2359_v25 = vmul.f32 %v2342_v59, %v4110_v9  ;;  %v2357_v9 = vpop.permute.xlu2 %2356 }
0x1301   : > { %v2362_v19 = vmul.f32 %v2357_v9, %v4125_v29 }
0x1306   : > { %v2374_v13 = vpop.permute.xlu0 %2373 }
0x1307   : > { %v2391_v1 = vadd.f32 %v2374_v13, %v2359_v25  ;;  %v2379_v2 = vpop.permute.xlu1 %2378 }
0x1308   : > { %v2392_v10 = vadd.f32 %v2379_v2, %v2360_v5  ;;  %v2491_v29 = vpop.permute.xlu2 %2490 }
0x1309   : > { %2399 = vrot.lane.b32.xlu2 %v2391_v1, %s4416_s30  ;;  %v2475_v3 = vmul.f32 %v4203_v42, %v2391_v1 }
0x130a   : > { %v2476_v11 = vmul.f32 %v2463_v51, %v2392_v10  ;;  %2417 = vrot.lane.b32.xlu1 %v2392_v10, %s4417_s15  ;;  %2401 = vrot.lane.b32.xlu0 %v2392_v10, %s4416_s30 }
0x130e   : > { %v2384_v14 = vpop.permute.xlu0 %2383 }
0x130f   : > { %v2393_v18 = vadd.f32 %v2384_v14, %v2361_v12  ;;  %v2389_v57 = vpop.permute.xlu1 %2388 }
0x1310   : > { %v2394_v0 = vadd.f32 %v2389_v57, %v2362_v19  ;;  %v2449_v17 = vpop.permute.xlu2 %2448 }
0x1311   : > { %v4213_v54 = vmul.f32 %v2468_v43, %v2393_v18  ;;  %2403 = vrot.lane.b32.xlu2 %v2393_v18, %s4416_s30 }
0x1312   : > { %2419 = vrot.lane.b32.xlu1 %v2393_v18, %s4417_s15  ;;  %2415 = vrot.lane.b32.xlu0 %v2391_v1, %s4417_s15 }
0x1316   : > { %v2473_v27 = vpop.permute.xlu0 %2472 }
0x1317   : > { %v2486_v24 = vpop.permute.xlu1 %2485  ;;  %v2478_v13 = vmul.f32 %v2473_v27, %v2394_v0  ;;  %v2930_v27 = vld [vmem:[%s4399_s6 + $0x30] sm:$0xff] }
0x1319   : > { %2421 = vrot.lane.b32.xlu2 %v2394_v0, %s4417_s15 }
0x131a   : > { %2528 = vperm.xlu1 %3147, %v3013_v20   ;;  %2405 = vrot.lane.b32.xlu0 %v2394_v0, %s4416_s30 }
0x131e   : > { %v2501_v31 = vpop.permute.xlu0 %2500 }
0x131f   : > { %v2496_v28 = vpop.permute.xlu1 %2495 }
0x1321   : > { %2518 = vperm.xlu2 %3148, %v3011_v8  }
0x1322   : > { %2523 = vperm.xlu0 %3146, %v3012_v39  }
0x1327   : > { %v2514_v45 = vpop.permute.xlu1 %2513 }
0x1363   : > { %v2400_v46 = vpop.permute.xlu2 %2399 }
0x1364   : > { %v2411_v40 = vsel %vm1317_vm3, 0.0, %v2400_v46  ;;  %v994_v46 = vld [vmem:[%s4399_s6 + $0x18] sm:$0xff] }
0x1365   : > { %v2451_v23 = vmul.f32 %v2434_v56, %v2411_v40 }
0x1367   : > { %v2479_v53 = vadd.f32 %v2475_v3, %v2451_v23 }
0x136b   : > { %v2404_v15 = vpop.permute.xlu2 %2403 }
0x136c   : > { %v2413_v42 = vsel %vm1317_vm3, 0.0, %v2404_v15  ;;  %v3030_v15 = vld [vmem:[%s4399_s6 + $0x70] sm:$0xff] }
0x136d   : > { %v2453_v59 = vmul.f32 %v4205_v21, %v2413_v42  ;;  %v3031_v42 = vld [vmem:[%s4399_s6 + $0x78] sm:$0xff] }
0x136f   : > { %v2481_v14 = vadd.f32 %v4213_v54, %v2453_v59 }
0x1373   : > { %v2422_v33 = vpop.permute.xlu2 %2421 }
0x1374   : > { %v2430_v25 = vsel %vm1334_vm2, %v2422_v33, 0.0 }
0x137b   : > { %v2519_v44 = vpop.permute.xlu2 %2518 }
0x137c   : > { %v2402_v34 = vpop.permute.xlu0 %2401  ;;  %v2418_v35 = vpop.permute.xlu1 %2417 }
0x137d   : > { %v2412_v36 = vsel %vm1317_vm3, 0.0, %v2402_v34  ;;  %v2428_v30 = vsel %vm1334_vm2, %v2418_v35, 0.0  ;;  %v2927_v34 = vld [vmem:[%s4398_s5 + $0x38] sm:$0xff] }
0x137e   : > { %v2452_v37 = vmul.f32 %v2439_v60, %v2412_v36  ;;  %v2504_v38 = vmul.f32 %v2491_v29, %v2428_v30  ;;  %2935 = vmatmul.msk.f32.gmra.mxu0 %vm1015_vm8, %v2927_v34 }
0x1380   : > { %v2480_v41 = vadd.f32 %v2476_v11, %v2452_v37  ;;  %v2506_v11 = vmul.f32 %v2501_v31, %v2430_v25  ;;  %v2709_v31 = vld [vmem:[%s4403_s10 + $0x10] sm:$0xff] }
0x1382   : > { %v2508_v4 = vadd.f32 %v2504_v38, %v2480_v41 }
0x1384   : > { %v2532_v49 = vadd.f32 %v2519_v44, %v2508_v4  ;;  %v2416_v50 = vpop.permute.xlu0 %2415  ;;  %v2420_v56 = vpop.permute.xlu1 %2419 }
0x1385   : > { %v2427_v52 = vsel %vm1334_vm2, %v2416_v50, 0.0  ;;  %v2429_v43 = vsel %vm1334_vm2, %v2420_v56, 0.0  ;;  %v2980_v56 = vld [vmem:[%s4399_s6 + $0x50] sm:$0xff] }
0x1386   : > { %v2503_v7 = vmul.f32 %v2486_v24, %v2427_v52  ;;  %vm2536_vm12 = vcmp.ge.f32.partialorder %v2532_v49, 0.0  ;;  %v2541_v16 = vmul.f32 %v2539_v48, %v2532_v49  ;;  %v2505_v6 = vmul.f32 %v2496_v28, %v2429_v43  ;;  %v2981_v28 = vld [vmem:[%s4399_s6 + $0x58] sm:$0xff]  ;;  %v2708_v43 = vld [vmem:[%s4403_s10 + $0x8] sm:$0xff] }
0x1388   : > { %v2507_v26 = vadd.f32 %v2503_v7, %v2479_v53  ;;  %v4243_v32 = vsel %vm2536_vm12, %v2532_v49, %v2541_v16  ;;  %v2509_v9 = vadd.f32 %v2505_v6, %v2481_v14 }
0x1389   : > { %2554 = vadd.xlane.f32.xlu0 %v4243_v32  ;;  %v2549_v10 = vmul.f32 %v4243_v32, %v4243_v32 }
0x138a   : > { %v2531_v60 = vadd.f32 %v2514_v45, %v2507_v26  ;;  %v993_v26 = vld [vmem:[%s4399_s6 + $0x10] sm:$0xff] }
0x138c   : > { %v2406_v51 = vpop.permute.xlu0 %2405  ;;  %vm2535_vm13 = vcmp.ge.f32.partialorder %v2531_v60, 0.0  ;;  %v2540_v58 = vmul.f32 %v2539_v48, %v2531_v60  ;;  %v2529_v18 = vpop.permute.xlu1 %2528 }
0x138d   : > { %v2414_v5 = vsel %vm1317_vm3, 0.0, %v2406_v51  ;;  %v2710_v51 = vld [vmem:[%s4403_s10 + $0x18] sm:$0xff] }
0x138e   : > { %v2454_v1 = vmul.f32 %v2449_v17, %v2414_v5  ;;  %v4255_v2 = vsel %vm2535_vm13, %v2531_v60, %v2540_v58  ;;  %v2707_v60 = vld [vmem:[%s4403_s10] sm:$0xff] }
0x138f   : > { %2552 = vadd.xlane.f32.xlu2 %v4255_v2  ;;  %v2548_v20 = vmul.f32 %v4255_v2, %v4255_v2 }
0x1390   : > { %v2482_v12 = vadd.f32 %v2478_v13, %v2454_v1 }
0x1391   : > { %2562 = vadd.xlane.f32.xlu0 %v2549_v10 }
0x1392   : > { %v2510_v21 = vadd.f32 %v2506_v11, %v2482_v12 }
0x1394   : > { %v2534_v57 = vadd.f32 %v2529_v18, %v2510_v21  ;;  %v2524_v19 = vpop.permute.xlu0 %2523 }
0x1395   : > { %v2533_v0 = vadd.f32 %v2524_v19, %v2509_v9 }
0x1396   : > { %vm2538_vm2 = vcmp.ge.f32.partialorder %v2534_v57, 0.0  ;;  %v2543_v8 = vmul.f32 %v2539_v48, %v2534_v57 }
0x1397   : > { %v2542_v39 = vmul.f32 %v2539_v48, %v2533_v0  ;;  %2560 = vadd.xlane.f32.xlu2 %v2548_v20  ;;  %vm2537_vm3 = vcmp.ge.f32.partialorder %v2533_v0, 0.0 }
0x1398   : > { %v4263_v29 = vsel %vm2538_vm2, %v2534_v57, %v2543_v8 }
0x1399   : > { %v4265_v17 = vsel %vm2537_vm3, %v2533_v0, %v2542_v39  ;;  %v2551_v54 = vmul.f32 %v4263_v29, %v4263_v29 }
0x139a   : > { %2556 = vadd.xlane.f32.xlu1 %v4265_v17  ;;  %v2550_v24 = vmul.f32 %v4265_v17, %v4265_v17 }
0x139b   : > { %2566 = vadd.xlane.f32.xlu0 %v2551_v54 }
0x139f   : > { %2564 = vadd.xlane.f32.xlu2 %v2550_v24 }
0x13a2   : > { %2558 = vadd.xlane.f32.xlu1 %v4263_v29 }
0x13af   : > { %1012 = vperm.xlu0 %3146, %v994_v46  }
0x13b7   : > { %1556 = vperm.xlu0 %3146, %v2930_v27  }
0x13bf   : > { %2107 = vperm.xlu0 %3146, %v2981_v28  }
0x13c7   : > { %2646 = vperm.xlu0 %3146, %v3030_v15  }
0x13cf   : > { %2723 = vperm.xlu0 %3146, %v2709_v31  }
0x13fc   : > { %v2555_v45 = vpop.xlane.xlu0 %2554 }
0x13fd   : > { %v2569_v38 = vsel %vm412_vm0, %v2555_v45, 0.0 }
0x1402   : > { %v2553_v33 = vpop.xlane.xlu2 %2552 }
0x1403   : > { %v2568_v40 = vsel %vm412_vm0, %v2553_v33, 0.0 }
0x1404   : > { %v2563_v35 = vpop.xlane.xlu0 %2562  ;;  %v2570_v44 = vadd.f32 %v2569_v38, %v2568_v40  ;;  %v3024_v38 = vld [vmem:[%s4398_s5 + $0x60] sm:$0xff] }
0x1405   : > { %v2586_v41 = vsel %vm412_vm0, %v2563_v35, 0.0 }
0x140a   : > { %v2561_v36 = vpop.xlane.xlu2 %2560 }
0x140b   : > { %v2585_v37 = vsel %vm412_vm0, %v2561_v36, 0.0 }
0x140c   : > { %v2587_v23 = vadd.f32 %v2586_v41, %v2585_v37 }
0x140d   : > { %v2557_v30 = vpop.xlane.xlu1 %2556 }
0x140e   : > { %v2571_v4 = vsel %vm412_vm0, %v2557_v30, 0.0  ;;  %v2567_v61 = vpop.xlane.xlu0 %2566 }
0x140f   : > { %v2572_v49 = vadd.f32 %v2571_v4, %v2570_v44  ;;  %v2590_v50 = vsel %vm412_vm0, %v2567_v61, 0.0 }
0x1412   : > { %v2565_v47 = vpop.xlane.xlu2 %2564 }
0x1413   : > { %v2588_v48 = vsel %vm412_vm0, %v2565_v47, 0.0 }
0x1414   : > { %v2589_v3 = vadd.f32 %v2588_v48, %v2587_v23 }
0x1415   : > { %v2559_v52 = vpop.xlane.xlu1 %2558 }
0x1416   : > { %v2591_v53 = vadd.f32 %v2590_v50, %v2589_v3  ;;  %v2573_v7 = vsel %vm412_vm0, %v2559_v52, 0.0  ;;  %v2145_v3 = vpop.f32.mrf.mxu3 }
0x1417   : > { %v2574_v16 = vadd.f32 %v2573_v7, %v2572_v49 }
0x1418   : > { %2592 = vadd.xlane.f32.xlu2 %v2591_v53 }
0x1419   : > { %2575 = vadd.xlane.f32.xlu1 %v2574_v16 }
0x1421   : > { %v1013_v23 = vpop.permute.xlu0 %1012 }
0x1429   : > { %v1557_v61 = vpop.permute.xlu0 %1556 }
0x1430   : > { %1007 = vperm.xlu2 %3148, %v993_v26   ;;  %v1055_v26 = vadd.f32 %v4108_v63, %v1013_v23 }
0x1431   : > { %v2108_v49 = vpop.permute.xlu0 %2107 }
0x1432   : > { %1561 = vperm.xlu1 %3147, %v2931_v55  }
0x1438   : > { %2102 = vperm.xlu2 %3148, %v2980_v56  }
0x143a   : > { %2651 = vperm.xlu1 %3147, %v3031_v42   ;;  %v2148_v42 = vpop.f32.mrf.mxu3 }
0x1440   : > { %2713 = vperm.xlu2 %3148, %v2707_v60   ;;  %v2647_v60 = vpop.permute.xlu0 %2646 }
0x1442   : > { %2718 = vperm.xlu1 %3147, %v2708_v43  }
0x1448   : > { %2728 = vperm.xlu2 %3148, %v2710_v51  }
0x148b   : > { %v2593_v58 = vpop.xlane.xlu2 %2592 }
0x148c   : > { %v2594_v59 = vrot.slane %v2593_v58, 4  ;;  %v2576_v25 = vpop.xlane.xlu1 %2575 }
0x148d   : > { %v2577_v5 = vrot.slane %v2576_v25, 4 }
0x148e   : > { %v2595_v13 = vadd.f32 %v2594_v59, %v2593_v58  ;;  %v2149_v59 = vadd.f32 %v2148_v42, %v2108_v49 }
0x148f   : > { %v2578_v1 = vadd.f32 %v2577_v5, %v2576_v25 }
0x1490   : > { %v2596_v6 = vrot.slane %v2595_v13, 2 }
0x1491   : > { %v2579_v10 = vrot.slane %v2578_v1, 2 }
0x1492   : > { %v2597_v11 = vadd.f32 %v2596_v6, %v2595_v13 }
0x1493   : > { %v2580_v12 = vadd.f32 %v2579_v10, %v2578_v1  ;;  %v1008_v44 = vpop.permute.xlu2 %1007 }
0x1494   : > { %v2598_v14 = vrot.slane %v2597_v11, 1  ;;  %v1052_v7 = vadd.f32 %v4106_v62, %v1008_v44 }
0x1495   : > { %v2581_v21 = vrot.slane %v2580_v12, 1 }
0x1496   : > { %v2599_v18 = vadd.f32 %v2598_v14, %v2597_v11  ;;  %v2698_v11 = vstv %s2695_s17  ;;  %s394_s17 = scalar_lea.vmem [#allocation6], %s2872_s16 }
0x1497   : > { %v2582_v9 = vadd.f32 %v2581_v21, %v2580_v12  ;;  %v2703_v21 = vld [vmem:[%s4402_s9] sm:$0xff]  ;;  %s2789_s15 = sshll.u32 %s394_s17, 4  ;;  %s2790_s15 = int_to_ptr.vmem [resolvable:$true] %s2789_s15 }
0x1499   : > { %3083 = vpush %v2582_v9  ;;  %v2704_v9 = vld [vmem:[%s4402_s9 + $0x8] sm:$0xff] }
0x149a   : > { %3085 = vpush %v2599_v18 }
0x149b   : > { %v2103_v52 = vpop.permute.xlu2 %2102 }
0x149c   : > { %v2146_v56 = vadd.f32 %v2145_v3, %v2103_v52 }
0x14a4   : > { %v1562_v50 = vpop.permute.xlu1 %1561 }
0x14ac   : > { %v2652_v5 = vpop.permute.xlu1 %2651 }
0x14ca   : > { %s3084_s18 = spop %3083 }
0x14cb   : > { %v2584_v57 = vstv %s3084_s18  ;;  %s3086_s23 = spop %3085  ;;  %s3046_s18 = sshll.u32 %s3348_s8, 5 }
0x14cc   : > { %v2602_v19 = vmul.f32 %v2584_v57, %v3496_v22  ;;  %v2601_v0 = vstv %s3086_s23  ;;  %v2705_v57 = vld [vmem:[%s4402_s9 + $0x10] sm:$0xff]  ;;  %s2788_s30 = scalar_lea.hbm %s4404_s11, %s3046_s18  ;;  %s3206_s18 = scalar_lea.hbm %s4404_s11, 64 }
0x14cd   : > { %v2603_v20 = vmul.f32 %v2601_v0, %v3496_v22  ;;  %v2714_v0 = vpop.permute.xlu2 %2713  ;;  %s2791_s12 = sshll.u32 %s2788_s30, 4  ;;  %s2792_s12 = int_to_ptr.hbm [resolvable:$true] %s2791_s12 }
0x14ce   : > { %v2604_v8 = vmul.f32 %v2602_v19, %v2602_v19  ;;  %v2621_v33 = vsub.f32 %v4263_v29, %v2602_v19  ;;  %v2620_v22 = vsub.f32 %v4265_v17, %v2602_v19  ;;  %v2619_v30 = vsub.f32 %v4243_v32, %v2602_v19  ;;  %v3025_v29 = vld [vmem:[%s4398_s5 + $0x68] sm:$0xff]  ;;  %v3026_v32 = vld [vmem:[%s4398_s5 + $0x70] sm:$0xff]  ;;  %v1599_v17 = vpop.f32.mrf.mxu0  ;;  %s3200_s14 = sshra.s32 %s2792_s12, 4  ;;  %s3201_s14 = int_to_ptr.hbm [resolvable:$true] %s3200_s14 }
0x14cf   : > { %v2618_v40 = vsub.f32 %v4255_v2, %v2602_v19  ;;  %v3027_v2 = vld [vmem:[%s4398_s5 + $0x78] sm:$0xff]  ;;  %v1600_v55 = vadd.f32 %v1599_v17, %v1557_v61  ;;  %s3202_s16 = scalar_lea.hbm %s3201_s14, 32  ;;  %p3207_p3 = scmp.lt.s32.totalorder %s3201_s14, %s4404_s11 }
0x14d0   : > { %v2605_v39 = vsub.f32 %v2603_v20, %v2604_v8  ;;  %v2706_v19 = vld [vmem:[%s4402_s9 + $0x18] sm:$0xff]  ;;  %p3203_p0 = scmp.ne.s32.totalorder %s3201_s14, %s3202_s16  ;;  %p3208_p4 = scmp.lt.s32.totalorder %s3206_s18, %s3202_s16 }
0x14d1   : > { %v1607_v43 = vadd.f32 %v1600_v55, %v1052_v7 }
0x14d2   : > { %v2606_v54 = vmax.f32 %v2605_v39, 0.0  ;;  %v2719_v39 = vpop.permute.xlu1 %2718  ;;  %p3204_p1 = pnand %p3203_p0, %p3365_p5  ;;  %p3209_p7 = por %p3208_p4, %p3207_p3 }
0x14d3   : > { %v2153_v25 = vadd.f32 %v2146_v56, %v1607_v43 }
0x14d4   : > { %v2607_v24 = vadd.f32 1e-08, %v2606_v54  ;;  %p3205_p2 = pneg %p3204_p1 }
0x14d6   : > { %3169 = vrsqrt.f32 %v2607_v24  ;;  %vm2614_vm15 = vweird.f32 %v2607_v24  ;;  %v1602_v4 = vpop.f32.mrf.mxu0  ;;  %p3210_p8 = pnand %p3209_p7, %p3205_p2 }
0x14d7   : > { %v1603_v16 = vadd.f32 %v1602_v4, %v1562_v50 }
0x14d9   : > { %v1608_v51 = vadd.f32 %v1603_v16, %v1055_v26 }
0x14db   : > { %v2154_v6 = vadd.f32 %v2149_v59, %v1608_v51 }
0x14dc   : > { %v3170_v46 = vpop.eup %3169 }
0x14dd   : > { %v2609_v27 = vmul.f32 %v3170_v46, %v2607_v24  ;;  %vm2615_vm0 = vweird.f32 %v3170_v46 }
0x14de   : > { %vm2616_vm1 = vmor %vm2614_vm15, %vm2615_vm0 }
0x14df   : > { %v2610_v28 = vmul.f32 %v3170_v46, %v2609_v27 }
0x14e1   : > { %v2611_v15 = vmul.f32 0.5, %v2610_v28 }
0x14e3   : > { %v2612_v31 = vsub.f32 1.5, %v2611_v15  ;;  %v2729_v15 = vpop.permute.xlu2 %2728 }
0x14e5   : > { %v2613_v45 = vmul.f32 %v3170_v46, %v2612_v31 }
0x14e7   : > { %v2617_v34 = vsel %vm2616_vm1, %v3170_v46, %v2613_v45  ;;  %v2724_v46 = vpop.permute.xlu0 %2723 }
0x14e8   : > { %v2625_v35 = vmul.f32 %v2621_v33, %v2617_v34  ;;  %v2624_v36 = vmul.f32 %v2620_v22, %v2617_v34  ;;  %v2623_v37 = vmul.f32 %v2619_v30, %v2617_v34  ;;  %v2622_v41 = vmul.f32 %v2618_v40, %v2617_v34 }
0x14ea   : > { %2678 = vmatpush.msra.mxu0 %v2625_v35 }
0x14ec   : > { %2679 = vmatpush.msra.mxu0 %v2624_v36 }
0x14ee   : > { %2680 = vmatpush.msra.mxu0 %v2623_v37 }
0x14f0   : > { %2681 = vmatpush.msra.mxu0 %v2622_v41 }
0x14f1   : > { %3032 = vmatmul.msk.f32.vlgmr.msra.gmra.mxu0 %vm1015_vm8, %v3024_v38 }
0x14f9   : > { %3033 = vmatmul.msk.f32.gmra.mxu0 %vm1015_vm8, %v3025_v29 }
0x1501   : > { %3034 = vmatmul.msk.f32.gmra.mxu0 %vm1015_vm8, %v3026_v32 }
0x1509   : > { %3035 = vmatmul.msk.f32.gmra.mxu0 %vm1015_vm8, %v3027_v2 }
0x156e   : > { %v2683_v47 = vpop.f32.mrf.mxu0 }
0x1576   : > { %v2685_v48 = vpop.f32.mrf.mxu0 }
0x157e   : > { %v2687_v53 = vpop.f32.mrf.mxu0 }
0x157f   : > { %v2688_v58 = vadd.f32 %v2687_v53, %v2647_v60 }
0x1581   : > { %v2693_v1 = vadd.f32 %v2688_v58, %v2153_v25 }
0x1583   : > { %v2699_v63 = vmul.f32 %v2698_v11, %v2693_v1  ;;  %vm2696_vm4 = vcmp.ge.f32.partialorder %v2693_v1, 0.0 }
0x1585   : > { %v2701_v18 = vsel %vm2696_vm4, %v2693_v1, %v2699_v63 }
0x1586   : > { %v2690_v13 = vpop.f32.mrf.mxu0 }
0x1587   : > { %v2691_v10 = vadd.f32 %v2690_v13, %v2652_v5 }
0x1589   : > { %v2694_v62 = vadd.f32 %v2691_v10, %v2154_v6 }
0x158b   : > { %v2700_v12 = vmul.f32 %v2698_v11, %v2694_v62  ;;  %vm2697_vm8 = vcmp.ge.f32.partialorder %v2694_v62, 0.0 }
0x158d   : > { %v2702_v14 = vsel %vm2697_vm8, %v2694_v62, %v2700_v12 }
0x158e   : > { %2757 = vmatpush.msra.mxu1 %v2702_v14 }
0x1590   : > { %2758 = vmatpush.msra.mxu1 %v2701_v18 }
0x1591   : > { %3036 = vmatmul.msk.f32.vlgmr.msra.gmra.mxu1 %vm480_vm5, %v2703_v21 }
0x1599   : > { %3037 = vmatmul.msk.f32.gmra.mxu1 %vm480_vm5, %v2704_v9 }
0x15a1   : > { %3038 = vmatmul.msk.f32.gmra.mxu1 %vm480_vm5, %v2705_v57 }
0x15a9   : > { %3039 = vmatmul.msk.f32.gmra.mxu1 %vm480_vm5, %v2706_v19 }
0x160e   : > { %v2760_v20 = vpop.f32.mrf.mxu1 }
0x160f   : > { %v2761_v8 = vadd.f32 %v2760_v20, %v2714_v0 }
0x1611   : > { %2772 = vst [vmem:[%s394_s17] sm:$0xff] %v2761_v8 }
0x1616   : > { %v2763_v54 = vpop.f32.mrf.mxu1 }
0x1617   : > { %v2764_v24 = vadd.f32 %v2763_v54, %v2719_v39 }
0x1619   : > { %2773 = vst [vmem:[%s394_s17 + $0x8] sm:$0xff] %v2764_v24 }
0x161e   : > { %v2766_v27 = vpop.f32.mrf.mxu1 }
0x161f   : > { %v2767_v28 = vadd.f32 %v2766_v27, %v2724_v46 }
0x1621   : > { %2774 = vst [vmem:[%s394_s17 + $0x10] sm:$0xff] %v2767_v28 }
0x1626   : > { %v2769_v31 = vpop.f32.mrf.mxu1 }
0x1627   : > { %v2770_v45 = vadd.f32 %v2769_v31, %v2729_v15 }
0x1629   : > { %2775 = vst [vmem:[%s394_s17 + $0x18] sm:$0xff] %v2770_v45 }
0x162a   : > { %3213 = shalt.err (!%p3210_p8)
}
0x162b   : > { %s3262_s26 = smov 128   ;;  %s3263_s17 = smov 8  }
0x162c   : > { %3091 = dma.vmem_to_hbm [thread:$0]  (%p3365_p5), %s2790_s15, 512, %s2792_s12, %s2777_s13, %s3262_s26, %s3262_s26, %s3263_s17  }
0x162d PF: > { %p3103_p9 = scmp.ge.s32.totalorder %s3252_s22, 2  ;;  %s2806_s0 = sand.u32 1, %s3240_s19  }
0x162e   : > { %s2807_s30 = scalar_lea.sflag [#allocation4], %s2806_s0 }
0x162f   : > { %p3098_p10 = pnand %p3103_p9, %p3369_p6 }
0x1631   : > { %p3099_p11 = pneg %p3098_p10 }
0x1633   : > { %3235 = dma.done.wait (%p3099_p11), %s2807_s30, 512  }
0x1634   : > { %3237 = vsyncadd (%p3099_p11), %s2807_s30, 4294966784  ;;  %p23_p12 = scmp.ge.s32.totalorder %s3352_s24, 4   ;;  %s4418_s19 = smov %s3244_s20 }
0x1635   : > { %s4419_s20 = smov %s3248_s21  ;;  %s4420_s21 = smov %s3363_s27 }
0x1636   : > { %s4421_s22 = smov %s3352_s24  ;;  %25 = sbr.rel (!%p23_p12) target bundleno = 7 (0x7), region = 116 }
0x163b   :  { %2813 = vsyncpa [#allocation4], 1 }
0x163c   :  { %2815 = vsyncpa [#allocation4 + $0x1], 1 }
0x163d   :  { %2816 = vsyncpa [#allocation5], 1 }
0x163e   :  { %2818 = vsyncpa [#allocation5 + $0x1], 1 }

</bundles_post_ra>
